<compile_context>
chip_gen: v5e
topology: v5e:2x2
jax: 0.10.0
libtpu: 0.0.40
codegen_flags: <defaults>
</compile_context>

<pallas_src>
import math

import jax
import jax.numpy as jnp
from jax.experimental import pallas as pl
from jax.experimental.pallas import tpu as pltpu


def make_deepar_kernel(Bt, T, D, H, O):
    """Builds the Pallas kernel for fixed (Bt=batch tile, T, D, H, O)."""
    G = 4 * H      # gate width per direction
    G2 = 8 * H     # fused fwd+rev gate width

    def kernel(x_ref,
               wih0_ref, whh0_ref, b0_ref,     # layer 0: (D, 8H), (2H, 8H), (1, 8H)
               wih1_ref, whh1_ref, b1_ref,     # layer 1: (2H, 8H), (2H, 8H), (1, 8H)
               attn_w_ref, attn_b_ref,         # (2H, 2H), (1, 2H)
               head_w_ref, head_b_ref,         # fused mu|sigma head: (2H, 2O), (1, 2O)
               mu_out_ref, sig_out_ref,        # (Bt, O), (Bt, O)
               cat0_ref, cat1_ref,             # (Bt, T, 2H) scratch: per-layer outputs
               xp_ref):                        # (Bt, T, 8H) scratch: fused input projection

        def time_loop(body, init):
            # Small static T -> full unroll (no loop overhead, scheduler can
            # interleave the fwd/rev chains). Longer sequences: partially
            # unrolled fori_loop keeps cross-iteration ILP visible.
            if T <= 16:
                carry = init
                for i in range(T):
                    carry = body(i, carry)
                return carry
            return jax.lax.fori_loop(0, T, body, init, unroll=2)

        def run_layer(in_ref, din, wih_ref, whh_ref, b_ref, out_ref):
            # ---- hoisted, direction-fused input projection: ONE matmul per layer ----
            flat = in_ref[...].reshape(Bt * T, din)
            xp_ref[...] = (jnp.dot(flat, wih_ref[...],
                                   preferred_element_type=jnp.float32)
                           + b_ref[...]).reshape(Bt, T, G2)
            whh = whh_ref[...]        # block-diag [whh_f 0; 0 whh_r] -> (2H, 8H)

            def body(i, carry):
                h_cat, c_f, c_r = carry
                t_r = T - 1 - i
                # ONE recurrence matmul covers both directions (contraction 2H).
                rec = jnp.dot(h_cat, whh, preferred_element_type=jnp.float32)
                xp_f = xp_ref[:, pl.ds(i, 1), 0:G].reshape(Bt, G)      # fwd @ t=i
                xp_r = xp_ref[:, pl.ds(t_r, 1), G:G2].reshape(Bt, G)   # rev @ t=T-1-i
                gates = jnp.concatenate([xp_f, xp_r], axis=1) + rec    # (Bt, 8H)
                # PyTorch gate order per direction: i, f, g, o.
                sig = jax.nn.sigmoid(gates)      # one EUP pass for both directions
                # forward chain
                c_f = (sig[:, H:2 * H] * c_f
                       + sig[:, 0:H] * jnp.tanh(gates[:, 2 * H:3 * H]))
                h_f = sig[:, 3 * H:4 * H] * jnp.tanh(c_f)
                # reverse chain
                c_r = (sig[:, 5 * H:6 * H] * c_r
                       + sig[:, 4 * H:5 * H] * jnp.tanh(gates[:, 6 * H:7 * H]))
                h_r = sig[:, 7 * H:8 * H] * jnp.tanh(c_r)
                # write directly into lane-slices of the shared (Bt, T, 2H) buffer
                out_ref[:, pl.ds(i, 1), 0:H] = h_f.reshape(Bt, 1, H)
                out_ref[:, pl.ds(t_r, 1), H:2 * H] = h_r.reshape(Bt, 1, H)
                return (jnp.concatenate([h_f, h_r], axis=1), c_f, c_r)

            h0 = jnp.zeros((Bt, 2 * H), jnp.float32)   # h0 = 0 (both directions)
            c0 = jnp.zeros((Bt, H), jnp.float32)       # c0 = 0
            time_loop(body, (h0, c0, c0))

        # --- LSTM layer 0 (input width D) ---
        run_layer(x_ref, D, wih0_ref, whh0_ref, b0_ref, cat0_ref)

        # --- LSTM layer 1 (input width 2H) ---
        # TODO(synk): inter-layer dropout applies only in training mode; eval semantics here.
        run_layer(cat0_ref, 2 * H, wih1_ref, whh1_ref, b1_ref, cat1_ref)

        lstm_out = cat1_ref[...]                                      # (Bt, T, 2H)

        # --- Attention: softmax(Linear(lstm_out), dim=seq); weighted sum over seq ---
        flat = lstm_out.reshape(Bt * T, 2 * H)
        logits = (jnp.dot(flat, attn_w_ref[...],
                          preferred_element_type=jnp.float32)
                  + attn_b_ref[...]).reshape(Bt, T, 2 * H)
        m = jnp.max(logits, axis=1, keepdims=True)
        e = jnp.exp(logits - m)
        num = jnp.sum(e * lstm_out, axis=1)                           # (Bt, 2H)
        den = jnp.sum(e, axis=1)                                      # (Bt, 2H)
        context = num / den                                           # divide once, small

        # --- Fused mu|sigma head: one matmul, slice the result ---
        head = (jnp.dot(context, head_w_ref[...],
                        preferred_element_type=jnp.float32) + head_b_ref[...])
        mu = head[:, 0:O]
        presig = head[:, O:2 * O]
        # numerically-stable softplus (log(1+exp(x)) overflows for x >~ 88)
        sigma = jnp.maximum(presig, 0.0) + jnp.log(1.0 + jnp.exp(-jnp.abs(presig)))

        mu_out_ref[...] = mu
        sig_out_ref[...] = sigma

    return kernel


def _estimate_vmem_bytes(Bt, T, D, H, O):
    f32 = 4
    scratch = Bt * T * (2 * H + 2 * H + 8 * H) * f32       # cat0 + cat1 + fused xp
    x_blocks = 2 * Bt * T * D * f32                        # double-buffered input blocks
    outs = 2 * 2 * Bt * O * f32                            # double-buffered outputs
    weights = (D * 8 * H + 2 * H * 8 * H + 8 * H           # layer 0
               + 2 * H * 8 * H + 2 * H * 8 * H + 8 * H     # layer 1
               + 2 * H * 2 * H + 2 * H                     # attention
               + 2 * H * 2 * O + 2 * O) * f32              # fused head
    return scratch + x_blocks + outs + weights


def _pick_batch_tile(B, T, D, H, O, vmem_budget=40 << 20):
    """Large MXU-filling tile, >=2 grid steps when possible, within VMEM budget."""
    if B % 8 != 0:
        return B
    bt, t = 8, 8
    while t <= min(B, 256):          # biggest power-of-two multiple of 8 dividing B
        if B % t == 0:
            bt = t
        t *= 2
    # guarantee >=2 grid steps so v7x's two TensorCores both get work
    if bt == B and B >= 16 and (B // 2) % 8 == 0:
        bt = B // 2
    # shrink until the footprint fits (v7x: 64 MiB physical / 32 MiB default scoped)
    while (bt >= 16 and bt % 16 == 0 and B % (bt // 2) == 0
           and _estimate_vmem_bytes(bt, T, D, H, O) > vmem_budget):
        bt //= 2
    return bt


def deepar_forward(x, params, *, hidden_size, output_size, batch_tile=None):
    B, T, D = x.shape
    H, O = hidden_size, output_size

    if batch_tile is None:
        batch_tile = _pick_batch_tile(B, T, D, H, O)
    Bt = batch_tile
    assert B % Bt == 0, "batch_tile must divide batch size"
    grid = (B // Bt,)

    kernel = make_deepar_kernel(Bt, T, D, H, O)

    args = (x,
            params["wih0"], params["whh0"], params["b0"],
            params["wih1"], params["whh1"], params["b1"],
            params["attn_w"], params["attn_b"],
            params["head_w"], params["head_b"])

    vmem_whole = pl.BlockSpec(memory_space=pltpu.MemorySpace.VMEM)   # small weights: whole array
    in_specs = ([pl.BlockSpec((Bt, T, D), lambda b: (b, 0, 0))]
                + [vmem_whole] * (len(args) - 1))
    out_specs = (pl.BlockSpec((Bt, O), lambda b: (b, 0)),
                 pl.BlockSpec((Bt, O), lambda b: (b, 0)))
    out_shape = (jax.ShapeDtypeStruct((B, O), jnp.float32),
                 jax.ShapeDtypeStruct((B, O), jnp.float32))

    vmem_limit = int(min(48 << 20,
                         max(16 << 20, 2 * _estimate_vmem_bytes(Bt, T, D, H, O))))

    mu, sigma = pl.pallas_call(
        kernel,
        grid=grid,
        out_shape=out_shape,
        in_specs=in_specs,
        out_specs=out_specs,
        scratch_shapes=[pltpu.VMEM((Bt, T, 2 * H), jnp.float32),    # cat0: layer-0 out / layer-1 in
                        pltpu.VMEM((Bt, T, 2 * H), jnp.float32),    # cat1: lstm_out
                        pltpu.VMEM((Bt, T, 8 * H), jnp.float32)],   # xp: fused fwd|rev projection
        compiler_params=pltpu.CompilerParams(
            dimension_semantics=("parallel",),
            vmem_limit_bytes=vmem_limit),
    )(*args)
    return mu, sigma


def init_deepar_params(key, input_size, hidden_size, output_size):
    """PyTorch-style init, packed host-side into the direction-fused kernel layout."""
    D = input_size * 2
    H = hidden_size
    O = output_size
    keys = iter(jax.random.split(key, 64))

    def uni(shape, bound):
        return jax.random.uniform(next(keys), shape, jnp.float32, -bound, bound)

    k_lstm = 1.0 / math.sqrt(H)

    def lstm_layer(in_dim):
        pieces = []
        for _ in range(2):  # forward, reverse directions
            w_ih = uni((4 * H, in_dim), k_lstm).T          # PyTorch weight_ih -> (in, 4H)
            w_hh = uni((4 * H, H), k_lstm).T               # PyTorch weight_hh -> (H, 4H)
            b = (uni((4 * H,), k_lstm) + uni((4 * H,), k_lstm)).reshape(1, 4 * H)
            pieces.append((w_ih, w_hh, b))
        (wih_f, whh_f, b_f), (wih_r, whh_r, b_r) = pieces
        # direction-fused layouts: one projection matmul + one block-diag recurrence matmul
        wih_cat = jnp.concatenate([wih_f, wih_r], axis=1)              # (in, 8H)
        b_cat = jnp.concatenate([b_f, b_r], axis=1)                    # (1, 8H)
        whh_blk = jnp.zeros((2 * H, 8 * H), jnp.float32)
        whh_blk = whh_blk.at[0:H, 0:4 * H].set(whh_f)
        whh_blk = whh_blk.at[H:2 * H, 4 * H:8 * H].set(whh_r)          # block-diagonal
        return wih_cat, whh_blk, b_cat

    wih0, whh0, b0 = lstm_layer(D)
    wih1, whh1, b1 = lstm_layer(2 * H)

    k_lin = 1.0 / math.sqrt(2 * H)
    attn_w = uni((2 * H, 2 * H), k_lin).T
    attn_b = uni((2 * H,), k_lin).reshape(1, 2 * H)
    mu_w = uni((O, 2 * H), k_lin).T
    mu_b = uni((O,), k_lin).reshape(1, O)
    sig_w = uni((O, 2 * H), k_lin).T
    sig_b = uni((O,), k_lin).reshape(1, O)
    head_w = jnp.concatenate([mu_w, sig_w], axis=1)     # fused mu|sigma head (2H, 2O)
    head_b = jnp.concatenate([mu_b, sig_b], axis=1)     # (1, 2O)

    # TODO(synk): optionally store weights in bfloat16 (cast up in-kernel) on v6e/v7x to
    # halve weight DMA/VMEM; kept f32 here since v5e has no bf16 VPU/EUP path.
    return dict(wih0=wih0, whh0=whh0, b0=b0,
                wih1=wih1, whh1=whh1, b1=b1,
                attn_w=attn_w, attn_b=attn_b,
                head_w=head_w, head_b=head_b)


if __name__ == "__main__":
    input_size, hidden_size, output_size = 4, 32, 2
    B, T = 2, 8

    key = jax.random.PRNGKey(0)
    kx, kp = jax.random.split(key)
    x = jax.random.normal(kx, (B, T, input_size * 2), jnp.float32)
    params = init_deepar_params(kp, input_size, hidden_size, output_size)

    mu, sigma = deepar_forward(x, params,
                               hidden_size=hidden_size,
                               output_size=output_size)
    jax.block_until_ready((mu, sigma))

    assert mu.shape == (B, output_size) and sigma.shape == (B, output_size)
    assert bool(jnp.all(jnp.isfinite(mu))) and bool(jnp.all(jnp.isfinite(sigma)))
    assert bool(jnp.all(sigma > 0))  # softplus output must be positive
    print("KERNEL_OK")
</pallas_src>

<mosaic_0001>
module attributes {stable_mosaic.version = 11 : i64} {
  func.func @kernel(%arg0: i32, %arg1: memref<2x8x8xf32, #tpu.memory_space<vmem>>, %arg2: memref<8x256xf32, #tpu.memory_space<vmem>>, %arg3: memref<64x256xf32, #tpu.memory_space<vmem>>, %arg4: memref<1x256xf32, #tpu.memory_space<vmem>>, %arg5: memref<64x256xf32, #tpu.memory_space<vmem>>, %arg6: memref<64x256xf32, #tpu.memory_space<vmem>>, %arg7: memref<1x256xf32, #tpu.memory_space<vmem>>, %arg8: memref<64x64xf32, #tpu.memory_space<vmem>>, %arg9: memref<1x64xf32, #tpu.memory_space<vmem>>, %arg10: memref<64x4xf32, #tpu.memory_space<vmem>>, %arg11: memref<1x4xf32, #tpu.memory_space<vmem>>, %arg12: memref<2x2xf32, #tpu.memory_space<vmem>>, %arg13: memref<2x2xf32, #tpu.memory_space<vmem>>, %arg14: memref<2x8x64xf32, #tpu.memory_space<vmem>>, %arg15: memref<2x8x64xf32, #tpu.memory_space<vmem>>, %arg16: memref<2x8x256xf32, #tpu.memory_space<vmem>>) attributes {dimension_semantics = [#tpu.dimension_semantics<parallel>], iteration_bounds = array<i64: 1>, scalar_prefetch = 0 : i64, scratch_operands = 3 : i64, tpu.core_type = #tpu.core_type<tc>, window_params = [{transform_indices = @transform_0, window_bounds = array<i64: 2, 8, 8>}, {pipeline_mode = #tpu.pipeline_mode<synchronous>, transform_indices = @transform_1, window_bounds = array<i64: 8, 256>}, {pipeline_mode = #tpu.pipeline_mode<synchronous>, transform_indices = @transform_2, window_bounds = array<i64: 64, 256>}, {pipeline_mode = #tpu.pipeline_mode<synchronous>, transform_indices = @transform_3, window_bounds = array<i64: 1, 256>}, {pipeline_mode = #tpu.pipeline_mode<synchronous>, transform_indices = @transform_4, window_bounds = array<i64: 64, 256>}, {pipeline_mode = #tpu.pipeline_mode<synchronous>, transform_indices = @transform_5, window_bounds = array<i64: 64, 256>}, {pipeline_mode = #tpu.pipeline_mode<synchronous>, transform_indices = @transform_6, window_bounds = array<i64: 1, 256>}, {pipeline_mode = #tpu.pipeline_mode<synchronous>, transform_indices = @transform_7, window_bounds = array<i64: 64, 64>}, {pipeline_mode = #tpu.pipeline_mode<synchronous>, transform_indices = @transform_8, window_bounds = array<i64: 1, 64>}, {pipeline_mode = #tpu.pipeline_mode<synchronous>, transform_indices = @transform_9, window_bounds = array<i64: 64, 4>}, {pipeline_mode = #tpu.pipeline_mode<synchronous>, transform_indices = @transform_10, window_bounds = array<i64: 1, 4>}, {transform_indices = @transform_11, window_bounds = array<i64: 2, 2>}, {transform_indices = @transform_12, window_bounds = array<i64: 2, 2>}]} {
    %c0 = arith.constant 0 : index
    %c0_0 = arith.constant 0 : index
    %c0_1 = arith.constant 0 : index
    %0 = vector.load %arg1[%c0, %c0_0, %c0_1] : memref<2x8x8xf32, #tpu.memory_space<vmem>>, vector<2x8x8xf32>
    %1 = vector.shape_cast %0 : vector<2x8x8xf32> to vector<16x8xf32>
    %c0_2 = arith.constant 0 : index
    %c0_3 = arith.constant 0 : index
    %2 = vector.load %arg2[%c0_2, %c0_3] : memref<8x256xf32, #tpu.memory_space<vmem>>, vector<8x256xf32>
    %cst = arith.constant dense<0.000000e+00> : vector<16x256xf32>
    %3 = tpu.matmul %1, %2, %cst {dimension_numbers = #tpu.dot_dimension_numbers<[1], [0], [0], [1], [0, 0, 1, 1], [], []>} : vector<16x8xf32>, vector<8x256xf32>, vector<16x256xf32> -> vector<16x256xf32>
    %c0_4 = arith.constant 0 : index
    %c0_5 = arith.constant 0 : index
    %4 = vector.load %arg4[%c0_4, %c0_5] : memref<1x256xf32, #tpu.memory_space<vmem>>, vector<1x256xf32>
    %5 = vector.broadcast %4 : vector<1x256xf32> to vector<16x256xf32>
    %6 = arith.addf %3, %5 : vector<16x256xf32>
    %7 = vector.shape_cast %6 : vector<16x256xf32> to vector<2x8x256xf32>
    %c0_6 = arith.constant 0 : index
    %c0_7 = arith.constant 0 : index
    %c0_8 = arith.constant 0 : index
    %8 = vector.load %arg16[%c0_6, %c0_7, %c0_8] : memref<2x8x256xf32, #tpu.memory_space<vmem>>, vector<2x8x256xf32>
    tpu.vector_store %arg16[%c0_6, %c0_7, %c0_8], %7 {strides = array<i32>} : memref<2x8x256xf32, #tpu.memory_space<vmem>>, vector<2x8x256xf32>,
    %c0_9 = arith.constant 0 : index
    %c0_10 = arith.constant 0 : index
    %9 = vector.load %arg3[%c0_9, %c0_10] : memref<64x256xf32, #tpu.memory_space<vmem>>, vector<64x256xf32>
    %cst_11 = arith.constant 0.000000e+00 : f32
    %10 = vector.broadcast %cst_11 : f32 to vector<2x64xf32>
    %cst_12 = arith.constant 0.000000e+00 : f32
    %11 = vector.broadcast %cst_12 : f32 to vector<2x32xf32>
    %cst_13 = arith.constant dense<0.000000e+00> : vector<2x256xf32>
    %12 = tpu.matmul %10, %9, %cst_13 {dimension_numbers = #tpu.dot_dimension_numbers<[1], [0], [0], [1], [0, 0, 1, 1], [], []>} : vector<2x64xf32>, vector<64x256xf32>, vector<2x256xf32> -> vector<2x256xf32>
    %c0_14 = arith.constant 0 : index
    %c0_15 = arith.constant 0 : index
    %c0_16 = arith.constant 0 : index
    %13 = vector.load %arg16[%c0_14, %c0_15, %c0_16] : memref<2x8x256xf32, #tpu.memory_space<vmem>>, vector<2x1x128xf32>
    %14 = vector.shape_cast %13 : vector<2x1x128xf32> to vector<2x128xf32>
    %c0_17 = arith.constant 0 : index
    %c7 = arith.constant 7 : index
    %c128 = arith.constant 128 : index
    %15 = vector.load %arg16[%c0_17, %c7, %c128] : memref<2x8x256xf32, #tpu.memory_space<vmem>>, vector<2x1x128xf32>
    %16 = vector.shape_cast %15 : vector<2x1x128xf32> to vector<2x128xf32>
    %17 = tpu.concatenate %14, %16 in 1 : vector<2x128xf32>, vector<2x128xf32> -> vector<2x256xf32>
    %18 = arith.addf %17, %12 : vector<2x256xf32>
    %19 = arith.negf %18 : vector<2x256xf32>
    %20 = math.exp %19 : vector<2x256xf32>
    %cst_18 = arith.constant 1.000000e+00 : f32
    %21 = vector.broadcast %cst_18 : f32 to vector<2x256xf32>
    %22 = arith.addf %21, %20 : vector<2x256xf32>
    %23 = arith.divf %21, %22 : vector<2x256xf32>
    %24 = vector.extract_strided_slice %23 {offsets = [0, 32], sizes = [2, 32], strides = [1, 1]} : vector<2x256xf32> to vector<2x32xf32>
    %25 = arith.mulf %24, %11 : vector<2x32xf32>
    %26 = vector.extract_strided_slice %23 {offsets = [0, 0], sizes = [2, 32], strides = [1, 1]} : vector<2x256xf32> to vector<2x32xf32>
    %27 = vector.extract_strided_slice %18 {offsets = [0, 64], sizes = [2, 32], strides = [1, 1]} : vector<2x256xf32> to vector<2x32xf32>
    %28 = math.tanh %27 : vector<2x32xf32>
    %29 = arith.mulf %26, %28 : vector<2x32xf32>
    %30 = arith.addf %25, %29 : vector<2x32xf32>
    %31 = vector.extract_strided_slice %23 {offsets = [0, 96], sizes = [2, 32], strides = [1, 1]} : vector<2x256xf32> to vector<2x32xf32>
    %32 = math.tanh %30 : vector<2x32xf32>
    %33 = arith.mulf %31, %32 : vector<2x32xf32>
    %34 = vector.extract_strided_slice %23 {offsets = [0, 160], sizes = [2, 32], strides = [1, 1]} : vector<2x256xf32> to vector<2x32xf32>
    %35 = arith.mulf %34, %11 : vector<2x32xf32>
    %36 = vector.extract_strided_slice %23 {offsets = [0, 128], sizes = [2, 32], strides = [1, 1]} : vector<2x256xf32> to vector<2x32xf32>
    %37 = vector.extract_strided_slice %18 {offsets = [0, 192], sizes = [2, 32], strides = [1, 1]} : vector<2x256xf32> to vector<2x32xf32>
    %38 = math.tanh %37 : vector<2x32xf32>
    %39 = arith.mulf %36, %38 : vector<2x32xf32>
    %40 = arith.addf %35, %39 : vector<2x32xf32>
    %41 = vector.extract_strided_slice %23 {offsets = [0, 224], sizes = [2, 32], strides = [1, 1]} : vector<2x256xf32> to vector<2x32xf32>
    %42 = math.tanh %40 : vector<2x32xf32>
    %43 = arith.mulf %41, %42 : vector<2x32xf32>
    %44 = vector.shape_cast %33 : vector<2x32xf32> to vector<2x1x32xf32>
    %c0_19 = arith.constant 0 : index
    %c0_20 = arith.constant 0 : index
    %c0_21 = arith.constant 0 : index
    %45 = vector.load %arg14[%c0_19, %c0_20, %c0_21] : memref<2x8x64xf32, #tpu.memory_space<vmem>>, vector<2x1x32xf32>
    tpu.vector_store %arg14[%c0_19, %c0_20, %c0_21], %44 {strides = array<i32>} : memref<2x8x64xf32, #tpu.memory_space<vmem>>, vector<2x1x32xf32>,
    %46 = vector.shape_cast %43 : vector<2x32xf32> to vector<2x1x32xf32>
    %c0_22 = arith.constant 0 : index
    %c7_23 = arith.constant 7 : index
    %c32 = arith.constant 32 : index
    %47 = vector.load %arg14[%c0_22, %c7_23, %c32] : memref<2x8x64xf32, #tpu.memory_space<vmem>>, vector<2x1x32xf32>
    tpu.vector_store %arg14[%c0_22, %c7_23, %c32], %46 {strides = array<i32>} : memref<2x8x64xf32, #tpu.memory_space<vmem>>, vector<2x1x32xf32>,
    %48 = tpu.concatenate %33, %43 in 1 : vector<2x32xf32>, vector<2x32xf32> -> vector<2x64xf32>
    %cst_24 = arith.constant dense<0.000000e+00> : vector<2x256xf32>
    %49 = tpu.matmul %48, %9, %cst_24 {dimension_numbers = #tpu.dot_dimension_numbers<[1], [0], [0], [1], [0, 0, 1, 1], [], []>} : vector<2x64xf32>, vector<64x256xf32>, vector<2x256xf32> -> vector<2x256xf32>
    %c0_25 = arith.constant 0 : index
    %c1 = arith.constant 1 : index
    %c0_26 = arith.constant 0 : index
    %50 = vector.load %arg16[%c0_25, %c1, %c0_26] : memref<2x8x256xf32, #tpu.memory_space<vmem>>, vector<2x1x128xf32>
    %51 = vector.shape_cast %50 : vector<2x1x128xf32> to vector<2x128xf32>
    %c0_27 = arith.constant 0 : index
    %c6 = arith.constant 6 : index
    %c128_28 = arith.constant 128 : index
    %52 = vector.load %arg16[%c0_27, %c6, %c128_28] : memref<2x8x256xf32, #tpu.memory_space<vmem>>, vector<2x1x128xf32>
    %53 = vector.shape_cast %52 : vector<2x1x128xf32> to vector<2x128xf32>
    %54 = tpu.concatenate %51, %53 in 1 : vector<2x128xf32>, vector<2x128xf32> -> vector<2x256xf32>
    %55 = arith.addf %54, %49 : vector<2x256xf32>
    %56 = arith.negf %55 : vector<2x256xf32>
    %57 = math.exp %56 : vector<2x256xf32>
    %cst_29 = arith.constant 1.000000e+00 : f32
    %58 = vector.broadcast %cst_29 : f32 to vector<2x256xf32>
    %59 = arith.addf %58, %57 : vector<2x256xf32>
    %60 = arith.divf %58, %59 : vector<2x256xf32>
    %61 = vector.extract_strided_slice %60 {offsets = [0, 32], sizes = [2, 32], strides = [1, 1]} : vector<2x256xf32> to vector<2x32xf32>
    %62 = arith.mulf %61, %30 : vector<2x32xf32>
    %63 = vector.extract_strided_slice %60 {offsets = [0, 0], sizes = [2, 32], strides = [1, 1]} : vector<2x256xf32> to vector<2x32xf32>
    %64 = vector.extract_strided_slice %55 {offsets = [0, 64], sizes = [2, 32], strides = [1, 1]} : vector<2x256xf32> to vector<2x32xf32>
    %65 = math.tanh %64 : vector<2x32xf32>
    %66 = arith.mulf %63, %65 : vector<2x32xf32>
    %67 = arith.addf %62, %66 : vector<2x32xf32>
    %68 = vector.extract_strided_slice %60 {offsets = [0, 96], sizes = [2, 32], strides = [1, 1]} : vector<2x256xf32> to vector<2x32xf32>
    %69 = math.tanh %67 : vector<2x32xf32>
    %70 = arith.mulf %68, %69 : vector<2x32xf32>
    %71 = vector.extract_strided_slice %60 {offsets = [0, 160], sizes = [2, 32], strides = [1, 1]} : vector<2x256xf32> to vector<2x32xf32>
    %72 = arith.mulf %71, %40 : vector<2x32xf32>
    %73 = vector.extract_strided_slice %60 {offsets = [0, 128], sizes = [2, 32], strides = [1, 1]} : vector<2x256xf32> to vector<2x32xf32>
    %74 = vector.extract_strided_slice %55 {offsets = [0, 192], sizes = [2, 32], strides = [1, 1]} : vector<2x256xf32> to vector<2x32xf32>
    %75 = math.tanh %74 : vector<2x32xf32>
    %76 = arith.mulf %73, %75 : vector<2x32xf32>
    %77 = arith.addf %72, %76 : vector<2x32xf32>
    %78 = vector.extract_strided_slice %60 {offsets = [0, 224], sizes = [2, 32], strides = [1, 1]} : vector<2x256xf32> to vector<2x32xf32>
    %79 = math.tanh %77 : vector<2x32xf32>
    %80 = arith.mulf %78, %79 : vector<2x32xf32>
    %81 = vector.shape_cast %70 : vector<2x32xf32> to vector<2x1x32xf32>
    %c0_30 = arith.constant 0 : index
    %c1_31 = arith.constant 1 : index
    %c0_32 = arith.constant 0 : index
    %82 = vector.load %arg14[%c0_30, %c1_31, %c0_32] : memref<2x8x64xf32, #tpu.memory_space<vmem>>, vector<2x1x32xf32>
    tpu.vector_store %arg14[%c0_30, %c1_31, %c0_32], %81 {strides = array<i32>} : memref<2x8x64xf32, #tpu.memory_space<vmem>>, vector<2x1x32xf32>,
    %83 = vector.shape_cast %80 : vector<2x32xf32> to vector<2x1x32xf32>
    %c0_33 = arith.constant 0 : index
    %c6_34 = arith.constant 6 : index
    %c32_35 = arith.constant 32 : index
    %84 = vector.load %arg14[%c0_33, %c6_34, %c32_35] : memref<2x8x64xf32, #tpu.memory_space<vmem>>, vector<2x1x32xf32>
    tpu.vector_store %arg14[%c0_33, %c6_34, %c32_35], %83 {strides = array<i32>} : memref<2x8x64xf32, #tpu.memory_space<vmem>>, vector<2x1x32xf32>,
    %85 = tpu.concatenate %70, %80 in 1 : vector<2x32xf32>, vector<2x32xf32> -> vector<2x64xf32>
    %cst_36 = arith.constant dense<0.000000e+00> : vector<2x256xf32>
    %86 = tpu.matmul %85, %9, %cst_36 {dimension_numbers = #tpu.dot_dimension_numbers<[1], [0], [0], [1], [0, 0, 1, 1], [], []>} : vector<2x64xf32>, vector<64x256xf32>, vector<2x256xf32> -> vector<2x256xf32>
    %c0_37 = arith.constant 0 : index
    %c2 = arith.constant 2 : index
    %c0_38 = arith.constant 0 : index
    %87 = vector.load %arg16[%c0_37, %c2, %c0_38] : memref<2x8x256xf32, #tpu.memory_space<vmem>>, vector<2x1x128xf32>
    %88 = vector.shape_cast %87 : vector<2x1x128xf32> to vector<2x128xf32>
    %c0_39 = arith.constant 0 : index
    %c5 = arith.constant 5 : index
    %c128_40 = arith.constant 128 : index
    %89 = vector.load %arg16[%c0_39, %c5, %c128_40] : memref<2x8x256xf32, #tpu.memory_space<vmem>>, vector<2x1x128xf32>
    %90 = vector.shape_cast %89 : vector<2x1x128xf32> to vector<2x128xf32>
    %91 = tpu.concatenate %88, %90 in 1 : vector<2x128xf32>, vector<2x128xf32> -> vector<2x256xf32>
    %92 = arith.addf %91, %86 : vector<2x256xf32>
    %93 = arith.negf %92 : vector<2x256xf32>
    %94 = math.exp %93 : vector<2x256xf32>
    %cst_41 = arith.constant 1.000000e+00 : f32
    %95 = vector.broadcast %cst_41 : f32 to vector<2x256xf32>
    %96 = arith.addf %95, %94 : vector<2x256xf32>
    %97 = arith.divf %95, %96 : vector<2x256xf32>
    %98 = vector.extract_strided_slice %97 {offsets = [0, 32], sizes = [2, 32], strides = [1, 1]} : vector<2x256xf32> to vector<2x32xf32>
    %99 = arith.mulf %98, %67 : vector<2x32xf32>
    %100 = vector.extract_strided_slice %97 {offsets = [0, 0], sizes = [2, 32], strides = [1, 1]} : vector<2x256xf32> to vector<2x32xf32>
    %101 = vector.extract_strided_slice %92 {offsets = [0, 64], sizes = [2, 32], strides = [1, 1]} : vector<2x256xf32> to vector<2x32xf32>
    %102 = math.tanh %101 : vector<2x32xf32>
    %103 = arith.mulf %100, %102 : vector<2x32xf32>
    %104 = arith.addf %99, %103 : vector<2x32xf32>
    %105 = vector.extract_strided_slice %97 {offsets = [0, 96], sizes = [2, 32], strides = [1, 1]} : vector<2x256xf32> to vector<2x32xf32>
    %106 = math.tanh %104 : vector<2x32xf32>
    %107 = arith.mulf %105, %106 : vector<2x32xf32>
    %108 = vector.extract_strided_slice %97 {offsets = [0, 160], sizes = [2, 32], strides = [1, 1]} : vector<2x256xf32> to vector<2x32xf32>
    %109 = arith.mulf %108, %77 : vector<2x32xf32>
    %110 = vector.extract_strided_slice %97 {offsets = [0, 128], sizes = [2, 32], strides = [1, 1]} : vector<2x256xf32> to vector<2x32xf32>
    %111 = vector.extract_strided_slice %92 {offsets = [0, 192], sizes = [2, 32], strides = [1, 1]} : vector<2x256xf32> to vector<2x32xf32>
    %112 = math.tanh %111 : vector<2x32xf32>
    %113 = arith.mulf %110, %112 : vector<2x32xf32>
    %114 = arith.addf %109, %113 : vector<2x32xf32>
    %115 = vector.extract_strided_slice %97 {offsets = [0, 224], sizes = [2, 32], strides = [1, 1]} : vector<2x256xf32> to vector<2x32xf32>
    %116 = math.tanh %114 : vector<2x32xf32>
    %117 = arith.mulf %115, %116 : vector<2x32xf32>
    %118 = vector.shape_cast %107 : vector<2x32xf32> to vector<2x1x32xf32>
    %c0_42 = arith.constant 0 : index
    %c2_43 = arith.constant 2 : index
    %c0_44 = arith.constant 0 : index
    %119 = vector.load %arg14[%c0_42, %c2_43, %c0_44] : memref<2x8x64xf32, #tpu.memory_space<vmem>>, vector<2x1x32xf32>
    tpu.vector_store %arg14[%c0_42, %c2_43, %c0_44], %118 {strides = array<i32>} : memref<2x8x64xf32, #tpu.memory_space<vmem>>, vector<2x1x32xf32>,
    %120 = vector.shape_cast %117 : vector<2x32xf32> to vector<2x1x32xf32>
    %c0_45 = arith.constant 0 : index
    %c5_46 = arith.constant 5 : index
    %c32_47 = arith.constant 32 : index
    %121 = vector.load %arg14[%c0_45, %c5_46, %c32_47] : memref<2x8x64xf32, #tpu.memory_space<vmem>>, vector<2x1x32xf32>
    tpu.vector_store %arg14[%c0_45, %c5_46, %c32_47], %120 {strides = array<i32>} : memref<2x8x64xf32, #tpu.memory_space<vmem>>, vector<2x1x32xf32>,
    %122 = tpu.concatenate %107, %117 in 1 : vector<2x32xf32>, vector<2x32xf32> -> vector<2x64xf32>
    %cst_48 = arith.constant dense<0.000000e+00> : vector<2x256xf32>
    %123 = tpu.matmul %122, %9, %cst_48 {dimension_numbers = #tpu.dot_dimension_numbers<[1], [0], [0], [1], [0, 0, 1, 1], [], []>} : vector<2x64xf32>, vector<64x256xf32>, vector<2x256xf32> -> vector<2x256xf32>
    %c0_49 = arith.constant 0 : index
    %c3 = arith.constant 3 : index
    %c0_50 = arith.constant 0 : index
    %124 = vector.load %arg16[%c0_49, %c3, %c0_50] : memref<2x8x256xf32, #tpu.memory_space<vmem>>, vector<2x1x128xf32>
    %125 = vector.shape_cast %124 : vector<2x1x128xf32> to vector<2x128xf32>
    %c0_51 = arith.constant 0 : index
    %c4 = arith.constant 4 : index
    %c128_52 = arith.constant 128 : index
    %126 = vector.load %arg16[%c0_51, %c4, %c128_52] : memref<2x8x256xf32, #tpu.memory_space<vmem>>, vector<2x1x128xf32>
    %127 = vector.shape_cast %126 : vector<2x1x128xf32> to vector<2x128xf32>
    %128 = tpu.concatenate %125, %127 in 1 : vector<2x128xf32>, vector<2x128xf32> -> vector<2x256xf32>
    %129 = arith.addf %128, %123 : vector<2x256xf32>
    %130 = arith.negf %129 : vector<2x256xf32>
    %131 = math.exp %130 : vector<2x256xf32>
    %cst_53 = arith.constant 1.000000e+00 : f32
    %132 = vector.broadcast %cst_53 : f32 to vector<2x256xf32>
    %133 = arith.addf %132, %131 : vector<2x256xf32>
    %134 = arith.divf %132, %133 : vector<2x256xf32>
    %135 = vector.extract_strided_slice %134 {offsets = [0, 32], sizes = [2, 32], strides = [1, 1]} : vector<2x256xf32> to vector<2x32xf32>
    %136 = arith.mulf %135, %104 : vector<2x32xf32>
    %137 = vector.extract_strided_slice %134 {offsets = [0, 0], sizes = [2, 32], strides = [1, 1]} : vector<2x256xf32> to vector<2x32xf32>
    %138 = vector.extract_strided_slice %129 {offsets = [0, 64], sizes = [2, 32], strides = [1, 1]} : vector<2x256xf32> to vector<2x32xf32>
    %139 = math.tanh %138 : vector<2x32xf32>
    %140 = arith.mulf %137, %139 : vector<2x32xf32>
    %141 = arith.addf %136, %140 : vector<2x32xf32>
    %142 = vector.extract_strided_slice %134 {offsets = [0, 96], sizes = [2, 32], strides = [1, 1]} : vector<2x256xf32> to vector<2x32xf32>
    %143 = math.tanh %141 : vector<2x32xf32>
    %144 = arith.mulf %142, %143 : vector<2x32xf32>
    %145 = vector.extract_strided_slice %134 {offsets = [0, 160], sizes = [2, 32], strides = [1, 1]} : vector<2x256xf32> to vector<2x32xf32>
    %146 = arith.mulf %145, %114 : vector<2x32xf32>
    %147 = vector.extract_strided_slice %134 {offsets = [0, 128], sizes = [2, 32], strides = [1, 1]} : vector<2x256xf32> to vector<2x32xf32>
    %148 = vector.extract_strided_slice %129 {offsets = [0, 192], sizes = [2, 32], strides = [1, 1]} : vector<2x256xf32> to vector<2x32xf32>
    %149 = math.tanh %148 : vector<2x32xf32>
    %150 = arith.mulf %147, %149 : vector<2x32xf32>
    %151 = arith.addf %146, %150 : vector<2x32xf32>
    %152 = vector.extract_strided_slice %134 {offsets = [0, 224], sizes = [2, 32], strides = [1, 1]} : vector<2x256xf32> to vector<2x32xf32>
    %153 = math.tanh %151 : vector<2x32xf32>
    %154 = arith.mulf %152, %153 : vector<2x32xf32>
    %155 = vector.shape_cast %144 : vector<2x32xf32> to vector<2x1x32xf32>
    %c0_54 = arith.constant 0 : index
    %c3_55 = arith.constant 3 : index
    %c0_56 = arith.constant 0 : index
    %156 = vector.load %arg14[%c0_54, %c3_55, %c0_56] : memref<2x8x64xf32, #tpu.memory_space<vmem>>, vector<2x1x32xf32>
    tpu.vector_store %arg14[%c0_54, %c3_55, %c0_56], %155 {strides = array<i32>} : memref<2x8x64xf32, #tpu.memory_space<vmem>>, vector<2x1x32xf32>,
    %157 = vector.shape_cast %154 : vector<2x32xf32> to vector<2x1x32xf32>
    %c0_57 = arith.constant 0 : index
    %c4_58 = arith.constant 4 : index
    %c32_59 = arith.constant 32 : index
    %158 = vector.load %arg14[%c0_57, %c4_58, %c32_59] : memref<2x8x64xf32, #tpu.memory_space<vmem>>, vector<2x1x32xf32>
    tpu.vector_store %arg14[%c0_57, %c4_58, %c32_59], %157 {strides = array<i32>} : memref<2x8x64xf32, #tpu.memory_space<vmem>>, vector<2x1x32xf32>,
    %159 = tpu.concatenate %144, %154 in 1 : vector<2x32xf32>, vector<2x32xf32> -> vector<2x64xf32>
    %cst_60 = arith.constant dense<0.000000e+00> : vector<2x256xf32>
    %160 = tpu.matmul %159, %9, %cst_60 {dimension_numbers = #tpu.dot_dimension_numbers<[1], [0], [0], [1], [0, 0, 1, 1], [], []>} : vector<2x64xf32>, vector<64x256xf32>, vector<2x256xf32> -> vector<2x256xf32>
    %c0_61 = arith.constant 0 : index
    %c4_62 = arith.constant 4 : index
    %c0_63 = arith.constant 0 : index
    %161 = vector.load %arg16[%c0_61, %c4_62, %c0_63] : memref<2x8x256xf32, #tpu.memory_space<vmem>>, vector<2x1x128xf32>
    %162 = vector.shape_cast %161 : vector<2x1x128xf32> to vector<2x128xf32>
    %c0_64 = arith.constant 0 : index
    %c3_65 = arith.constant 3 : index
    %c128_66 = arith.constant 128 : index
    %163 = vector.load %arg16[%c0_64, %c3_65, %c128_66] : memref<2x8x256xf32, #tpu.memory_space<vmem>>, vector<2x1x128xf32>
    %164 = vector.shape_cast %163 : vector<2x1x128xf32> to vector<2x128xf32>
    %165 = tpu.concatenate %162, %164 in 1 : vector<2x128xf32>, vector<2x128xf32> -> vector<2x256xf32>
    %166 = arith.addf %165, %160 : vector<2x256xf32>
    %167 = arith.negf %166 : vector<2x256xf32>
    %168 = math.exp %167 : vector<2x256xf32>
    %cst_67 = arith.constant 1.000000e+00 : f32
    %169 = vector.broadcast %cst_67 : f32 to vector<2x256xf32>
    %170 = arith.addf %169, %168 : vector<2x256xf32>
    %171 = arith.divf %169, %170 : vector<2x256xf32>
    %172 = vector.extract_strided_slice %171 {offsets = [0, 32], sizes = [2, 32], strides = [1, 1]} : vector<2x256xf32> to vector<2x32xf32>
    %173 = arith.mulf %172, %141 : vector<2x32xf32>
    %174 = vector.extract_strided_slice %171 {offsets = [0, 0], sizes = [2, 32], strides = [1, 1]} : vector<2x256xf32> to vector<2x32xf32>
    %175 = vector.extract_strided_slice %166 {offsets = [0, 64], sizes = [2, 32], strides = [1, 1]} : vector<2x256xf32> to vector<2x32xf32>
    %176 = math.tanh %175 : vector<2x32xf32>
    %177 = arith.mulf %174, %176 : vector<2x32xf32>
    %178 = arith.addf %173, %177 : vector<2x32xf32>
    %179 = vector.extract_strided_slice %171 {offsets = [0, 96], sizes = [2, 32], strides = [1, 1]} : vector<2x256xf32> to vector<2x32xf32>
    %180 = math.tanh %178 : vector<2x32xf32>
    %181 = arith.mulf %179, %180 : vector<2x32xf32>
    %182 = vector.extract_strided_slice %171 {offsets = [0, 160], sizes = [2, 32], strides = [1, 1]} : vector<2x256xf32> to vector<2x32xf32>
    %183 = arith.mulf %182, %151 : vector<2x32xf32>
    %184 = vector.extract_strided_slice %171 {offsets = [0, 128], sizes = [2, 32], strides = [1, 1]} : vector<2x256xf32> to vector<2x32xf32>
    %185 = vector.extract_strided_slice %166 {offsets = [0, 192], sizes = [2, 32], strides = [1, 1]} : vector<2x256xf32> to vector<2x32xf32>
    %186 = math.tanh %185 : vector<2x32xf32>
    %187 = arith.mulf %184, %186 : vector<2x32xf32>
    %188 = arith.addf %183, %187 : vector<2x32xf32>
    %189 = vector.extract_strided_slice %171 {offsets = [0, 224], sizes = [2, 32], strides = [1, 1]} : vector<2x256xf32> to vector<2x32xf32>
    %190 = math.tanh %188 : vector<2x32xf32>
    %191 = arith.mulf %189, %190 : vector<2x32xf32>
    %192 = vector.shape_cast %181 : vector<2x32xf32> to vector<2x1x32xf32>
    %c0_68 = arith.constant 0 : index
    %c4_69 = arith.constant 4 : index
    %c0_70 = arith.constant 0 : index
    %193 = vector.load %arg14[%c0_68, %c4_69, %c0_70] : memref<2x8x64xf32, #tpu.memory_space<vmem>>, vector<2x1x32xf32>
    tpu.vector_store %arg14[%c0_68, %c4_69, %c0_70], %192 {strides = array<i32>} : memref<2x8x64xf32, #tpu.memory_space<vmem>>, vector<2x1x32xf32>,
    %194 = vector.shape_cast %191 : vector<2x32xf32> to vector<2x1x32xf32>
    %c0_71 = arith.constant 0 : index
    %c3_72 = arith.constant 3 : index
    %c32_73 = arith.constant 32 : index
    %195 = vector.load %arg14[%c0_71, %c3_72, %c32_73] : memref<2x8x64xf32, #tpu.memory_space<vmem>>, vector<2x1x32xf32>
    tpu.vector_store %arg14[%c0_71, %c3_72, %c32_73], %194 {strides = array<i32>} : memref<2x8x64xf32, #tpu.memory_space<vmem>>, vector<2x1x32xf32>,
    %196 = tpu.concatenate %181, %191 in 1 : vector<2x32xf32>, vector<2x32xf32> -> vector<2x64xf32>
    %cst_74 = arith.constant dense<0.000000e+00> : vector<2x256xf32>
    %197 = tpu.matmul %196, %9, %cst_74 {dimension_numbers = #tpu.dot_dimension_numbers<[1], [0], [0], [1], [0, 0, 1, 1], [], []>} : vector<2x64xf32>, vector<64x256xf32>, vector<2x256xf32> -> vector<2x256xf32>
    %c0_75 = arith.constant 0 : index
    %c5_76 = arith.constant 5 : index
    %c0_77 = arith.constant 0 : index
    %198 = vector.load %arg16[%c0_75, %c5_76, %c0_77] : memref<2x8x256xf32, #tpu.memory_space<vmem>>, vector<2x1x128xf32>
    %199 = vector.shape_cast %198 : vector<2x1x128xf32> to vector<2x128xf32>
    %c0_78 = arith.constant 0 : index
    %c2_79 = arith.constant 2 : index
    %c128_80 = arith.constant 128 : index
    %200 = vector.load %arg16[%c0_78, %c2_79, %c128_80] : memref<2x8x256xf32, #tpu.memory_space<vmem>>, vector<2x1x128xf32>
    %201 = vector.shape_cast %200 : vector<2x1x128xf32> to vector<2x128xf32>
    %202 = tpu.concatenate %199, %201 in 1 : vector<2x128xf32>, vector<2x128xf32> -> vector<2x256xf32>
    %203 = arith.addf %202, %197 : vector<2x256xf32>
    %204 = arith.negf %203 : vector<2x256xf32>
    %205 = math.exp %204 : vector<2x256xf32>
    %cst_81 = arith.constant 1.000000e+00 : f32
    %206 = vector.broadcast %cst_81 : f32 to vector<2x256xf32>
    %207 = arith.addf %206, %205 : vector<2x256xf32>
    %208 = arith.divf %206, %207 : vector<2x256xf32>
    %209 = vector.extract_strided_slice %208 {offsets = [0, 32], sizes = [2, 32], strides = [1, 1]} : vector<2x256xf32> to vector<2x32xf32>
    %210 = arith.mulf %209, %178 : vector<2x32xf32>
    %211 = vector.extract_strided_slice %208 {offsets = [0, 0], sizes = [2, 32], strides = [1, 1]} : vector<2x256xf32> to vector<2x32xf32>
    %212 = vector.extract_strided_slice %203 {offsets = [0, 64], sizes = [2, 32], strides = [1, 1]} : vector<2x256xf32> to vector<2x32xf32>
    %213 = math.tanh %212 : vector<2x32xf32>
    %214 = arith.mulf %211, %213 : vector<2x32xf32>
    %215 = arith.addf %210, %214 : vector<2x32xf32>
    %216 = vector.extract_strided_slice %208 {offsets = [0, 96], sizes = [2, 32], strides = [1, 1]} : vector<2x256xf32> to vector<2x32xf32>
    %217 = math.tanh %215 : vector<2x32xf32>
    %218 = arith.mulf %216, %217 : vector<2x32xf32>
    %219 = vector.extract_strided_slice %208 {offsets = [0, 160], sizes = [2, 32], strides = [1, 1]} : vector<2x256xf32> to vector<2x32xf32>
    %220 = arith.mulf %219, %188 : vector<2x32xf32>
    %221 = vector.extract_strided_slice %208 {offsets = [0, 128], sizes = [2, 32], strides = [1, 1]} : vector<2x256xf32> to vector<2x32xf32>
    %222 = vector.extract_strided_slice %203 {offsets = [0, 192], sizes = [2, 32], strides = [1, 1]} : vector<2x256xf32> to vector<2x32xf32>
    %223 = math.tanh %222 : vector<2x32xf32>
    %224 = arith.mulf %221, %223 : vector<2x32xf32>
    %225 = arith.addf %220, %224 : vector<2x32xf32>
    %226 = vector.extract_strided_slice %208 {offsets = [0, 224], sizes = [2, 32], strides = [1, 1]} : vector<2x256xf32> to vector<2x32xf32>
    %227 = math.tanh %225 : vector<2x32xf32>
    %228 = arith.mulf %226, %227 : vector<2x32xf32>
    %229 = vector.shape_cast %218 : vector<2x32xf32> to vector<2x1x32xf32>
    %c0_82 = arith.constant 0 : index
    %c5_83 = arith.constant 5 : index
    %c0_84 = arith.constant 0 : index
    %230 = vector.load %arg14[%c0_82, %c5_83, %c0_84] : memref<2x8x64xf32, #tpu.memory_space<vmem>>, vector<2x1x32xf32>
    tpu.vector_store %arg14[%c0_82, %c5_83, %c0_84], %229 {strides = array<i32>} : memref<2x8x64xf32, #tpu.memory_space<vmem>>, vector<2x1x32xf32>,
    %231 = vector.shape_cast %228 : vector<2x32xf32> to vector<2x1x32xf32>
    %c0_85 = arith.constant 0 : index
    %c2_86 = arith.constant 2 : index
    %c32_87 = arith.constant 32 : index
    %232 = vector.load %arg14[%c0_85, %c2_86, %c32_87] : memref<2x8x64xf32, #tpu.memory_space<vmem>>, vector<2x1x32xf32>
    tpu.vector_store %arg14[%c0_85, %c2_86, %c32_87], %231 {strides = array<i32>} : memref<2x8x64xf32, #tpu.memory_space<vmem>>, vector<2x1x32xf32>,
    %233 = tpu.concatenate %218, %228 in 1 : vector<2x32xf32>, vector<2x32xf32> -> vector<2x64xf32>
    %cst_88 = arith.constant dense<0.000000e+00> : vector<2x256xf32>
    %234 = tpu.matmul %233, %9, %cst_88 {dimension_numbers = #tpu.dot_dimension_numbers<[1], [0], [0], [1], [0, 0, 1, 1], [], []>} : vector<2x64xf32>, vector<64x256xf32>, vector<2x256xf32> -> vector<2x256xf32>
    %c0_89 = arith.constant 0 : index
    %c6_90 = arith.constant 6 : index
    %c0_91 = arith.constant 0 : index
    %235 = vector.load %arg16[%c0_89, %c6_90, %c0_91] : memref<2x8x256xf32, #tpu.memory_space<vmem>>, vector<2x1x128xf32>
    %236 = vector.shape_cast %235 : vector<2x1x128xf32> to vector<2x128xf32>
    %c0_92 = arith.constant 0 : index
    %c1_93 = arith.constant 1 : index
    %c128_94 = arith.constant 128 : index
    %237 = vector.load %arg16[%c0_92, %c1_93, %c128_94] : memref<2x8x256xf32, #tpu.memory_space<vmem>>, vector<2x1x128xf32>
    %238 = vector.shape_cast %237 : vector<2x1x128xf32> to vector<2x128xf32>
    %239 = tpu.concatenate %236, %238 in 1 : vector<2x128xf32>, vector<2x128xf32> -> vector<2x256xf32>
    %240 = arith.addf %239, %234 : vector<2x256xf32>
    %241 = arith.negf %240 : vector<2x256xf32>
    %242 = math.exp %241 : vector<2x256xf32>
    %cst_95 = arith.constant 1.000000e+00 : f32
    %243 = vector.broadcast %cst_95 : f32 to vector<2x256xf32>
    %244 = arith.addf %243, %242 : vector<2x256xf32>
    %245 = arith.divf %243, %244 : vector<2x256xf32>
    %246 = vector.extract_strided_slice %245 {offsets = [0, 32], sizes = [2, 32], strides = [1, 1]} : vector<2x256xf32> to vector<2x32xf32>
    %247 = arith.mulf %246, %215 : vector<2x32xf32>
    %248 = vector.extract_strided_slice %245 {offsets = [0, 0], sizes = [2, 32], strides = [1, 1]} : vector<2x256xf32> to vector<2x32xf32>
    %249 = vector.extract_strided_slice %240 {offsets = [0, 64], sizes = [2, 32], strides = [1, 1]} : vector<2x256xf32> to vector<2x32xf32>
    %250 = math.tanh %249 : vector<2x32xf32>
    %251 = arith.mulf %248, %250 : vector<2x32xf32>
    %252 = arith.addf %247, %251 : vector<2x32xf32>
    %253 = vector.extract_strided_slice %245 {offsets = [0, 96], sizes = [2, 32], strides = [1, 1]} : vector<2x256xf32> to vector<2x32xf32>
    %254 = math.tanh %252 : vector<2x32xf32>
    %255 = arith.mulf %253, %254 : vector<2x32xf32>
    %256 = vector.extract_strided_slice %245 {offsets = [0, 160], sizes = [2, 32], strides = [1, 1]} : vector<2x256xf32> to vector<2x32xf32>
    %257 = arith.mulf %256, %225 : vector<2x32xf32>
    %258 = vector.extract_strided_slice %245 {offsets = [0, 128], sizes = [2, 32], strides = [1, 1]} : vector<2x256xf32> to vector<2x32xf32>
    %259 = vector.extract_strided_slice %240 {offsets = [0, 192], sizes = [2, 32], strides = [1, 1]} : vector<2x256xf32> to vector<2x32xf32>
    %260 = math.tanh %259 : vector<2x32xf32>
    %261 = arith.mulf %258, %260 : vector<2x32xf32>
    %262 = arith.addf %257, %261 : vector<2x32xf32>
    %263 = vector.extract_strided_slice %245 {offsets = [0, 224], sizes = [2, 32], strides = [1, 1]} : vector<2x256xf32> to vector<2x32xf32>
    %264 = math.tanh %262 : vector<2x32xf32>
    %265 = arith.mulf %263, %264 : vector<2x32xf32>
    %266 = vector.shape_cast %255 : vector<2x32xf32> to vector<2x1x32xf32>
    %c0_96 = arith.constant 0 : index
    %c6_97 = arith.constant 6 : index
    %c0_98 = arith.constant 0 : index
    %267 = vector.load %arg14[%c0_96, %c6_97, %c0_98] : memref<2x8x64xf32, #tpu.memory_space<vmem>>, vector<2x1x32xf32>
    tpu.vector_store %arg14[%c0_96, %c6_97, %c0_98], %266 {strides = array<i32>} : memref<2x8x64xf32, #tpu.memory_space<vmem>>, vector<2x1x32xf32>,
    %268 = vector.shape_cast %265 : vector<2x32xf32> to vector<2x1x32xf32>
    %c0_99 = arith.constant 0 : index
    %c1_100 = arith.constant 1 : index
    %c32_101 = arith.constant 32 : index
    %269 = vector.load %arg14[%c0_99, %c1_100, %c32_101] : memref<2x8x64xf32, #tpu.memory_space<vmem>>, vector<2x1x32xf32>
    tpu.vector_store %arg14[%c0_99, %c1_100, %c32_101], %268 {strides = array<i32>} : memref<2x8x64xf32, #tpu.memory_space<vmem>>, vector<2x1x32xf32>,
    %270 = tpu.concatenate %255, %265 in 1 : vector<2x32xf32>, vector<2x32xf32> -> vector<2x64xf32>
    %cst_102 = arith.constant dense<0.000000e+00> : vector<2x256xf32>
    %271 = tpu.matmul %270, %9, %cst_102 {dimension_numbers = #tpu.dot_dimension_numbers<[1], [0], [0], [1], [0, 0, 1, 1], [], []>} : vector<2x64xf32>, vector<64x256xf32>, vector<2x256xf32> -> vector<2x256xf32>
    %c0_103 = arith.constant 0 : index
    %c7_104 = arith.constant 7 : index
    %c0_105 = arith.constant 0 : index
    %272 = vector.load %arg16[%c0_103, %c7_104, %c0_105] : memref<2x8x256xf32, #tpu.memory_space<vmem>>, vector<2x1x128xf32>
    %273 = vector.shape_cast %272 : vector<2x1x128xf32> to vector<2x128xf32>
    %c0_106 = arith.constant 0 : index
    %c0_107 = arith.constant 0 : index
    %c128_108 = arith.constant 128 : index
    %274 = vector.load %arg16[%c0_106, %c0_107, %c128_108] : memref<2x8x256xf32, #tpu.memory_space<vmem>>, vector<2x1x128xf32>
    %275 = vector.shape_cast %274 : vector<2x1x128xf32> to vector<2x128xf32>
    %276 = tpu.concatenate %273, %275 in 1 : vector<2x128xf32>, vector<2x128xf32> -> vector<2x256xf32>
    %277 = arith.addf %276, %271 : vector<2x256xf32>
    %278 = arith.negf %277 : vector<2x256xf32>
    %279 = math.exp %278 : vector<2x256xf32>
    %cst_109 = arith.constant 1.000000e+00 : f32
    %280 = vector.broadcast %cst_109 : f32 to vector<2x256xf32>
    %281 = arith.addf %280, %279 : vector<2x256xf32>
    %282 = arith.divf %280, %281 : vector<2x256xf32>
    %283 = vector.extract_strided_slice %282 {offsets = [0, 32], sizes = [2, 32], strides = [1, 1]} : vector<2x256xf32> to vector<2x32xf32>
    %284 = arith.mulf %283, %252 : vector<2x32xf32>
    %285 = vector.extract_strided_slice %282 {offsets = [0, 0], sizes = [2, 32], strides = [1, 1]} : vector<2x256xf32> to vector<2x32xf32>
    %286 = vector.extract_strided_slice %277 {offsets = [0, 64], sizes = [2, 32], strides = [1, 1]} : vector<2x256xf32> to vector<2x32xf32>
    %287 = math.tanh %286 : vector<2x32xf32>
    %288 = arith.mulf %285, %287 : vector<2x32xf32>
    %289 = arith.addf %284, %288 : vector<2x32xf32>
    %290 = vector.extract_strided_slice %282 {offsets = [0, 96], sizes = [2, 32], strides = [1, 1]} : vector<2x256xf32> to vector<2x32xf32>
    %291 = math.tanh %289 : vector<2x32xf32>
    %292 = arith.mulf %290, %291 : vector<2x32xf32>
    %293 = vector.extract_strided_slice %282 {offsets = [0, 160], sizes = [2, 32], strides = [1, 1]} : vector<2x256xf32> to vector<2x32xf32>
    %294 = arith.mulf %293, %262 : vector<2x32xf32>
    %295 = vector.extract_strided_slice %282 {offsets = [0, 128], sizes = [2, 32], strides = [1, 1]} : vector<2x256xf32> to vector<2x32xf32>
    %296 = vector.extract_strided_slice %277 {offsets = [0, 192], sizes = [2, 32], strides = [1, 1]} : vector<2x256xf32> to vector<2x32xf32>
    %297 = math.tanh %296 : vector<2x32xf32>
    %298 = arith.mulf %295, %297 : vector<2x32xf32>
    %299 = arith.addf %294, %298 : vector<2x32xf32>
    %300 = vector.extract_strided_slice %282 {offsets = [0, 224], sizes = [2, 32], strides = [1, 1]} : vector<2x256xf32> to vector<2x32xf32>
    %301 = math.tanh %299 : vector<2x32xf32>
    %302 = arith.mulf %300, %301 : vector<2x32xf32>
    %303 = vector.shape_cast %292 : vector<2x32xf32> to vector<2x1x32xf32>
    %c0_110 = arith.constant 0 : index
    %c7_111 = arith.constant 7 : index
    %c0_112 = arith.constant 0 : index
    %304 = vector.load %arg14[%c0_110, %c7_111, %c0_112] : memref<2x8x64xf32, #tpu.memory_space<vmem>>, vector<2x1x32xf32>
    tpu.vector_store %arg14[%c0_110, %c7_111, %c0_112], %303 {strides = array<i32>} : memref<2x8x64xf32, #tpu.memory_space<vmem>>, vector<2x1x32xf32>,
    %305 = vector.shape_cast %302 : vector<2x32xf32> to vector<2x1x32xf32>
    %c0_113 = arith.constant 0 : index
    %c0_114 = arith.constant 0 : index
    %c32_115 = arith.constant 32 : index
    %306 = vector.load %arg14[%c0_113, %c0_114, %c32_115] : memref<2x8x64xf32, #tpu.memory_space<vmem>>, vector<2x1x32xf32>
    tpu.vector_store %arg14[%c0_113, %c0_114, %c32_115], %305 {strides = array<i32>} : memref<2x8x64xf32, #tpu.memory_space<vmem>>, vector<2x1x32xf32>,
    %c0_116 = arith.constant 0 : index
    %c0_117 = arith.constant 0 : index
    %c0_118 = arith.constant 0 : index
    %307 = vector.load %arg14[%c0_116, %c0_117, %c0_118] : memref<2x8x64xf32, #tpu.memory_space<vmem>>, vector<2x8x64xf32>
    %308 = vector.shape_cast %307 : vector<2x8x64xf32> to vector<16x64xf32>
    %c0_119 = arith.constant 0 : index
    %c0_120 = arith.constant 0 : index
    %309 = vector.load %arg5[%c0_119, %c0_120] : memref<64x256xf32, #tpu.memory_space<vmem>>, vector<64x256xf32>
    %cst_121 = arith.constant dense<0.000000e+00> : vector<16x256xf32>
    %310 = tpu.matmul %308, %309, %cst_121 {dimension_numbers = #tpu.dot_dimension_numbers<[1], [0], [0], [1], [0, 0, 1, 1], [], []>} : vector<16x64xf32>, vector<64x256xf32>, vector<16x256xf32> -> vector<16x256xf32>
    %c0_122 = arith.constant 0 : index
    %c0_123 = arith.constant 0 : index
    %311 = vector.load %arg7[%c0_122, %c0_123] : memref<1x256xf32, #tpu.memory_space<vmem>>, vector<1x256xf32>
    %312 = vector.broadcast %311 : vector<1x256xf32> to vector<16x256xf32>
    %313 = arith.addf %310, %312 : vector<16x256xf32>
    %314 = vector.shape_cast %313 : vector<16x256xf32> to vector<2x8x256xf32>
    %c0_124 = arith.constant 0 : index
    %c0_125 = arith.constant 0 : index
    %c0_126 = arith.constant 0 : index
    %315 = vector.load %arg16[%c0_124, %c0_125, %c0_126] : memref<2x8x256xf32, #tpu.memory_space<vmem>>, vector<2x8x256xf32>
    tpu.vector_store %arg16[%c0_124, %c0_125, %c0_126], %314 {strides = array<i32>} : memref<2x8x256xf32, #tpu.memory_space<vmem>>, vector<2x8x256xf32>,
    %c0_127 = arith.constant 0 : index
    %c0_128 = arith.constant 0 : index
    %316 = vector.load %arg6[%c0_127, %c0_128] : memref<64x256xf32, #tpu.memory_space<vmem>>, vector<64x256xf32>
    %cst_129 = arith.constant 0.000000e+00 : f32
    %317 = vector.broadcast %cst_129 : f32 to vector<2x64xf32>
    %cst_130 = arith.constant 0.000000e+00 : f32
    %318 = vector.broadcast %cst_130 : f32 to vector<2x32xf32>
    %cst_131 = arith.constant dense<0.000000e+00> : vector<2x256xf32>
    %319 = tpu.matmul %317, %316, %cst_131 {dimension_numbers = #tpu.dot_dimension_numbers<[1], [0], [0], [1], [0, 0, 1, 1], [], []>} : vector<2x64xf32>, vector<64x256xf32>, vector<2x256xf32> -> vector<2x256xf32>
    %c0_132 = arith.constant 0 : index
    %c0_133 = arith.constant 0 : index
    %c0_134 = arith.constant 0 : index
    %320 = vector.load %arg16[%c0_132, %c0_133, %c0_134] : memref<2x8x256xf32, #tpu.memory_space<vmem>>, vector<2x1x128xf32>
    %321 = vector.shape_cast %320 : vector<2x1x128xf32> to vector<2x128xf32>
    %c0_135 = arith.constant 0 : index
    %c7_136 = arith.constant 7 : index
    %c128_137 = arith.constant 128 : index
    %322 = vector.load %arg16[%c0_135, %c7_136, %c128_137] : memref<2x8x256xf32, #tpu.memory_space<vmem>>, vector<2x1x128xf32>
    %323 = vector.shape_cast %322 : vector<2x1x128xf32> to vector<2x128xf32>
    %324 = tpu.concatenate %321, %323 in 1 : vector<2x128xf32>, vector<2x128xf32> -> vector<2x256xf32>
    %325 = arith.addf %324, %319 : vector<2x256xf32>
    %326 = arith.negf %325 : vector<2x256xf32>
    %327 = math.exp %326 : vector<2x256xf32>
    %cst_138 = arith.constant 1.000000e+00 : f32
    %328 = vector.broadcast %cst_138 : f32 to vector<2x256xf32>
    %329 = arith.addf %328, %327 : vector<2x256xf32>
    %330 = arith.divf %328, %329 : vector<2x256xf32>
    %331 = vector.extract_strided_slice %330 {offsets = [0, 32], sizes = [2, 32], strides = [1, 1]} : vector<2x256xf32> to vector<2x32xf32>
    %332 = arith.mulf %331, %318 : vector<2x32xf32>
    %333 = vector.extract_strided_slice %330 {offsets = [0, 0], sizes = [2, 32], strides = [1, 1]} : vector<2x256xf32> to vector<2x32xf32>
    %334 = vector.extract_strided_slice %325 {offsets = [0, 64], sizes = [2, 32], strides = [1, 1]} : vector<2x256xf32> to vector<2x32xf32>
    %335 = math.tanh %334 : vector<2x32xf32>
    %336 = arith.mulf %333, %335 : vector<2x32xf32>
    %337 = arith.addf %332, %336 : vector<2x32xf32>
    %338 = vector.extract_strided_slice %330 {offsets = [0, 96], sizes = [2, 32], strides = [1, 1]} : vector<2x256xf32> to vector<2x32xf32>
    %339 = math.tanh %337 : vector<2x32xf32>
    %340 = arith.mulf %338, %339 : vector<2x32xf32>
    %341 = vector.extract_strided_slice %330 {offsets = [0, 160], sizes = [2, 32], strides = [1, 1]} : vector<2x256xf32> to vector<2x32xf32>
    %342 = arith.mulf %341, %318 : vector<2x32xf32>
    %343 = vector.extract_strided_slice %330 {offsets = [0, 128], sizes = [2, 32], strides = [1, 1]} : vector<2x256xf32> to vector<2x32xf32>
    %344 = vector.extract_strided_slice %325 {offsets = [0, 192], sizes = [2, 32], strides = [1, 1]} : vector<2x256xf32> to vector<2x32xf32>
    %345 = math.tanh %344 : vector<2x32xf32>
    %346 = arith.mulf %343, %345 : vector<2x32xf32>
    %347 = arith.addf %342, %346 : vector<2x32xf32>
    %348 = vector.extract_strided_slice %330 {offsets = [0, 224], sizes = [2, 32], strides = [1, 1]} : vector<2x256xf32> to vector<2x32xf32>
    %349 = math.tanh %347 : vector<2x32xf32>
    %350 = arith.mulf %348, %349 : vector<2x32xf32>
    %351 = vector.shape_cast %340 : vector<2x32xf32> to vector<2x1x32xf32>
    %c0_139 = arith.constant 0 : index
    %c0_140 = arith.constant 0 : index
    %c0_141 = arith.constant 0 : index
    %352 = vector.load %arg15[%c0_139, %c0_140, %c0_141] : memref<2x8x64xf32, #tpu.memory_space<vmem>>, vector<2x1x32xf32>
    tpu.vector_store %arg15[%c0_139, %c0_140, %c0_141], %351 {strides = array<i32>} : memref<2x8x64xf32, #tpu.memory_space<vmem>>, vector<2x1x32xf32>,
    %353 = vector.shape_cast %350 : vector<2x32xf32> to vector<2x1x32xf32>
    %c0_142 = arith.constant 0 : index
    %c7_143 = arith.constant 7 : index
    %c32_144 = arith.constant 32 : index
    %354 = vector.load %arg15[%c0_142, %c7_143, %c32_144] : memref<2x8x64xf32, #tpu.memory_space<vmem>>, vector<2x1x32xf32>
    tpu.vector_store %arg15[%c0_142, %c7_143, %c32_144], %353 {strides = array<i32>} : memref<2x8x64xf32, #tpu.memory_space<vmem>>, vector<2x1x32xf32>,
    %355 = tpu.concatenate %340, %350 in 1 : vector<2x32xf32>, vector<2x32xf32> -> vector<2x64xf32>
    %cst_145 = arith.constant dense<0.000000e+00> : vector<2x256xf32>
    %356 = tpu.matmul %355, %316, %cst_145 {dimension_numbers = #tpu.dot_dimension_numbers<[1], [0], [0], [1], [0, 0, 1, 1], [], []>} : vector<2x64xf32>, vector<64x256xf32>, vector<2x256xf32> -> vector<2x256xf32>
    %c0_146 = arith.constant 0 : index
    %c1_147 = arith.constant 1 : index
    %c0_148 = arith.constant 0 : index
    %357 = vector.load %arg16[%c0_146, %c1_147, %c0_148] : memref<2x8x256xf32, #tpu.memory_space<vmem>>, vector<2x1x128xf32>
    %358 = vector.shape_cast %357 : vector<2x1x128xf32> to vector<2x128xf32>
    %c0_149 = arith.constant 0 : index
    %c6_150 = arith.constant 6 : index
    %c128_151 = arith.constant 128 : index
    %359 = vector.load %arg16[%c0_149, %c6_150, %c128_151] : memref<2x8x256xf32, #tpu.memory_space<vmem>>, vector<2x1x128xf32>
    %360 = vector.shape_cast %359 : vector<2x1x128xf32> to vector<2x128xf32>
    %361 = tpu.concatenate %358, %360 in 1 : vector<2x128xf32>, vector<2x128xf32> -> vector<2x256xf32>
    %362 = arith.addf %361, %356 : vector<2x256xf32>
    %363 = arith.negf %362 : vector<2x256xf32>
    %364 = math.exp %363 : vector<2x256xf32>
    %cst_152 = arith.constant 1.000000e+00 : f32
    %365 = vector.broadcast %cst_152 : f32 to vector<2x256xf32>
    %366 = arith.addf %365, %364 : vector<2x256xf32>
    %367 = arith.divf %365, %366 : vector<2x256xf32>
    %368 = vector.extract_strided_slice %367 {offsets = [0, 32], sizes = [2, 32], strides = [1, 1]} : vector<2x256xf32> to vector<2x32xf32>
    %369 = arith.mulf %368, %337 : vector<2x32xf32>
    %370 = vector.extract_strided_slice %367 {offsets = [0, 0], sizes = [2, 32], strides = [1, 1]} : vector<2x256xf32> to vector<2x32xf32>
    %371 = vector.extract_strided_slice %362 {offsets = [0, 64], sizes = [2, 32], strides = [1, 1]} : vector<2x256xf32> to vector<2x32xf32>
    %372 = math.tanh %371 : vector<2x32xf32>
    %373 = arith.mulf %370, %372 : vector<2x32xf32>
    %374 = arith.addf %369, %373 : vector<2x32xf32>
    %375 = vector.extract_strided_slice %367 {offsets = [0, 96], sizes = [2, 32], strides = [1, 1]} : vector<2x256xf32> to vector<2x32xf32>
    %376 = math.tanh %374 : vector<2x32xf32>
    %377 = arith.mulf %375, %376 : vector<2x32xf32>
    %378 = vector.extract_strided_slice %367 {offsets = [0, 160], sizes = [2, 32], strides = [1, 1]} : vector<2x256xf32> to vector<2x32xf32>
    %379 = arith.mulf %378, %347 : vector<2x32xf32>
    %380 = vector.extract_strided_slice %367 {offsets = [0, 128], sizes = [2, 32], strides = [1, 1]} : vector<2x256xf32> to vector<2x32xf32>
    %381 = vector.extract_strided_slice %362 {offsets = [0, 192], sizes = [2, 32], strides = [1, 1]} : vector<2x256xf32> to vector<2x32xf32>
    %382 = math.tanh %381 : vector<2x32xf32>
    %383 = arith.mulf %380, %382 : vector<2x32xf32>
    %384 = arith.addf %379, %383 : vector<2x32xf32>
    %385 = vector.extract_strided_slice %367 {offsets = [0, 224], sizes = [2, 32], strides = [1, 1]} : vector<2x256xf32> to vector<2x32xf32>
    %386 = math.tanh %384 : vector<2x32xf32>
    %387 = arith.mulf %385, %386 : vector<2x32xf32>
    %388 = vector.shape_cast %377 : vector<2x32xf32> to vector<2x1x32xf32>
    %c0_153 = arith.constant 0 : index
    %c1_154 = arith.constant 1 : index
    %c0_155 = arith.constant 0 : index
    %389 = vector.load %arg15[%c0_153, %c1_154, %c0_155] : memref<2x8x64xf32, #tpu.memory_space<vmem>>, vector<2x1x32xf32>
    tpu.vector_store %arg15[%c0_153, %c1_154, %c0_155], %388 {strides = array<i32>} : memref<2x8x64xf32, #tpu.memory_space<vmem>>, vector<2x1x32xf32>,
    %390 = vector.shape_cast %387 : vector<2x32xf32> to vector<2x1x32xf32>
    %c0_156 = arith.constant 0 : index
    %c6_157 = arith.constant 6 : index
    %c32_158 = arith.constant 32 : index
    %391 = vector.load %arg15[%c0_156, %c6_157, %c32_158] : memref<2x8x64xf32, #tpu.memory_space<vmem>>, vector<2x1x32xf32>
    tpu.vector_store %arg15[%c0_156, %c6_157, %c32_158], %390 {strides = array<i32>} : memref<2x8x64xf32, #tpu.memory_space<vmem>>, vector<2x1x32xf32>,
    %392 = tpu.concatenate %377, %387 in 1 : vector<2x32xf32>, vector<2x32xf32> -> vector<2x64xf32>
    %cst_159 = arith.constant dense<0.000000e+00> : vector<2x256xf32>
    %393 = tpu.matmul %392, %316, %cst_159 {dimension_numbers = #tpu.dot_dimension_numbers<[1], [0], [0], [1], [0, 0, 1, 1], [], []>} : vector<2x64xf32>, vector<64x256xf32>, vector<2x256xf32> -> vector<2x256xf32>
    %c0_160 = arith.constant 0 : index
    %c2_161 = arith.constant 2 : index
    %c0_162 = arith.constant 0 : index
    %394 = vector.load %arg16[%c0_160, %c2_161, %c0_162] : memref<2x8x256xf32, #tpu.memory_space<vmem>>, vector<2x1x128xf32>
    %395 = vector.shape_cast %394 : vector<2x1x128xf32> to vector<2x128xf32>
    %c0_163 = arith.constant 0 : index
    %c5_164 = arith.constant 5 : index
    %c128_165 = arith.constant 128 : index
    %396 = vector.load %arg16[%c0_163, %c5_164, %c128_165] : memref<2x8x256xf32, #tpu.memory_space<vmem>>, vector<2x1x128xf32>
    %397 = vector.shape_cast %396 : vector<2x1x128xf32> to vector<2x128xf32>
    %398 = tpu.concatenate %395, %397 in 1 : vector<2x128xf32>, vector<2x128xf32> -> vector<2x256xf32>
    %399 = arith.addf %398, %393 : vector<2x256xf32>
    %400 = arith.negf %399 : vector<2x256xf32>
    %401 = math.exp %400 : vector<2x256xf32>
    %cst_166 = arith.constant 1.000000e+00 : f32
    %402 = vector.broadcast %cst_166 : f32 to vector<2x256xf32>
    %403 = arith.addf %402, %401 : vector<2x256xf32>
    %404 = arith.divf %402, %403 : vector<2x256xf32>
    %405 = vector.extract_strided_slice %404 {offsets = [0, 32], sizes = [2, 32], strides = [1, 1]} : vector<2x256xf32> to vector<2x32xf32>
    %406 = arith.mulf %405, %374 : vector<2x32xf32>
    %407 = vector.extract_strided_slice %404 {offsets = [0, 0], sizes = [2, 32], strides = [1, 1]} : vector<2x256xf32> to vector<2x32xf32>
    %408 = vector.extract_strided_slice %399 {offsets = [0, 64], sizes = [2, 32], strides = [1, 1]} : vector<2x256xf32> to vector<2x32xf32>
    %409 = math.tanh %408 : vector<2x32xf32>
    %410 = arith.mulf %407, %409 : vector<2x32xf32>
    %411 = arith.addf %406, %410 : vector<2x32xf32>
    %412 = vector.extract_strided_slice %404 {offsets = [0, 96], sizes = [2, 32], strides = [1, 1]} : vector<2x256xf32> to vector<2x32xf32>
    %413 = math.tanh %411 : vector<2x32xf32>
    %414 = arith.mulf %412, %413 : vector<2x32xf32>
    %415 = vector.extract_strided_slice %404 {offsets = [0, 160], sizes = [2, 32], strides = [1, 1]} : vector<2x256xf32> to vector<2x32xf32>
    %416 = arith.mulf %415, %384 : vector<2x32xf32>
    %417 = vector.extract_strided_slice %404 {offsets = [0, 128], sizes = [2, 32], strides = [1, 1]} : vector<2x256xf32> to vector<2x32xf32>
    %418 = vector.extract_strided_slice %399 {offsets = [0, 192], sizes = [2, 32], strides = [1, 1]} : vector<2x256xf32> to vector<2x32xf32>
    %419 = math.tanh %418 : vector<2x32xf32>
    %420 = arith.mulf %417, %419 : vector<2x32xf32>
    %421 = arith.addf %416, %420 : vector<2x32xf32>
    %422 = vector.extract_strided_slice %404 {offsets = [0, 224], sizes = [2, 32], strides = [1, 1]} : vector<2x256xf32> to vector<2x32xf32>
    %423 = math.tanh %421 : vector<2x32xf32>
    %424 = arith.mulf %422, %423 : vector<2x32xf32>
    %425 = vector.shape_cast %414 : vector<2x32xf32> to vector<2x1x32xf32>
    %c0_167 = arith.constant 0 : index
    %c2_168 = arith.constant 2 : index
    %c0_169 = arith.constant 0 : index
    %426 = vector.load %arg15[%c0_167, %c2_168, %c0_169] : memref<2x8x64xf32, #tpu.memory_space<vmem>>, vector<2x1x32xf32>
    tpu.vector_store %arg15[%c0_167, %c2_168, %c0_169], %425 {strides = array<i32>} : memref<2x8x64xf32, #tpu.memory_space<vmem>>, vector<2x1x32xf32>,
    %427 = vector.shape_cast %424 : vector<2x32xf32> to vector<2x1x32xf32>
    %c0_170 = arith.constant 0 : index
    %c5_171 = arith.constant 5 : index
    %c32_172 = arith.constant 32 : index
    %428 = vector.load %arg15[%c0_170, %c5_171, %c32_172] : memref<2x8x64xf32, #tpu.memory_space<vmem>>, vector<2x1x32xf32>
    tpu.vector_store %arg15[%c0_170, %c5_171, %c32_172], %427 {strides = array<i32>} : memref<2x8x64xf32, #tpu.memory_space<vmem>>, vector<2x1x32xf32>,
    %429 = tpu.concatenate %414, %424 in 1 : vector<2x32xf32>, vector<2x32xf32> -> vector<2x64xf32>
    %cst_173 = arith.constant dense<0.000000e+00> : vector<2x256xf32>
    %430 = tpu.matmul %429, %316, %cst_173 {dimension_numbers = #tpu.dot_dimension_numbers<[1], [0], [0], [1], [0, 0, 1, 1], [], []>} : vector<2x64xf32>, vector<64x256xf32>, vector<2x256xf32> -> vector<2x256xf32>
    %c0_174 = arith.constant 0 : index
    %c3_175 = arith.constant 3 : index
    %c0_176 = arith.constant 0 : index
    %431 = vector.load %arg16[%c0_174, %c3_175, %c0_176] : memref<2x8x256xf32, #tpu.memory_space<vmem>>, vector<2x1x128xf32>
    %432 = vector.shape_cast %431 : vector<2x1x128xf32> to vector<2x128xf32>
    %c0_177 = arith.constant 0 : index
    %c4_178 = arith.constant 4 : index
    %c128_179 = arith.constant 128 : index
    %433 = vector.load %arg16[%c0_177, %c4_178, %c128_179] : memref<2x8x256xf32, #tpu.memory_space<vmem>>, vector<2x1x128xf32>
    %434 = vector.shape_cast %433 : vector<2x1x128xf32> to vector<2x128xf32>
    %435 = tpu.concatenate %432, %434 in 1 : vector<2x128xf32>, vector<2x128xf32> -> vector<2x256xf32>
    %436 = arith.addf %435, %430 : vector<2x256xf32>
    %437 = arith.negf %436 : vector<2x256xf32>
    %438 = math.exp %437 : vector<2x256xf32>
    %cst_180 = arith.constant 1.000000e+00 : f32
    %439 = vector.broadcast %cst_180 : f32 to vector<2x256xf32>
    %440 = arith.addf %439, %438 : vector<2x256xf32>
    %441 = arith.divf %439, %440 : vector<2x256xf32>
    %442 = vector.extract_strided_slice %441 {offsets = [0, 32], sizes = [2, 32], strides = [1, 1]} : vector<2x256xf32> to vector<2x32xf32>
    %443 = arith.mulf %442, %411 : vector<2x32xf32>
    %444 = vector.extract_strided_slice %441 {offsets = [0, 0], sizes = [2, 32], strides = [1, 1]} : vector<2x256xf32> to vector<2x32xf32>
    %445 = vector.extract_strided_slice %436 {offsets = [0, 64], sizes = [2, 32], strides = [1, 1]} : vector<2x256xf32> to vector<2x32xf32>
    %446 = math.tanh %445 : vector<2x32xf32>
    %447 = arith.mulf %444, %446 : vector<2x32xf32>
    %448 = arith.addf %443, %447 : vector<2x32xf32>
    %449 = vector.extract_strided_slice %441 {offsets = [0, 96], sizes = [2, 32], strides = [1, 1]} : vector<2x256xf32> to vector<2x32xf32>
    %450 = math.tanh %448 : vector<2x32xf32>
    %451 = arith.mulf %449, %450 : vector<2x32xf32>
    %452 = vector.extract_strided_slice %441 {offsets = [0, 160], sizes = [2, 32], strides = [1, 1]} : vector<2x256xf32> to vector<2x32xf32>
    %453 = arith.mulf %452, %421 : vector<2x32xf32>
    %454 = vector.extract_strided_slice %441 {offsets = [0, 128], sizes = [2, 32], strides = [1, 1]} : vector<2x256xf32> to vector<2x32xf32>
    %455 = vector.extract_strided_slice %436 {offsets = [0, 192], sizes = [2, 32], strides = [1, 1]} : vector<2x256xf32> to vector<2x32xf32>
    %456 = math.tanh %455 : vector<2x32xf32>
    %457 = arith.mulf %454, %456 : vector<2x32xf32>
    %458 = arith.addf %453, %457 : vector<2x32xf32>
    %459 = vector.extract_strided_slice %441 {offsets = [0, 224], sizes = [2, 32], strides = [1, 1]} : vector<2x256xf32> to vector<2x32xf32>
    %460 = math.tanh %458 : vector<2x32xf32>
    %461 = arith.mulf %459, %460 : vector<2x32xf32>
    %462 = vector.shape_cast %451 : vector<2x32xf32> to vector<2x1x32xf32>
    %c0_181 = arith.constant 0 : index
    %c3_182 = arith.constant 3 : index
    %c0_183 = arith.constant 0 : index
    %463 = vector.load %arg15[%c0_181, %c3_182, %c0_183] : memref<2x8x64xf32, #tpu.memory_space<vmem>>, vector<2x1x32xf32>
    tpu.vector_store %arg15[%c0_181, %c3_182, %c0_183], %462 {strides = array<i32>} : memref<2x8x64xf32, #tpu.memory_space<vmem>>, vector<2x1x32xf32>,
    %464 = vector.shape_cast %461 : vector<2x32xf32> to vector<2x1x32xf32>
    %c0_184 = arith.constant 0 : index
    %c4_185 = arith.constant 4 : index
    %c32_186 = arith.constant 32 : index
    %465 = vector.load %arg15[%c0_184, %c4_185, %c32_186] : memref<2x8x64xf32, #tpu.memory_space<vmem>>, vector<2x1x32xf32>
    tpu.vector_store %arg15[%c0_184, %c4_185, %c32_186], %464 {strides = array<i32>} : memref<2x8x64xf32, #tpu.memory_space<vmem>>, vector<2x1x32xf32>,
    %466 = tpu.concatenate %451, %461 in 1 : vector<2x32xf32>, vector<2x32xf32> -> vector<2x64xf32>
    %cst_187 = arith.constant dense<0.000000e+00> : vector<2x256xf32>
    %467 = tpu.matmul %466, %316, %cst_187 {dimension_numbers = #tpu.dot_dimension_numbers<[1], [0], [0], [1], [0, 0, 1, 1], [], []>} : vector<2x64xf32>, vector<64x256xf32>, vector<2x256xf32> -> vector<2x256xf32>
    %c0_188 = arith.constant 0 : index
    %c4_189 = arith.constant 4 : index
    %c0_190 = arith.constant 0 : index
    %468 = vector.load %arg16[%c0_188, %c4_189, %c0_190] : memref<2x8x256xf32, #tpu.memory_space<vmem>>, vector<2x1x128xf32>
    %469 = vector.shape_cast %468 : vector<2x1x128xf32> to vector<2x128xf32>
    %c0_191 = arith.constant 0 : index
    %c3_192 = arith.constant 3 : index
    %c128_193 = arith.constant 128 : index
    %470 = vector.load %arg16[%c0_191, %c3_192, %c128_193] : memref<2x8x256xf32, #tpu.memory_space<vmem>>, vector<2x1x128xf32>
    %471 = vector.shape_cast %470 : vector<2x1x128xf32> to vector<2x128xf32>
    %472 = tpu.concatenate %469, %471 in 1 : vector<2x128xf32>, vector<2x128xf32> -> vector<2x256xf32>
    %473 = arith.addf %472, %467 : vector<2x256xf32>
    %474 = arith.negf %473 : vector<2x256xf32>
    %475 = math.exp %474 : vector<2x256xf32>
    %cst_194 = arith.constant 1.000000e+00 : f32
    %476 = vector.broadcast %cst_194 : f32 to vector<2x256xf32>
    %477 = arith.addf %476, %475 : vector<2x256xf32>
    %478 = arith.divf %476, %477 : vector<2x256xf32>
    %479 = vector.extract_strided_slice %478 {offsets = [0, 32], sizes = [2, 32], strides = [1, 1]} : vector<2x256xf32> to vector<2x32xf32>
    %480 = arith.mulf %479, %448 : vector<2x32xf32>
    %481 = vector.extract_strided_slice %478 {offsets = [0, 0], sizes = [2, 32], strides = [1, 1]} : vector<2x256xf32> to vector<2x32xf32>
    %482 = vector.extract_strided_slice %473 {offsets = [0, 64], sizes = [2, 32], strides = [1, 1]} : vector<2x256xf32> to vector<2x32xf32>
    %483 = math.tanh %482 : vector<2x32xf32>
    %484 = arith.mulf %481, %483 : vector<2x32xf32>
    %485 = arith.addf %480, %484 : vector<2x32xf32>
    %486 = vector.extract_strided_slice %478 {offsets = [0, 96], sizes = [2, 32], strides = [1, 1]} : vector<2x256xf32> to vector<2x32xf32>
    %487 = math.tanh %485 : vector<2x32xf32>
    %488 = arith.mulf %486, %487 : vector<2x32xf32>
    %489 = vector.extract_strided_slice %478 {offsets = [0, 160], sizes = [2, 32], strides = [1, 1]} : vector<2x256xf32> to vector<2x32xf32>
    %490 = arith.mulf %489, %458 : vector<2x32xf32>
    %491 = vector.extract_strided_slice %478 {offsets = [0, 128], sizes = [2, 32], strides = [1, 1]} : vector<2x256xf32> to vector<2x32xf32>
    %492 = vector.extract_strided_slice %473 {offsets = [0, 192], sizes = [2, 32], strides = [1, 1]} : vector<2x256xf32> to vector<2x32xf32>
    %493 = math.tanh %492 : vector<2x32xf32>
    %494 = arith.mulf %491, %493 : vector<2x32xf32>
    %495 = arith.addf %490, %494 : vector<2x32xf32>
    %496 = vector.extract_strided_slice %478 {offsets = [0, 224], sizes = [2, 32], strides = [1, 1]} : vector<2x256xf32> to vector<2x32xf32>
    %497 = math.tanh %495 : vector<2x32xf32>
    %498 = arith.mulf %496, %497 : vector<2x32xf32>
    %499 = vector.shape_cast %488 : vector<2x32xf32> to vector<2x1x32xf32>
    %c0_195 = arith.constant 0 : index
    %c4_196 = arith.constant 4 : index
    %c0_197 = arith.constant 0 : index
    %500 = vector.load %arg15[%c0_195, %c4_196, %c0_197] : memref<2x8x64xf32, #tpu.memory_space<vmem>>, vector<2x1x32xf32>
    tpu.vector_store %arg15[%c0_195, %c4_196, %c0_197], %499 {strides = array<i32>} : memref<2x8x64xf32, #tpu.memory_space<vmem>>, vector<2x1x32xf32>,
    %501 = vector.shape_cast %498 : vector<2x32xf32> to vector<2x1x32xf32>
    %c0_198 = arith.constant 0 : index
    %c3_199 = arith.constant 3 : index
    %c32_200 = arith.constant 32 : index
    %502 = vector.load %arg15[%c0_198, %c3_199, %c32_200] : memref<2x8x64xf32, #tpu.memory_space<vmem>>, vector<2x1x32xf32>
    tpu.vector_store %arg15[%c0_198, %c3_199, %c32_200], %501 {strides = array<i32>} : memref<2x8x64xf32, #tpu.memory_space<vmem>>, vector<2x1x32xf32>,
    %503 = tpu.concatenate %488, %498 in 1 : vector<2x32xf32>, vector<2x32xf32> -> vector<2x64xf32>
    %cst_201 = arith.constant dense<0.000000e+00> : vector<2x256xf32>
    %504 = tpu.matmul %503, %316, %cst_201 {dimension_numbers = #tpu.dot_dimension_numbers<[1], [0], [0], [1], [0, 0, 1, 1], [], []>} : vector<2x64xf32>, vector<64x256xf32>, vector<2x256xf32> -> vector<2x256xf32>
    %c0_202 = arith.constant 0 : index
    %c5_203 = arith.constant 5 : index
    %c0_204 = arith.constant 0 : index
    %505 = vector.load %arg16[%c0_202, %c5_203, %c0_204] : memref<2x8x256xf32, #tpu.memory_space<vmem>>, vector<2x1x128xf32>
    %506 = vector.shape_cast %505 : vector<2x1x128xf32> to vector<2x128xf32>
    %c0_205 = arith.constant 0 : index
    %c2_206 = arith.constant 2 : index
    %c128_207 = arith.constant 128 : index
    %507 = vector.load %arg16[%c0_205, %c2_206, %c128_207] : memref<2x8x256xf32, #tpu.memory_space<vmem>>, vector<2x1x128xf32>
    %508 = vector.shape_cast %507 : vector<2x1x128xf32> to vector<2x128xf32>
    %509 = tpu.concatenate %506, %508 in 1 : vector<2x128xf32>, vector<2x128xf32> -> vector<2x256xf32>
    %510 = arith.addf %509, %504 : vector<2x256xf32>
    %511 = arith.negf %510 : vector<2x256xf32>
    %512 = math.exp %511 : vector<2x256xf32>
    %cst_208 = arith.constant 1.000000e+00 : f32
    %513 = vector.broadcast %cst_208 : f32 to vector<2x256xf32>
    %514 = arith.addf %513, %512 : vector<2x256xf32>
    %515 = arith.divf %513, %514 : vector<2x256xf32>
    %516 = vector.extract_strided_slice %515 {offsets = [0, 32], sizes = [2, 32], strides = [1, 1]} : vector<2x256xf32> to vector<2x32xf32>
    %517 = arith.mulf %516, %485 : vector<2x32xf32>
    %518 = vector.extract_strided_slice %515 {offsets = [0, 0], sizes = [2, 32], strides = [1, 1]} : vector<2x256xf32> to vector<2x32xf32>
    %519 = vector.extract_strided_slice %510 {offsets = [0, 64], sizes = [2, 32], strides = [1, 1]} : vector<2x256xf32> to vector<2x32xf32>
    %520 = math.tanh %519 : vector<2x32xf32>
    %521 = arith.mulf %518, %520 : vector<2x32xf32>
    %522 = arith.addf %517, %521 : vector<2x32xf32>
    %523 = vector.extract_strided_slice %515 {offsets = [0, 96], sizes = [2, 32], strides = [1, 1]} : vector<2x256xf32> to vector<2x32xf32>
    %524 = math.tanh %522 : vector<2x32xf32>
    %525 = arith.mulf %523, %524 : vector<2x32xf32>
    %526 = vector.extract_strided_slice %515 {offsets = [0, 160], sizes = [2, 32], strides = [1, 1]} : vector<2x256xf32> to vector<2x32xf32>
    %527 = arith.mulf %526, %495 : vector<2x32xf32>
    %528 = vector.extract_strided_slice %515 {offsets = [0, 128], sizes = [2, 32], strides = [1, 1]} : vector<2x256xf32> to vector<2x32xf32>
    %529 = vector.extract_strided_slice %510 {offsets = [0, 192], sizes = [2, 32], strides = [1, 1]} : vector<2x256xf32> to vector<2x32xf32>
    %530 = math.tanh %529 : vector<2x32xf32>
    %531 = arith.mulf %528, %530 : vector<2x32xf32>
    %532 = arith.addf %527, %531 : vector<2x32xf32>
    %533 = vector.extract_strided_slice %515 {offsets = [0, 224], sizes = [2, 32], strides = [1, 1]} : vector<2x256xf32> to vector<2x32xf32>
    %534 = math.tanh %532 : vector<2x32xf32>
    %535 = arith.mulf %533, %534 : vector<2x32xf32>
    %536 = vector.shape_cast %525 : vector<2x32xf32> to vector<2x1x32xf32>
    %c0_209 = arith.constant 0 : index
    %c5_210 = arith.constant 5 : index
    %c0_211 = arith.constant 0 : index
    %537 = vector.load %arg15[%c0_209, %c5_210, %c0_211] : memref<2x8x64xf32, #tpu.memory_space<vmem>>, vector<2x1x32xf32>
    tpu.vector_store %arg15[%c0_209, %c5_210, %c0_211], %536 {strides = array<i32>} : memref<2x8x64xf32, #tpu.memory_space<vmem>>, vector<2x1x32xf32>,
    %538 = vector.shape_cast %535 : vector<2x32xf32> to vector<2x1x32xf32>
    %c0_212 = arith.constant 0 : index
    %c2_213 = arith.constant 2 : index
    %c32_214 = arith.constant 32 : index
    %539 = vector.load %arg15[%c0_212, %c2_213, %c32_214] : memref<2x8x64xf32, #tpu.memory_space<vmem>>, vector<2x1x32xf32>
    tpu.vector_store %arg15[%c0_212, %c2_213, %c32_214], %538 {strides = array<i32>} : memref<2x8x64xf32, #tpu.memory_space<vmem>>, vector<2x1x32xf32>,
    %540 = tpu.concatenate %525, %535 in 1 : vector<2x32xf32>, vector<2x32xf32> -> vector<2x64xf32>
    %cst_215 = arith.constant dense<0.000000e+00> : vector<2x256xf32>
    %541 = tpu.matmul %540, %316, %cst_215 {dimension_numbers = #tpu.dot_dimension_numbers<[1], [0], [0], [1], [0, 0, 1, 1], [], []>} : vector<2x64xf32>, vector<64x256xf32>, vector<2x256xf32> -> vector<2x256xf32>
    %c0_216 = arith.constant 0 : index
    %c6_217 = arith.constant 6 : index
    %c0_218 = arith.constant 0 : index
    %542 = vector.load %arg16[%c0_216, %c6_217, %c0_218] : memref<2x8x256xf32, #tpu.memory_space<vmem>>, vector<2x1x128xf32>
    %543 = vector.shape_cast %542 : vector<2x1x128xf32> to vector<2x128xf32>
    %c0_219 = arith.constant 0 : index
    %c1_220 = arith.constant 1 : index
    %c128_221 = arith.constant 128 : index
    %544 = vector.load %arg16[%c0_219, %c1_220, %c128_221] : memref<2x8x256xf32, #tpu.memory_space<vmem>>, vector<2x1x128xf32>
    %545 = vector.shape_cast %544 : vector<2x1x128xf32> to vector<2x128xf32>
    %546 = tpu.concatenate %543, %545 in 1 : vector<2x128xf32>, vector<2x128xf32> -> vector<2x256xf32>
    %547 = arith.addf %546, %541 : vector<2x256xf32>
    %548 = arith.negf %547 : vector<2x256xf32>
    %549 = math.exp %548 : vector<2x256xf32>
    %cst_222 = arith.constant 1.000000e+00 : f32
    %550 = vector.broadcast %cst_222 : f32 to vector<2x256xf32>
    %551 = arith.addf %550, %549 : vector<2x256xf32>
    %552 = arith.divf %550, %551 : vector<2x256xf32>
    %553 = vector.extract_strided_slice %552 {offsets = [0, 32], sizes = [2, 32], strides = [1, 1]} : vector<2x256xf32> to vector<2x32xf32>
    %554 = arith.mulf %553, %522 : vector<2x32xf32>
    %555 = vector.extract_strided_slice %552 {offsets = [0, 0], sizes = [2, 32], strides = [1, 1]} : vector<2x256xf32> to vector<2x32xf32>
    %556 = vector.extract_strided_slice %547 {offsets = [0, 64], sizes = [2, 32], strides = [1, 1]} : vector<2x256xf32> to vector<2x32xf32>
    %557 = math.tanh %556 : vector<2x32xf32>
    %558 = arith.mulf %555, %557 : vector<2x32xf32>
    %559 = arith.addf %554, %558 : vector<2x32xf32>
    %560 = vector.extract_strided_slice %552 {offsets = [0, 96], sizes = [2, 32], strides = [1, 1]} : vector<2x256xf32> to vector<2x32xf32>
    %561 = math.tanh %559 : vector<2x32xf32>
    %562 = arith.mulf %560, %561 : vector<2x32xf32>
    %563 = vector.extract_strided_slice %552 {offsets = [0, 160], sizes = [2, 32], strides = [1, 1]} : vector<2x256xf32> to vector<2x32xf32>
    %564 = arith.mulf %563, %532 : vector<2x32xf32>
    %565 = vector.extract_strided_slice %552 {offsets = [0, 128], sizes = [2, 32], strides = [1, 1]} : vector<2x256xf32> to vector<2x32xf32>
    %566 = vector.extract_strided_slice %547 {offsets = [0, 192], sizes = [2, 32], strides = [1, 1]} : vector<2x256xf32> to vector<2x32xf32>
    %567 = math.tanh %566 : vector<2x32xf32>
    %568 = arith.mulf %565, %567 : vector<2x32xf32>
    %569 = arith.addf %564, %568 : vector<2x32xf32>
    %570 = vector.extract_strided_slice %552 {offsets = [0, 224], sizes = [2, 32], strides = [1, 1]} : vector<2x256xf32> to vector<2x32xf32>
    %571 = math.tanh %569 : vector<2x32xf32>
    %572 = arith.mulf %570, %571 : vector<2x32xf32>
    %573 = vector.shape_cast %562 : vector<2x32xf32> to vector<2x1x32xf32>
    %c0_223 = arith.constant 0 : index
    %c6_224 = arith.constant 6 : index
    %c0_225 = arith.constant 0 : index
    %574 = vector.load %arg15[%c0_223, %c6_224, %c0_225] : memref<2x8x64xf32, #tpu.memory_space<vmem>>, vector<2x1x32xf32>
    tpu.vector_store %arg15[%c0_223, %c6_224, %c0_225], %573 {strides = array<i32>} : memref<2x8x64xf32, #tpu.memory_space<vmem>>, vector<2x1x32xf32>,
    %575 = vector.shape_cast %572 : vector<2x32xf32> to vector<2x1x32xf32>
    %c0_226 = arith.constant 0 : index
    %c1_227 = arith.constant 1 : index
    %c32_228 = arith.constant 32 : index
    %576 = vector.load %arg15[%c0_226, %c1_227, %c32_228] : memref<2x8x64xf32, #tpu.memory_space<vmem>>, vector<2x1x32xf32>
    tpu.vector_store %arg15[%c0_226, %c1_227, %c32_228], %575 {strides = array<i32>} : memref<2x8x64xf32, #tpu.memory_space<vmem>>, vector<2x1x32xf32>,
    %577 = tpu.concatenate %562, %572 in 1 : vector<2x32xf32>, vector<2x32xf32> -> vector<2x64xf32>
    %cst_229 = arith.constant dense<0.000000e+00> : vector<2x256xf32>
    %578 = tpu.matmul %577, %316, %cst_229 {dimension_numbers = #tpu.dot_dimension_numbers<[1], [0], [0], [1], [0, 0, 1, 1], [], []>} : vector<2x64xf32>, vector<64x256xf32>, vector<2x256xf32> -> vector<2x256xf32>
    %c0_230 = arith.constant 0 : index
    %c7_231 = arith.constant 7 : index
    %c0_232 = arith.constant 0 : index
    %579 = vector.load %arg16[%c0_230, %c7_231, %c0_232] : memref<2x8x256xf32, #tpu.memory_space<vmem>>, vector<2x1x128xf32>
    %580 = vector.shape_cast %579 : vector<2x1x128xf32> to vector<2x128xf32>
    %c0_233 = arith.constant 0 : index
    %c0_234 = arith.constant 0 : index
    %c128_235 = arith.constant 128 : index
    %581 = vector.load %arg16[%c0_233, %c0_234, %c128_235] : memref<2x8x256xf32, #tpu.memory_space<vmem>>, vector<2x1x128xf32>
    %582 = vector.shape_cast %581 : vector<2x1x128xf32> to vector<2x128xf32>
    %583 = tpu.concatenate %580, %582 in 1 : vector<2x128xf32>, vector<2x128xf32> -> vector<2x256xf32>
    %584 = arith.addf %583, %578 : vector<2x256xf32>
    %585 = arith.negf %584 : vector<2x256xf32>
    %586 = math.exp %585 : vector<2x256xf32>
    %cst_236 = arith.constant 1.000000e+00 : f32
    %587 = vector.broadcast %cst_236 : f32 to vector<2x256xf32>
    %588 = arith.addf %587, %586 : vector<2x256xf32>
    %589 = arith.divf %587, %588 : vector<2x256xf32>
    %590 = vector.extract_strided_slice %589 {offsets = [0, 32], sizes = [2, 32], strides = [1, 1]} : vector<2x256xf32> to vector<2x32xf32>
    %591 = arith.mulf %590, %559 : vector<2x32xf32>
    %592 = vector.extract_strided_slice %589 {offsets = [0, 0], sizes = [2, 32], strides = [1, 1]} : vector<2x256xf32> to vector<2x32xf32>
    %593 = vector.extract_strided_slice %584 {offsets = [0, 64], sizes = [2, 32], strides = [1, 1]} : vector<2x256xf32> to vector<2x32xf32>
    %594 = math.tanh %593 : vector<2x32xf32>
    %595 = arith.mulf %592, %594 : vector<2x32xf32>
    %596 = arith.addf %591, %595 : vector<2x32xf32>
    %597 = vector.extract_strided_slice %589 {offsets = [0, 96], sizes = [2, 32], strides = [1, 1]} : vector<2x256xf32> to vector<2x32xf32>
    %598 = math.tanh %596 : vector<2x32xf32>
    %599 = arith.mulf %597, %598 : vector<2x32xf32>
    %600 = vector.extract_strided_slice %589 {offsets = [0, 160], sizes = [2, 32], strides = [1, 1]} : vector<2x256xf32> to vector<2x32xf32>
    %601 = arith.mulf %600, %569 : vector<2x32xf32>
    %602 = vector.extract_strided_slice %589 {offsets = [0, 128], sizes = [2, 32], strides = [1, 1]} : vector<2x256xf32> to vector<2x32xf32>
    %603 = vector.extract_strided_slice %584 {offsets = [0, 192], sizes = [2, 32], strides = [1, 1]} : vector<2x256xf32> to vector<2x32xf32>
    %604 = math.tanh %603 : vector<2x32xf32>
    %605 = arith.mulf %602, %604 : vector<2x32xf32>
    %606 = arith.addf %601, %605 : vector<2x32xf32>
    %607 = vector.extract_strided_slice %589 {offsets = [0, 224], sizes = [2, 32], strides = [1, 1]} : vector<2x256xf32> to vector<2x32xf32>
    %608 = math.tanh %606 : vector<2x32xf32>
    %609 = arith.mulf %607, %608 : vector<2x32xf32>
    %610 = vector.shape_cast %599 : vector<2x32xf32> to vector<2x1x32xf32>
    %c0_237 = arith.constant 0 : index
    %c7_238 = arith.constant 7 : index
    %c0_239 = arith.constant 0 : index
    %611 = vector.load %arg15[%c0_237, %c7_238, %c0_239] : memref<2x8x64xf32, #tpu.memory_space<vmem>>, vector<2x1x32xf32>
    tpu.vector_store %arg15[%c0_237, %c7_238, %c0_239], %610 {strides = array<i32>} : memref<2x8x64xf32, #tpu.memory_space<vmem>>, vector<2x1x32xf32>,
    %612 = vector.shape_cast %609 : vector<2x32xf32> to vector<2x1x32xf32>
    %c0_240 = arith.constant 0 : index
    %c0_241 = arith.constant 0 : index
    %c32_242 = arith.constant 32 : index
    %613 = vector.load %arg15[%c0_240, %c0_241, %c32_242] : memref<2x8x64xf32, #tpu.memory_space<vmem>>, vector<2x1x32xf32>
    tpu.vector_store %arg15[%c0_240, %c0_241, %c32_242], %612 {strides = array<i32>} : memref<2x8x64xf32, #tpu.memory_space<vmem>>, vector<2x1x32xf32>,
    %c0_243 = arith.constant 0 : index
    %c0_244 = arith.constant 0 : index
    %c0_245 = arith.constant 0 : index
    %614 = vector.load %arg15[%c0_243, %c0_244, %c0_245] : memref<2x8x64xf32, #tpu.memory_space<vmem>>, vector<2x8x64xf32>
    %615 = vector.shape_cast %614 : vector<2x8x64xf32> to vector<16x64xf32>
    %c0_246 = arith.constant 0 : index
    %c0_247 = arith.constant 0 : index
    %616 = vector.load %arg8[%c0_246, %c0_247] : memref<64x64xf32, #tpu.memory_space<vmem>>, vector<64x64xf32>
    %cst_248 = arith.constant dense<0.000000e+00> : vector<16x64xf32>
    %617 = tpu.matmul %615, %616, %cst_248 {dimension_numbers = #tpu.dot_dimension_numbers<[1], [0], [0], [1], [0, 0, 1, 1], [], []>} : vector<16x64xf32>, vector<64x64xf32>, vector<16x64xf32> -> vector<16x64xf32>
    %c0_249 = arith.constant 0 : index
    %c0_250 = arith.constant 0 : index
    %618 = vector.load %arg9[%c0_249, %c0_250] : memref<1x64xf32, #tpu.memory_space<vmem>>, vector<1x64xf32>
    %619 = vector.broadcast %618 : vector<1x64xf32> to vector<16x64xf32>
    %620 = arith.addf %617, %619 : vector<16x64xf32>
    %621 = vector.shape_cast %620 : vector<16x64xf32> to vector<2x8x64xf32>
    %cst_251 = arith.constant dense<0xFF800000> : vector<2x64xf32>
    %622 = vector.multi_reduction <maximumf>, %621, %cst_251 [1] : vector<2x8x64xf32> to vector<2x64xf32>
    %623 = vector.shape_cast %622 : vector<2x64xf32> to vector<2x1x64xf32>
    %624 = vector.broadcast %623 : vector<2x1x64xf32> to vector<2x8x64xf32>
    %625 = arith.subf %621, %624 : vector<2x8x64xf32>
    %626 = math.exp %625 : vector<2x8x64xf32>
    %627 = arith.mulf %626, %614 : vector<2x8x64xf32>
    %cst_252 = arith.constant dense<0.000000e+00> : vector<2x64xf32>
    %628 = vector.multi_reduction <add>, %627, %cst_252 [1] : vector<2x8x64xf32> to vector<2x64xf32>
    %cst_253 = arith.constant dense<0.000000e+00> : vector<2x64xf32>
    %629 = vector.multi_reduction <add>, %626, %cst_253 [1] : vector<2x8x64xf32> to vector<2x64xf32>
    %630 = arith.divf %628, %629 : vector<2x64xf32>
    %c0_254 = arith.constant 0 : index
    %c0_255 = arith.constant 0 : index
    %631 = vector.load %arg10[%c0_254, %c0_255] : memref<64x4xf32, #tpu.memory_space<vmem>>, vector<64x4xf32>
    %cst_256 = arith.constant dense<0.000000e+00> : vector<2x4xf32>
    %632 = tpu.matmul %630, %631, %cst_256 {dimension_numbers = #tpu.dot_dimension_numbers<[1], [0], [0], [1], [0, 0, 1, 1], [], []>} : vector<2x64xf32>, vector<64x4xf32>, vector<2x4xf32> -> vector<2x4xf32>
    %c0_257 = arith.constant 0 : index
    %c0_258 = arith.constant 0 : index
    %633 = vector.load %arg11[%c0_257, %c0_258] : memref<1x4xf32, #tpu.memory_space<vmem>>, vector<1x4xf32>
    %634 = vector.broadcast %633 : vector<1x4xf32> to vector<2x4xf32>
    %635 = arith.addf %632, %634 : vector<2x4xf32>
    %636 = vector.extract_strided_slice %635 {offsets = [0, 0], sizes = [2, 2], strides = [1, 1]} : vector<2x4xf32> to vector<2x2xf32>
    %637 = vector.extract_strided_slice %635 {offsets = [0, 2], sizes = [2, 2], strides = [1, 1]} : vector<2x4xf32> to vector<2x2xf32>
    %cst_259 = arith.constant 0.000000e+00 : f32
    %638 = vector.broadcast %cst_259 : f32 to vector<2x2xf32>
    %639 = arith.maximumf %637, %638 : vector<2x2xf32>
    %640 = math.absf %637 : vector<2x2xf32>
    %cst_260 = arith.constant 0.000000e+00 : f32
    %641 = vector.broadcast %cst_260 : f32 to vector<2x2xf32>
    %642 = arith.subf %641, %640 : vector<2x2xf32>
    %643 = math.exp %642 : vector<2x2xf32>
    %cst_261 = arith.constant 1.000000e+00 : f32
    %644 = vector.broadcast %cst_261 : f32 to vector<2x2xf32>
    %645 = arith.addf %644, %643 : vector<2x2xf32>
    %646 = math.log %645 : vector<2x2xf32>
    %647 = arith.addf %639, %646 : vector<2x2xf32>
    %c0_262 = arith.constant 0 : index
    %c0_263 = arith.constant 0 : index
    %648 = vector.load %arg12[%c0_262, %c0_263] : memref<2x2xf32, #tpu.memory_space<vmem>>, vector<2x2xf32>
    tpu.vector_store %arg12[%c0_262, %c0_263], %636 {strides = array<i32>} : memref<2x2xf32, #tpu.memory_space<vmem>>, vector<2x2xf32>,
    %c0_264 = arith.constant 0 : index
    %c0_265 = arith.constant 0 : index
    %649 = vector.load %arg13[%c0_264, %c0_265] : memref<2x2xf32, #tpu.memory_space<vmem>>, vector<2x2xf32>
    tpu.vector_store %arg13[%c0_264, %c0_265], %647 {strides = array<i32>} : memref<2x2xf32, #tpu.memory_space<vmem>>, vector<2x2xf32>,
    return
  }
  func.func @transform_0(%arg0: i32) -> (i32, i32, i32) {
    %c0_i32 = arith.constant 0 : i32
    %c0_i32_0 = arith.constant 0 : i32
    %c0_i32_1 = arith.constant 0 : i32
    return %arg0, %c0_i32, %c0_i32_0 : i32, i32, i32
  }
  func.func @transform_1(%arg0: i32) -> (i32, i32) {
    %c0_i32 = arith.constant 0 : i32
    %c0_i32_0 = arith.constant 0 : i32
    %c0_i32_1 = arith.constant 0 : i32
    return %c0_i32, %c0_i32_0 : i32, i32
  }
  func.func @transform_2(%arg0: i32) -> (i32, i32) {
    %c0_i32 = arith.constant 0 : i32
    %c0_i32_0 = arith.constant 0 : i32
    %c0_i32_1 = arith.constant 0 : i32
    return %c0_i32, %c0_i32_0 : i32, i32
  }
  func.func @transform_3(%arg0: i32) -> (i32, i32) {
    %c0_i32 = arith.constant 0 : i32
    %c0_i32_0 = arith.constant 0 : i32
    %c0_i32_1 = arith.constant 0 : i32
    return %c0_i32, %c0_i32_0 : i32, i32
  }
  func.func @transform_4(%arg0: i32) -> (i32, i32) {
    %c0_i32 = arith.constant 0 : i32
    %c0_i32_0 = arith.constant 0 : i32
    %c0_i32_1 = arith.constant 0 : i32
    return %c0_i32, %c0_i32_0 : i32, i32
  }
  func.func @transform_5(%arg0: i32) -> (i32, i32) {
    %c0_i32 = arith.constant 0 : i32
    %c0_i32_0 = arith.constant 0 : i32
    %c0_i32_1 = arith.constant 0 : i32
    return %c0_i32, %c0_i32_0 : i32, i32
  }
  func.func @transform_6(%arg0: i32) -> (i32, i32) {
    %c0_i32 = arith.constant 0 : i32
    %c0_i32_0 = arith.constant 0 : i32
    %c0_i32_1 = arith.constant 0 : i32
    return %c0_i32, %c0_i32_0 : i32, i32
  }
  func.func @transform_7(%arg0: i32) -> (i32, i32) {
    %c0_i32 = arith.constant 0 : i32
    %c0_i32_0 = arith.constant 0 : i32
    %c0_i32_1 = arith.constant 0 : i32
    return %c0_i32, %c0_i32_0 : i32, i32
  }
  func.func @transform_8(%arg0: i32) -> (i32, i32) {
    %c0_i32 = arith.constant 0 : i32
    %c0_i32_0 = arith.constant 0 : i32
    %c0_i32_1 = arith.constant 0 : i32
    return %c0_i32, %c0_i32_0 : i32, i32
  }
  func.func @transform_9(%arg0: i32) -> (i32, i32) {
    %c0_i32 = arith.constant 0 : i32
    %c0_i32_0 = arith.constant 0 : i32
    %c0_i32_1 = arith.constant 0 : i32
    return %c0_i32, %c0_i32_0 : i32, i32
  }
  func.func @transform_10(%arg0: i32) -> (i32, i32) {
    %c0_i32 = arith.constant 0 : i32
    %c0_i32_0 = arith.constant 0 : i32
    %c0_i32_1 = arith.constant 0 : i32
    return %c0_i32, %c0_i32_0 : i32, i32
  }
  func.func @transform_11(%arg0: i32) -> (i32, i32) {
    %c0_i32 = arith.constant 0 : i32
    %c0_i32_0 = arith.constant 0 : i32
    return %arg0, %c0_i32 : i32, i32
  }
  func.func @transform_12(%arg0: i32) -> (i32, i32) {
    %c0_i32 = arith.constant 0 : i32
    %c0_i32_0 = arith.constant 0 : i32
    return %arg0, %c0_i32 : i32, i32
  }
}

</mosaic_0001>

<bundles_post_ra>
// kernel: tpu_custom_call.1
= control target key start
LH: loop header
LB: loop body
LE: loop exit
PB: predicated region body
PF: predicated region fallthrough
CT: control target
= control target key end

     0   :  { %18 = vsyncpa [#allocation6], 0  ;;  %s4725_s0 = inlined_call_operand.hbm [shape: f32[2,8,8], index: 0, kind: input, shape index: {}]   ;;  %s4726_s1 = inlined_call_operand.hbm [shape: f32[8,256], index: 1, kind: input, shape index: {}]   ;;  %s4727_s2 = inlined_call_operand.hbm [shape: f32[64,256], index: 2, kind: input, shape index: {}]   ;;  %s4728_s3 = inlined_call_operand.vmem [shape: f32[1,256], index: 3, kind: input, shape index: {}]   ;;  %s4729_s4 = inlined_call_operand.hbm [shape: f32[64,256], index: 4, kind: input, shape index: {}]   ;;  %s4730_s5 = inlined_call_operand.hbm [shape: f32[64,256], index: 5, kind: input, shape index: {}]   ;;  %s4731_s6 = inlined_call_operand.vmem [shape: f32[1,256], index: 6, kind: input, shape index: {}]   ;;  %s4732_s7 = inlined_call_operand.vmem [shape: f32[64,64], index: 7, kind: input, shape index: {}]   ;;  %s4733_s8 = inlined_call_operand.vmem [shape: f32[1,64], index: 8, kind: input, shape index: {}]   ;;  %s4734_s9 = inlined_call_operand.vmem [shape: f32[64,4], index: 9, kind: input, shape index: {}]   ;;  %s4735_s10 = inlined_call_operand.vmem [shape: f32[1,4], index: 10, kind: input, shape index: {}]   ;;  %s4736_s11 = inlined_call_operand.hbm [shape: f32[2,2], index: 11, kind: output, shape index: {0}]   ;;  %s4737_s12 = inlined_call_operand.hbm [shape: f32[2,2], index: 12, kind: output, shape index: {1}]  }
   0x1   :  { %19 = vsyncpa [#allocation9], 0 }
   0x2   :  { %20 = vsyncpa [#allocation12], 0 }
   0x3   :  { %21 = vsyncpa [#allocation7], 0  ;;  %s41_s23 = sshll.u32 %s4726_s1, 4  ;;  %s42_s23 = int_to_ptr.hbm [resolvable:$true] %s41_s23 }
   0x4   :  { %22 = vsyncpa [#allocation16], 0  ;;  %s3622_s24 = smov [#allocation8]   ;;  %s66_s28 = sshll.u32 %s4729_s4, 4  ;;  %s67_s28 = int_to_ptr.hbm [resolvable:$true] %s66_s28 }
   0x5   :  { %s43_s25 = sshll.u32 %s3622_s24, 4  ;;  %s3623_s29 = smov [#allocation11]   ;;  %s44_s25 = int_to_ptr.vmem [resolvable:$true] %s43_s25 }
   0x6   :  { %46 = dma.hbm_to_vmem [thread:$0]  %s42_s23, 256, %s44_s25, [#allocation9]  }
   0x7   :  { %s68_s30 = sshll.u32 %s3623_s29, 4  ;;  %s27_s15 = sshll.u32 %s4725_s0, 4  ;;  %s69_s30 = int_to_ptr.vmem [resolvable:$true] %s68_s30  ;;  %s28_s15 = int_to_ptr.hbm [resolvable:$true] %s27_s15 }
   0x8   :  { %s3624_s1 = smov 256   ;;  %s3625_s16 = smov 16  }
   0x9   :  { %74 = dma.hbm_to_vmem [thread:$0]  %s67_s28, 2048, %s69_s30, [#allocation12], %s3624_s1, %s3624_s1, %s3625_s16  }
   0xa   :  { %s3626_s17 = smov [#allocation5]   ;;  %s51_s21 = sshll.u32 %s4727_s2, 4  ;;  %s52_s21 = int_to_ptr.hbm [resolvable:$true] %s51_s21 }
   0xb   :  { %s29_s18 = sshll.u32 %s3626_s17, 4  ;;  %s3627_s4 = smov 128   ;;  %s30_s18 = int_to_ptr.vmem [resolvable:$true] %s29_s18 }
   0xc   :  { %s3628_s22 = smov 8   ;;  %s3629_s23 = smov [#allocation10]  }
   0xd   :  { %35 = dma.hbm_to_vmem [thread:$0]  %s28_s15, 256, %s30_s18, [#allocation6], %s3627_s4, %s3627_s4, %s3628_s22  }
   0xe   :  { %s53_s24 = sshll.u32 %s3629_s23, 4  ;;  %s79_s26 = sshll.u32 %s4730_s5, 4  ;;  %s54_s24 = int_to_ptr.vmem [resolvable:$true] %s53_s24  ;;  %s80_s26 = int_to_ptr.hbm [resolvable:$true] %s79_s26 }
   0xf   :  { %59 = dma.hbm_to_vmem [thread:$0]  %s52_s21, 2048, %s54_s24, [#allocation9], %s3624_s1, %s3624_s1, %s3625_s16  }
  0x10   :  { %s3630_s27 = smov [#allocation13]  }
  0x11   :  { %s81_s28 = sshll.u32 %s3630_s27, 4  ;;  %s82_s28 = int_to_ptr.vmem [resolvable:$true] %s81_s28 }
  0x12   :  { %87 = dma.hbm_to_vmem [thread:$0]  %s80_s26, 2048, %s82_s28, [#allocation12], %s3624_s1, %s3624_s1, %s3625_s16  }
  0x13   :  { %3612 = dma.done.wait [#allocation6], 256  }
  0x14   :  { %3613 = vsyncadd [#allocation6], 4294967040 }
  0x15   :  { %3614 = dma.done.wait [#allocation9], 2304  }
  0x16   :  { %3615 = vsyncadd [#allocation9], 4294964992 }
  0x17   :  { %3616 = dma.done.wait [#allocation12], 4096  }
  0x18   :  { %3617 = vsyncadd [#allocation12], 4294963200  ;;  %vm128_vm0 = vcmask 64512   ;;  %v120_v0 = vld [vmem:[#allocation8] sm:$0xff]  ;;  %v3717_v1 = vld [vmem:[#allocation10 + $0x78] sm:$0xff]  ;;  %v3631_v20 = vmov 0.0  }
  0x19   :  { %v118_v2 = vld [vmem:[#allocation5] sm:$0xff]  ;;  %150 = vmatpush.msra.mxu2 %v120_v0  ;;  %233 = vmatpush.msra.mxu3 %v3717_v1  ;;  %v121_v3 = vld [vmem:[#allocation8 + $0x8] sm:$0xff]  ;;  %v3720_v4 = vld [vmem:[#allocation10 + $0x68] sm:$0xff]  ;;  %vm251_vm1 = vcmask 1041409   ;;  %s3633_s29 = smov 32   ;;  %vm366_vm10 = vcmask 261120  }
  0x1a   :  { %v3722_v5 = vld [vmem:[#allocation10 + $0x70] sm:$0xff]  ;;  %3088 = vmatmul.msk.f32.vlgmr.msra.gmra.mxu2 %vm128_vm0, %v118_v2  ;;  %173 = vmatpush.msra.mxu1 %v121_v3  ;;  %v3725_v6 = vld [vmem:[#allocation10 + $0x58] sm:$0xff]  ;;  %v3729_v7 = vld [vmem:[#allocation10 + $0x60] sm:$0xff]  ;;  %vm201_vm11 = vcmask 523264   ;;  %s3634_s20 = smov [#allocation14]   ;;  %s3060_s23 = sshll.u32 %s4736_s11, 4  ;;  %s3061_s23 = int_to_ptr.hbm [resolvable:$true] %s3060_s23 }
  0x1b   :  { %3090 = vmatmul.msk.f32.vlgmr.msra.gmra.mxu1 %vm128_vm0, %v118_v2  ;;  %234 = vmatpush.msra.mxu3 %v3720_v4  ;;  %v3732_v8 = vld [vmem:[#allocation10 + $0x48] sm:$0xff]  ;;  %v3736_v9 = vld [vmem:[#allocation10 + $0x50] sm:$0xff]  ;;  %v3740_v10 = vld [vmem:[#allocation10 + $0x38] sm:$0xff]  ;;  %s3058_s21 = sshll.u32 %s3634_s20, 4  ;;  %s3636_s11 = smov [#allocation15]   ;;  %s3059_s21 = int_to_ptr.vmem [resolvable:$true] %s3058_s21 }
  0x1c   :  { %213 = vmatpush.msrb.mxu2 %v3722_v5  ;;  %399 = vmatpush.msrb.mxu1 %v3717_v1  ;;  %v119_v11 = vld [vmem:[#allocation5 + $0x8] sm:$0xff]  ;;  %v3746_v12 = vld [vmem:[#allocation10 + $0x40] sm:$0xff]  ;;  %v3754_v14 = vld [vmem:[#allocation10 + $0x30] sm:$0xff]  ;;  %s3069_s24 = sshll.u32 %s3636_s11, 4  ;;  %s3070_s24 = int_to_ptr.vmem [resolvable:$true] %s3069_s24 }
  0x1d   :  { %235 = vmatpush.msra.mxu3 %v3725_v6  ;;  %379 = vmatpush.msra.mxu0 %v3722_v5  ;;  %v3750_v13 = vld [vmem:[#allocation10 + $0x28] sm:$0xff]  ;;  %v3759_v15 = vld [vmem:[#allocation10 + $0x18] sm:$0xff]  ;;  %v3762_v16 = vld [vmem:[#allocation10 + $0x20] sm:$0xff] }
  0x1e   :  { %214 = vmatpush.msrb.mxu2 %v3729_v7  ;;  %400 = vmatpush.msrb.mxu1 %v3720_v4  ;;  %v3766_v17 = vld [vmem:[#allocation10 + $0x8] sm:$0xff]  ;;  %v3770_v18 = vld [vmem:[#allocation10 + $0x10] sm:$0xff]  ;;  %v3776_v19 = vld [vmem:[#allocation10] sm:$0xff] }
  0x1f   :  { %236 = vmatpush.msra.mxu3 %v3732_v8  ;;  %380 = vmatpush.msra.mxu0 %v3729_v7  ;;  %v122_v21 = vld [vmem:[%s4728_s3] sm:$0x3]  ;;  %s3632_s3 = smov 64  }
  0x20   :  { %215 = vmatpush.msrb.mxu2 %v3736_v9  ;;  %401 = vmatpush.msrb.mxu1 %v3725_v6  ;;  %v125_v22 = vperm.slane %v122_v21, 1  ;;  %v124_v25 = vperm.slane %v122_v21, 0 }
  0x21   :  { %237 = vmatpush.msra.mxu3 %v3740_v10  ;;  %381 = vmatpush.msra.mxu0 %v3736_v9 }
  0x22   :  { %3089 = vmatmul.msk.f32.gmra.mxu2 %vm128_vm0, %v119_v11  ;;  %402 = vmatpush.msrb.mxu1 %v3732_v8 }
  0x23   :  { %3091 = vmatmul.msk.f32.gmra.mxu1 %vm128_vm0, %v119_v11  ;;  %216 = vmatpush.msrb.mxu2 %v3746_v12 }
  0x24   :  { %238 = vmatpush.msra.mxu3 %v3750_v13  ;;  %382 = vmatpush.msra.mxu0 %v3746_v12 }
  0x25   :  { %217 = vmatpush.msrb.mxu2 %v3754_v14  ;;  %403 = vmatpush.msrb.mxu1 %v3740_v10 }
  0x26   :  { %239 = vmatpush.msra.mxu3 %v3759_v15  ;;  %383 = vmatpush.msra.mxu0 %v3754_v14 }
  0x27   :  { %218 = vmatpush.msrb.mxu2 %v3762_v16  ;;  %404 = vmatpush.msrb.mxu1 %v3750_v13 }
  0x28   :  { %240 = vmatpush.msra.mxu3 %v3766_v17  ;;  %384 = vmatpush.msra.mxu0 %v3762_v16 }
  0x29   :  { %241 = vmatmul.f32.vlgmr.msra.gmra.mxu3 %v3631_v20  ;;  %219 = vmatpush.msrb.mxu2 %v3770_v18 }
  0x2a   :  { %405 = vmatpush.msrb.mxu1 %v3759_v15  ;;  %385 = vmatpush.msra.mxu0 %v3770_v18 }
  0x2b   :  { %220 = vmatpush.msrb.mxu2 %v3776_v19  ;;  %561 = vmatpush.msrb.mxu3 %v3717_v1 }
  0x2c   :  { %221 = vmatmul.f32.vlgmr.msrb.gmra.mxu2 %v3631_v20  ;;  %406 = vmatpush.msrb.mxu1 %v3766_v17 }
  0x2d   :  { %386 = vmatpush.msra.mxu0 %v3776_v19  ;;  %541 = vmatpush.msra.mxu2 %v3722_v5 }
  0x2e   :  { %562 = vmatpush.msrb.mxu3 %v3720_v4  ;;  %723 = vmatpush.msra.mxu1 %v3717_v1 }
  0x2f   :  { %703 = vmatpush.msrb.mxu0 %v3722_v5  ;;  %542 = vmatpush.msra.mxu2 %v3729_v7 }
  0x30   :  { %563 = vmatpush.msrb.mxu3 %v3725_v6  ;;  %724 = vmatpush.msra.mxu1 %v3720_v4 }
  0x31   :  { %704 = vmatpush.msrb.mxu0 %v3729_v7  ;;  %543 = vmatpush.msra.mxu2 %v3736_v9 }
  0x32   :  { %564 = vmatpush.msrb.mxu3 %v3732_v8  ;;  %725 = vmatpush.msra.mxu1 %v3725_v6 }
  0x33   :  { %705 = vmatpush.msrb.mxu0 %v3736_v9  ;;  %544 = vmatpush.msra.mxu2 %v3746_v12 }
  0x34   :  { %565 = vmatpush.msrb.mxu3 %v3740_v10  ;;  %726 = vmatpush.msra.mxu1 %v3732_v8 }
  0x35   :  { %706 = vmatpush.msrb.mxu0 %v3746_v12  ;;  %545 = vmatpush.msra.mxu2 %v3754_v14 }
  0x36   :  { %566 = vmatpush.msrb.mxu3 %v3750_v13  ;;  %727 = vmatpush.msra.mxu1 %v3740_v10 }
  0x37   :  { %707 = vmatpush.msrb.mxu0 %v3754_v14  ;;  %546 = vmatpush.msra.mxu2 %v3762_v16 }
  0x38   :  { %567 = vmatpush.msrb.mxu3 %v3759_v15  ;;  %728 = vmatpush.msra.mxu1 %v3750_v13 }
  0x39   :  { %708 = vmatpush.msrb.mxu0 %v3762_v16  ;;  %547 = vmatpush.msra.mxu2 %v3770_v18 }
  0x3a   :  { %568 = vmatpush.msrb.mxu3 %v3766_v17  ;;  %729 = vmatpush.msra.mxu1 %v3759_v15 }
  0x3b   :  { %709 = vmatpush.msrb.mxu0 %v3770_v18  ;;  %548 = vmatpush.msra.mxu2 %v3776_v19 }
  0x3c   :  { %730 = vmatpush.msra.mxu1 %v3766_v17  ;;  %885 = vmatpush.msra.mxu3 %v3717_v1 }
  0x3d   :  { %710 = vmatpush.msrb.mxu0 %v3776_v19  ;;  %865 = vmatpush.msrb.mxu2 %v3722_v5 }
  0x3e   :  { %886 = vmatpush.msra.mxu3 %v3720_v4 }
  0x3f   :  { %866 = vmatpush.msrb.mxu2 %v3729_v7 }
  0x40   :  { %887 = vmatpush.msra.mxu3 %v3725_v6 }
  0x41   :  { %867 = vmatpush.msrb.mxu2 %v3736_v9 }
  0x42   :  { %888 = vmatpush.msra.mxu3 %v3732_v8 }
  0x43   :  { %868 = vmatpush.msrb.mxu2 %v3746_v12 }
  0x44   :  { %889 = vmatpush.msra.mxu3 %v3740_v10 }
  0x45   :  { %869 = vmatpush.msrb.mxu2 %v3754_v14 }
  0x46   :  { %890 = vmatpush.msra.mxu3 %v3750_v13 }
  0x47   :  { %870 = vmatpush.msrb.mxu2 %v3762_v16 }
  0x48   :  { %891 = vmatpush.msra.mxu3 %v3759_v15 }
  0x49   :  { %871 = vmatpush.msrb.mxu2 %v3770_v18 }
  0x4a   :  { %892 = vmatpush.msra.mxu3 %v3766_v17 }
  0x4b   :  { %872 = vmatpush.msrb.mxu2 %v3776_v19 }
  0x98   :  { %v175_v23 = vpop.f32.mrf.mxu1 }
  0x99   :  { %v176_v24 = vadd.f32 %v175_v23, %v125_v22 }
  0x9b   :  { %182 = vst [vmem:[#allocation4 + $0x8] sm:$0xff] %v176_v24 }
  0x9d   :  { %v152_v26 = vpop.f32.mrf.mxu2 }
  0x9e   :  { %v153_v27 = vadd.f32 %v152_v26, %v124_v25 }
  0xa0   :  { %181 = vst [vmem:[#allocation4] sm:$0xff] %v153_v27  ;;  %v178_v28 = vpop.f32.mrf.mxu1 }
  0xa1   :  { %v179_v29 = vadd.f32 %v178_v28, %v125_v22 }
  0xa2   :  { %v247_v37 = vld [vmem:[#allocation4 + $0xf] ss:$0 sm:$0xff] }
  0xa3   :  { %184 = vst [vmem:[#allocation4 + $0x18] sm:$0xff] %v179_v29 }
  0xa5   :  { %v155_v30 = vpop.f32.mrf.mxu2 }
  0xa6   :  { %v156_v31 = vadd.f32 %v155_v30, %v124_v25 }
  0xa7   :  { %v245_v33 = vld [vmem:[#allocation4] ss:$0 sm:$0xff] }
  0xa8   :  { %183 = vst [vmem:[#allocation4 + $0x10] sm:$0xff] %v156_v31 }
  0xaa   :  { %v248_v38 = vld [vmem:[#allocation4 + $0x1f] ss:$0 sm:$0xff] }
  0xab   :  { %v256_v40 = vsel %vm251_vm1, %v248_v38, %v247_v37 }
  0xac   :  { %v242_v39 = vpop.f32.mrf.mxu3 }
  0xad   :  { %v259_v42 = vadd.f32 %v256_v40, %v242_v39 }
  0xaf   :  { %v222_v32 = vpop.f32.mrf.mxu2  ;;  %v246_v34 = vld [vmem:[#allocation4 + $0x10] ss:$0 sm:$0xff]  ;;  %v3093_v45 = vmul.f32 -1.442695, %v259_v42 }
  0xb0   :  { %v252_v35 = vsel %vm251_vm1, %v246_v34, %v245_v33 }
  0xb1   :  { %v258_v36 = vadd.f32 %v252_v35, %v222_v32 }
  0xb3   :  { %3176 = vtanh.f32 %v258_v36  ;;  %v3092_v44 = vmul.f32 -1.442695, %v258_v36 }
  0xb4   :  { %3178 = vtanh.f32 %v259_v42  ;;  %v412_v42 = vld [vmem:[#allocation4 + $0x11] ss:$0 sm:$0xff] }
  0xb5   :  { %3180 = vpow2.f32 %v3092_v44  ;;  %v414_v44 = vld [vmem:[#allocation4 + $0x1e] ss:$0 sm:$0xff] }
  0xb6   :  { %3182 = vpow2.f32 %v3093_v45  ;;  %v411_v45 = vld [vmem:[#allocation4 + $0x1] ss:$0 sm:$0xff] }
  0xb9   :  { %v3177_v41 = vpop.eup %3176 }
  0xba   :  { %301 = vrot.lane.b32.xlu0 %v3177_v41, %s3632_s3  ;;  %v3179_v43 = vpop.eup %3178 }
  0xbb   :  { %v3181_v46 = vpop.eup %3180 }
  0xbc   :  { %v266_v47 = vadd.f32 1.0, %v3181_v46  ;;  %v3183_v48 = vpop.eup %3182 }
  0xbd   :  { %v267_v49 = vadd.f32 1.0, %v3183_v48 }
  0xbe   :  { %3184 = vrcp.f32 %v266_v47  ;;  %v279_v58 = vand.u32 2147483648, %v266_v47  ;;  %vm273_vm3 = vweird.f32 %v266_v47  ;;  %v277_v59 = vand.u32 2147483647, %v266_v47 }
  0xbf   :  { %3186 = vrcp.f32 %v267_v49  ;;  %v294_v11 = vand.u32 2147483648, %v267_v49  ;;  %vm288_vm7 = vweird.f32 %v267_v49  ;;  %v292_v21 = vand.u32 2147483647, %v267_v49 }
  0xc0   :  { %v280_v62 = vor.u32 1.1754944e-38, %v279_v58  ;;  %vm278_vm5 = vcmp.eq.f32.partialorder %v277_v59, 8.507059e+37 }
  0xc1   :  { %v295_v23 = vor.u32 1.1754944e-38, %v294_v11  ;;  %vm293_vm9 = vcmp.eq.f32.partialorder %v292_v21, 8.507059e+37 }
  0xc2   :  { %319 = vrot.lane.b32.xlu0 %v3179_v43, %s3632_s3  ;;  %v413_v43 = vld [vmem:[#allocation4 + $0xe] ss:$0 sm:$0xff] }
  0xc4   :  { %v3185_v50 = vpop.eup %3184 }
  0xc5   :  { %v269_v51 = vmul.f32 %v3185_v50, %v266_v47  ;;  %v3187_v53 = vpop.eup %3186  ;;  %vm274_vm2 = vweird.f32 %v3185_v50  ;;  %v417_v47 = vsel %vm251_vm1, %v412_v42, %v411_v45 }
  0xc6   :  { %v284_v55 = vmul.f32 %v3187_v53, %v267_v49  ;;  %vm275_vm4 = vmor %vm273_vm3, %vm274_vm2  ;;  %vm289_vm6 = vweird.f32 %v3187_v53  ;;  %v421_v49 = vsel %vm251_vm1, %v414_v44, %v413_v43 }
  0xc7   :  { %v270_v52 = vsub.f32 1.0, %v269_v51  ;;  %vm290_vm8 = vmor %vm288_vm7, %vm289_vm6 }
  0xc8   :  { %v285_v57 = vsub.f32 1.0, %v284_v55 }
  0xc9   :  { %v271_v54 = vmul.f32 %v3185_v50, %v270_v52 }
  0xca   :  { %v286_v61 = vmul.f32 %v3187_v53, %v285_v57 }
  0xcb   :  { %v272_v56 = vadd.f32 %v3185_v50, %v271_v54 }
  0xcc   :  { %v287_v3 = vadd.f32 %v3187_v53, %v286_v61 }
  0xcd   :  { %v276_v60 = vsel %vm275_vm4, %v3185_v50, %v272_v56 }
  0xce   :  { %v281_v0 = vsel %vm278_vm5, %v280_v62, %v276_v60  ;;  %v291_v22 = vsel %vm290_vm8, %v3187_v53, %v287_v3 }
  0xcf   :  { %v296_v24 = vsel %vm293_vm9, %v295_v23, %v291_v22  ;;  %v298_v27 = vmul.f32 0.0, %v281_v0 }
  0xd0   :  { %v316_v30 = vmul.f32 0.0, %v296_v24 }
 0x12c   :  { %v302_v63 = vpop.permute.xlu0 %301 }
 0x12d   :  { %v304_v2 = vmul.f32 %v302_v63, %v281_v0 }
 0x12f   :  { %306 = vrot.lane.b32.xlu1 %v304_v2, %s3633_s29 }
 0x134   :  { %v320_v25 = vpop.permute.xlu0 %319 }
 0x135   :  { %v322_v26 = vmul.f32 %v320_v25, %v296_v24 }
 0x137   :  { %324 = vrot.lane.b32.xlu1 %v322_v26, %s3633_s29 }
 0x1a1   :  { %v307_v28 = vpop.permute.xlu1 %306 }
 0x1a2   :  { %v3844_v29 = vadd.f32 %v307_v28, %v298_v27 }
 0x1a4   :  { %3188 = vtanh.f32 %v3844_v29 }
 0x1a9   :  { %v325_v31 = vpop.permute.xlu1 %324 }
 0x1aa   :  { %v3189_v32 = vpop.eup %3188  ;;  %v3847_v33 = vadd.f32 %v325_v31, %v316_v30 }
 0x1ab   :  { %312 = vrot.lane.b32.xlu2 %v3189_v32, %s3632_s3 }
 0x1ac   :  { %3190 = vtanh.f32 %v3847_v33 }
 0x1b2   :  { %v3191_v34 = vpop.eup %3190 }
 0x1b3   :  { %330 = vrot.lane.b32.xlu2 %v3191_v34, %s3632_s3 }
 0x205   :  { %v313_v35 = vpop.permute.xlu2 %312 }
 0x206   :  { %v3852_v36 = vmul.f32 %v313_v35, %v281_v0 }
 0x208   :  { %360 = vrot.lane.b32.xlu0 %v3852_v36, %s3633_s29 }
 0x20d   :  { %v331_v37 = vpop.permute.xlu2 %330 }
 0x20e   :  { %v3856_v38 = vmul.f32 %v331_v37, %v296_v24 }
 0x210   :  { %363 = vrot.lane.b32.xlu1 %v3856_v38, %s3632_s3 }
 0x27a   :  { %v361_v39 = vpop.permute.xlu0 %360 }
 0x282   :  { %v364_v40 = vpop.permute.xlu1 %363 }
 0x283   :  { %v367_v41 = vsel %vm366_vm10, %v361_v39, %v364_v40 }
 0x284   :  { %3094 = vmatmul.msk.f32.vlgmr.msra.gmra.mxu0 %vm201_vm11, %v367_v41  ;;  %3095 = vmatmul.msk.f32.vlgmr.msrb.gmra.mxu1 %vm201_vm11, %v367_v41 }
 0x285   :  { %1027 = vmatpush.msra.mxu0 %v3722_v5  ;;  %1047 = vmatpush.msrb.mxu1 %v3717_v1 }
 0x287   :  { %1028 = vmatpush.msra.mxu0 %v3729_v7  ;;  %1048 = vmatpush.msrb.mxu1 %v3720_v4 }
 0x289   :  { %1029 = vmatpush.msra.mxu0 %v3736_v9  ;;  %1049 = vmatpush.msrb.mxu1 %v3725_v6 }
 0x28b   :  { %1030 = vmatpush.msra.mxu0 %v3746_v12  ;;  %1050 = vmatpush.msrb.mxu1 %v3732_v8 }
 0x28d   :  { %1031 = vmatpush.msra.mxu0 %v3754_v14  ;;  %1051 = vmatpush.msrb.mxu1 %v3740_v10 }
 0x28f   :  { %1032 = vmatpush.msra.mxu0 %v3762_v16  ;;  %1052 = vmatpush.msrb.mxu1 %v3750_v13 }
 0x291   :  { %1033 = vmatpush.msra.mxu0 %v3770_v18  ;;  %1053 = vmatpush.msrb.mxu1 %v3759_v15 }
 0x293   :  { %1034 = vmatpush.msra.mxu0 %v3776_v19  ;;  %1054 = vmatpush.msrb.mxu1 %v3766_v17 }
 0x301   :  { %v388_v46 = vpop.f32.mrf.mxu0  ;;  %v408_v48 = vpop.f32.mrf.mxu1 }
 0x302   :  { %v423_v50 = vadd.f32 %v417_v47, %v388_v46  ;;  %v424_v51 = vadd.f32 %v421_v49, %v408_v48 }
 0x304   :  { %3192 = vtanh.f32 %v423_v50  ;;  %v3096_v54 = vmul.f32 -1.442695, %v423_v50  ;;  %v3097_v58 = vmul.f32 -1.442695, %v424_v51 }
 0x305   :  { %3194 = vtanh.f32 %v424_v51 }
 0x306   :  { %3196 = vpow2.f32 %v3096_v54  ;;  %v574_v54 = vld [vmem:[#allocation4 + $0x12] ss:$0 sm:$0xff] }
 0x30a   :  { %v3193_v52 = vpop.eup %3192 }
 0x30b   :  { %v3195_v53 = vpop.eup %3194  ;;  %466 = vrot.lane.b32.xlu2 %v3193_v52, %s3632_s3 }
 0x30c   :  { %484 = vrot.lane.b32.xlu0 %v3195_v53, %s3632_s3  ;;  %v3197_v55 = vpop.eup %3196 }
 0x30d   :  { %v431_v56 = vadd.f32 1.0, %v3197_v55  ;;  %v575_v55 = vld [vmem:[#allocation4 + $0xd] ss:$0 sm:$0xff] }
 0x30f   :  { %3198 = vrcp.f32 %v431_v56  ;;  %v444_v2 = vand.u32 2147483648, %v431_v56  ;;  %vm438_vm13 = vweird.f32 %v431_v56  ;;  %v442_v3 = vand.u32 2147483647, %v431_v56 }
 0x310   :  { %3200 = vpow2.f32 %v3097_v58 }
 0x311   :  { %v445_v21 = vor.u32 1.1754944e-38, %v444_v2  ;;  %vm443_vm15 = vcmp.eq.f32.partialorder %v442_v3, 8.507059e+37 }
 0x315   :  { %v3199_v57 = vpop.eup %3198 }
 0x316   :  { %v434_v59 = vmul.f32 %v3199_v57, %v431_v56  ;;  %v3201_v62 = vpop.eup %3200  ;;  %vm439_vm12 = vweird.f32 %v3199_v57  ;;  %v576_v56 = vld [vmem:[#allocation4 + $0x1d] ss:$0 sm:$0xff] }
 0x317   :  { %v432_v63 = vadd.f32 1.0, %v3201_v62  ;;  %vm440_vm14 = vmor %vm438_vm13, %vm439_vm12 }
 0x318   :  { %v435_v60 = vsub.f32 1.0, %v434_v59 }
 0x319   :  { %3202 = vrcp.f32 %v432_v63  ;;  %v459_v31 = vand.u32 2147483648, %v432_v63  ;;  %vm453_vm2 = vweird.f32 %v432_v63  ;;  %v457_v32 = vand.u32 2147483647, %v432_v63 }
 0x31a   :  { %v436_v61 = vmul.f32 %v3199_v57, %v435_v60 }
 0x31b   :  { %v460_v35 = vor.u32 1.1754944e-38, %v459_v31  ;;  %vm458_vm4 = vcmp.eq.f32.partialorder %v457_v32, 8.507059e+37 }
 0x31c   :  { %v437_v0 = vadd.f32 %v3199_v57, %v436_v61  ;;  %v583_v61 = vsel %vm251_vm1, %v576_v56, %v575_v55 }
 0x31e   :  { %v441_v11 = vsel %vm440_vm14, %v3199_v57, %v437_v0  ;;  %v573_v57 = vld [vmem:[#allocation4 + $0x2] ss:$0 sm:$0xff] }
 0x31f   :  { %v446_v23 = vsel %vm443_vm15, %v445_v21, %v441_v11  ;;  %v3203_v25 = vpop.eup %3202  ;;  %v579_v59 = vsel %vm251_vm1, %v574_v54, %v573_v57 }
 0x320   :  { %v449_v26 = vmul.f32 %v3203_v25, %v432_v63  ;;  %vm454_vm0 = vweird.f32 %v3203_v25  ;;  %v463_v41 = vmul.f32 %v446_v23, %v3844_v29 }
 0x321   :  { %vm455_vm3 = vmor %vm453_vm2, %vm454_vm0 }
 0x322   :  { %v450_v27 = vsub.f32 1.0, %v449_v26 }
 0x324   :  { %v451_v28 = vmul.f32 %v3203_v25, %v450_v27 }
 0x326   :  { %v452_v30 = vadd.f32 %v3203_v25, %v451_v28 }
 0x328   :  { %v456_v34 = vsel %vm455_vm3, %v3203_v25, %v452_v30 }
 0x329   :  { %v461_v39 = vsel %vm458_vm4, %v460_v35, %v456_v34 }
 0x32a   :  { %v481_v42 = vmul.f32 %v461_v39, %v3847_v33 }
 0x365   :  { %v467_v22 = vpop.permute.xlu2 %466 }
 0x366   :  { %v469_v24 = vmul.f32 %v467_v22, %v446_v23 }
 0x368   :  { %471 = vrot.lane.b32.xlu1 %v469_v24, %s3633_s29 }
 0x37e   :  { %v485_v37 = vpop.permute.xlu0 %484 }
 0x37f   :  { %v487_v40 = vmul.f32 %v485_v37, %v461_v39 }
 0x381   :  { %489 = vrot.lane.b32.xlu2 %v487_v40, %s3633_s29 }
 0x3da   :  { %v472_v43 = vpop.permute.xlu1 %471 }
 0x3db   :  { %v490_v44 = vpop.permute.xlu2 %489  ;;  %v3887_v45 = vadd.f32 %v472_v43, %v463_v41 }
 0x3dc   :  { %v3889_v46 = vadd.f32 %v490_v44, %v481_v42 }
 0x3dd   :  { %3204 = vtanh.f32 %v3887_v45 }
 0x3de   :  { %3206 = vtanh.f32 %v3889_v46 }
 0x3e3   :  { %v3205_v47 = vpop.eup %3204 }
 0x3e4   :  { %v3207_v48 = vpop.eup %3206  ;;  %477 = vrot.lane.b32.xlu0 %v3205_v47, %s3632_s3 }
 0x3e5   :  { %495 = vrot.lane.b32.xlu1 %v3207_v48, %s3632_s3 }
 0x456   :  { %v478_v49 = vpop.permute.xlu0 %477 }
 0x457   :  { %v496_v29 = vpop.permute.xlu1 %495  ;;  %v3895_v50 = vmul.f32 %v478_v49, %v446_v23 }
 0x458   :  { %v3897_v33 = vmul.f32 %v496_v29, %v461_v39 }
 0x459   :  { %523 = vrot.lane.b32.xlu2 %v3895_v50, %s3633_s29 }
 0x45a   :  { %526 = vrot.lane.b32.xlu0 %v3897_v33, %s3632_s3 }
 0x4b3   :  { %v524_v51 = vpop.permute.xlu2 %523 }
 0x4cc   :  { %v527_v52 = vpop.permute.xlu0 %526 }
 0x4cd   :  { %v529_v53 = vsel %vm366_vm10, %v524_v51, %v527_v52 }
 0x4ce   :  { %3098 = vmatmul.msk.f32.vlgmr.msra.gmra.mxu2 %vm201_vm11, %v529_v53  ;;  %3099 = vmatmul.msk.f32.vlgmr.msrb.gmra.mxu3 %vm201_vm11, %v529_v53 }
 0x4cf   :  { %1189 = vmatpush.msra.mxu2 %v3722_v5  ;;  %1209 = vmatpush.msrb.mxu3 %v3717_v1 }
 0x4d1   :  { %1190 = vmatpush.msra.mxu2 %v3729_v7  ;;  %1210 = vmatpush.msrb.mxu3 %v3720_v4 }
 0x4d3   :  { %1191 = vmatpush.msra.mxu2 %v3736_v9  ;;  %1211 = vmatpush.msrb.mxu3 %v3725_v6 }
 0x4d5   :  { %1192 = vmatpush.msra.mxu2 %v3746_v12  ;;  %1212 = vmatpush.msrb.mxu3 %v3732_v8 }
 0x4d7   :  { %1193 = vmatpush.msra.mxu2 %v3754_v14  ;;  %1213 = vmatpush.msrb.mxu3 %v3740_v10 }
 0x4d9   :  { %1194 = vmatpush.msra.mxu2 %v3762_v16  ;;  %1214 = vmatpush.msrb.mxu3 %v3750_v13 }
 0x4db   :  { %1195 = vmatpush.msra.mxu2 %v3770_v18  ;;  %1215 = vmatpush.msrb.mxu3 %v3759_v15 }
 0x4dd   :  { %1196 = vmatpush.msra.mxu2 %v3776_v19  ;;  %1216 = vmatpush.msrb.mxu3 %v3766_v17 }
 0x551   :  { %v550_v58 = vpop.f32.mrf.mxu2  ;;  %v570_v60 = vpop.f32.mrf.mxu3 }
 0x552   :  { %v585_v62 = vadd.f32 %v579_v59, %v550_v58  ;;  %v586_v63 = vadd.f32 %v583_v61, %v570_v60 }
 0x554   :  { %3208 = vtanh.f32 %v585_v62  ;;  %v3101_v3 = vmul.f32 -1.442695, %v586_v63  ;;  %v3100_v23 = vmul.f32 -1.442695, %v585_v62 }
 0x555   :  { %3210 = vtanh.f32 %v586_v63 }
 0x556   :  { %3212 = vpow2.f32 %v3101_v3 }
 0x55a   :  { %v3209_v0 = vpop.eup %3208 }
 0x55b   :  { %v3211_v2 = vpop.eup %3210  ;;  %628 = vrot.lane.b32.xlu1 %v3209_v0, %s3632_s3 }
 0x55c   :  { %646 = vrot.lane.b32.xlu2 %v3211_v2, %s3632_s3  ;;  %v3213_v11 = vpop.eup %3212 }
 0x55d   :  { %v594_v21 = vadd.f32 1.0, %v3213_v11 }
 0x55f   :  { %3214 = vrcp.f32 %v594_v21  ;;  %v621_v31 = vand.u32 2147483648, %v594_v21  ;;  %vm615_vm6 = vweird.f32 %v594_v21  ;;  %v619_v32 = vand.u32 2147483647, %v594_v21 }
 0x560   :  { %3216 = vpow2.f32 %v3100_v23 }
 0x561   :  { %v622_v35 = vor.u32 1.1754944e-38, %v621_v31  ;;  %vm620_vm8 = vcmp.eq.f32.partialorder %v619_v32, 8.507059e+37 }
 0x565   :  { %v3215_v22 = vpop.eup %3214 }
 0x566   :  { %v611_v24 = vmul.f32 %v3215_v22, %v594_v21  ;;  %v3217_v26 = vpop.eup %3216  ;;  %vm616_vm5 = vweird.f32 %v3215_v22 }
 0x567   :  { %v593_v28 = vadd.f32 1.0, %v3217_v26  ;;  %vm617_vm7 = vmor %vm615_vm6, %vm616_vm5 }
 0x568   :  { %v612_v25 = vsub.f32 1.0, %v611_v24 }
 0x569   :  { %3218 = vrcp.f32 %v593_v28  ;;  %v606_v48 = vand.u32 2147483648, %v593_v28  ;;  %vm600_vm12 = vweird.f32 %v593_v28  ;;  %v604_v49 = vand.u32 2147483647, %v593_v28 }
 0x56a   :  { %v613_v27 = vmul.f32 %v3215_v22, %v612_v25 }
 0x56b   :  { %v607_v51 = vor.u32 1.1754944e-38, %v606_v48  ;;  %vm605_vm14 = vcmp.eq.f32.partialorder %v604_v49, 8.507059e+37 }
 0x56c   :  { %v614_v30 = vadd.f32 %v3215_v22, %v613_v27 }
 0x56e   :  { %v618_v34 = vsel %vm617_vm7, %v3215_v22, %v614_v30 }
 0x56f   :  { %v623_v39 = vsel %vm620_vm8, %v622_v35, %v618_v34  ;;  %v3219_v40 = vpop.eup %3218 }
 0x570   :  { %v596_v42 = vmul.f32 %v3219_v40, %v593_v28  ;;  %vm601_vm9 = vweird.f32 %v3219_v40  ;;  %v643_v55 = vmul.f32 %v623_v39, %v3889_v46 }
 0x571   :  { %vm602_vm13 = vmor %vm600_vm12, %vm601_vm9 }
 0x572   :  { %v597_v43 = vsub.f32 1.0, %v596_v42 }
 0x574   :  { %v598_v44 = vmul.f32 %v3219_v40, %v597_v43 }
 0x576   :  { %v599_v47 = vadd.f32 %v3219_v40, %v598_v44 }
 0x578   :  { %v603_v29 = vsel %vm602_vm13, %v3219_v40, %v599_v47 }
 0x579   :  { %v608_v53 = vsel %vm605_vm14, %v607_v51, %v603_v29 }
 0x57a   :  { %v625_v59 = vmul.f32 %v608_v53, %v3887_v45 }
 0x5b6   :  { %v647_v37 = vpop.permute.xlu2 %646 }
 0x5b7   :  { %v649_v41 = vmul.f32 %v647_v37, %v623_v39 }
 0x5b9   :  { %651 = vrot.lane.b32.xlu1 %v649_v41, %s3633_s29 }
 0x5cd   :  { %v629_v52 = vpop.permute.xlu1 %628 }
 0x5ce   :  { %v631_v54 = vmul.f32 %v629_v52, %v608_v53 }
 0x5d0   :  { %633 = vrot.lane.b32.xlu0 %v631_v54, %s3633_s29 }
 0x62b   :  { %v652_v56 = vpop.permute.xlu1 %651 }
 0x62c   :  { %v3929_v57 = vadd.f32 %v652_v56, %v643_v55 }
 0x62e   :  { %3220 = vtanh.f32 %v3929_v57 }
 0x634   :  { %v3221_v58 = vpop.eup %3220 }
 0x635   :  { %657 = vrot.lane.b32.xlu0 %v3221_v58, %s3632_s3 }
 0x642   :  { %v634_v60 = vpop.permute.xlu0 %633 }
 0x643   :  { %v3934_v61 = vadd.f32 %v634_v60, %v625_v59 }
 0x645   :  { %3222 = vtanh.f32 %v3934_v61 }
 0x64b   :  { %v3223_v62 = vpop.eup %3222 }
 0x64c   :  { %639 = vrot.lane.b32.xlu2 %v3223_v62, %s3632_s3 }
 0x6a6   :  { %v640_v63 = vpop.permute.xlu2 %639 }
 0x6a7   :  { %v658_v46 = vpop.permute.xlu0 %657  ;;  %v3938_v0 = vmul.f32 %v640_v63, %v608_v53 }
 0x6a8   :  { %v3940_v2 = vmul.f32 %v658_v46, %v623_v39 }
 0x6a9   :  { %685 = vrot.lane.b32.xlu1 %v3938_v0, %s3633_s29 }
 0x6aa   :  { %688 = vrot.lane.b32.xlu2 %v3940_v2, %s3632_s3 }
 0x704   :  { %v689_v45 = vpop.permute.xlu2 %688 }
 0x71b   :  { %v686_v3 = vpop.permute.xlu1 %685 }
 0x71c   :  { %v691_v11 = vsel %vm366_vm10, %v686_v3, %v689_v45 }
 0x71d   :  { %3102 = vmatmul.msk.f32.vlgmr.msrb.gmra.mxu0 %vm201_vm11, %v691_v11  ;;  %3103 = vmatmul.msk.f32.vlgmr.msra.gmra.mxu1 %vm201_vm11, %v691_v11 }
 0x71e   :  { %1351 = vmatpush.msrb.mxu0 %v3722_v5  ;;  %1371 = vmatpush.msra.mxu1 %v3717_v1  ;;  %v736_v1 = vld [vmem:[#allocation4 + $0x13] ss:$0 sm:$0xff]  ;;  %v738_v5 = vld [vmem:[#allocation4 + $0x1c] ss:$0 sm:$0xff] }
 0x720   :  { %1352 = vmatpush.msrb.mxu0 %v3729_v7  ;;  %1372 = vmatpush.msra.mxu1 %v3720_v4  ;;  %v737_v4 = vld [vmem:[#allocation4 + $0xc] ss:$0 sm:$0xff] }
 0x722   :  { %1353 = vmatpush.msrb.mxu0 %v3736_v9  ;;  %1373 = vmatpush.msra.mxu1 %v3725_v6  ;;  %v735_v6 = vld [vmem:[#allocation4 + $0x3] ss:$0 sm:$0xff] }
 0x724   :  { %1354 = vmatpush.msrb.mxu0 %v3746_v12  ;;  %1374 = vmatpush.msra.mxu1 %v3732_v8  ;;  %v741_v8 = vsel %vm251_vm1, %v736_v1, %v735_v6  ;;  %v898_v1 = vld [vmem:[#allocation4 + $0x14] ss:$0 sm:$0xff]  ;;  %v897_v6 = vld [vmem:[#allocation4 + $0x4] ss:$0 sm:$0xff] }
 0x726   :  { %1355 = vmatpush.msrb.mxu0 %v3754_v14  ;;  %1375 = vmatpush.msra.mxu1 %v3740_v10  ;;  %v745_v10 = vsel %vm251_vm1, %v738_v5, %v737_v4  ;;  %v899_v4 = vld [vmem:[#allocation4 + $0xb] ss:$0 sm:$0xff]  ;;  %v900_v5 = vld [vmem:[#allocation4 + $0x1b] ss:$0 sm:$0xff] }
 0x728   :  { %1356 = vmatpush.msrb.mxu0 %v3762_v16  ;;  %1376 = vmatpush.msra.mxu1 %v3750_v13 }
 0x72a   :  { %1357 = vmatpush.msrb.mxu0 %v3770_v18  ;;  %1377 = vmatpush.msra.mxu1 %v3759_v15 }
 0x72c   :  { %1358 = vmatpush.msrb.mxu0 %v3776_v19  ;;  %1378 = vmatpush.msra.mxu1 %v3766_v17 }
 0x79a   :  { %v712_v7 = vpop.f32.mrf.mxu0  ;;  %v732_v9 = vpop.f32.mrf.mxu1 }
 0x79b   :  { %v747_v12 = vadd.f32 %v741_v8, %v712_v7  ;;  %v748_v13 = vadd.f32 %v745_v10, %v732_v9  ;;  %v903_v8 = vsel %vm251_vm1, %v898_v1, %v897_v6  ;;  %v907_v10 = vsel %vm251_vm1, %v900_v5, %v899_v4  ;;  %v1060_v5 = vld [vmem:[#allocation4 + $0x15] ss:$0 sm:$0xff]  ;;  %v1061_v6 = vld [vmem:[#allocation4 + $0xa] ss:$0 sm:$0xff] }
 0x79d   :  { %3224 = vtanh.f32 %v747_v12  ;;  %v3104_v16 = vmul.f32 -1.442695, %v747_v12  ;;  %v3105_v17 = vmul.f32 -1.442695, %v748_v13 }
 0x79e   :  { %3226 = vtanh.f32 %v748_v13 }
 0x79f   :  { %3228 = vpow2.f32 %v3104_v16 }
 0x7a0   :  { %3230 = vpow2.f32 %v3105_v17 }
 0x7a3   :  { %v3225_v14 = vpop.eup %3224 }
 0x7a4   :  { %v3227_v15 = vpop.eup %3226  ;;  %790 = vrot.lane.b32.xlu0 %v3225_v14, %s3632_s3 }
 0x7a5   :  { %808 = vrot.lane.b32.xlu1 %v3227_v15, %s3632_s3  ;;  %v3229_v18 = vpop.eup %3228 }
 0x7a6   :  { %v3231_v19 = vpop.eup %3230  ;;  %v755_v21 = vadd.f32 1.0, %v3229_v18 }
 0x7a7   :  { %v756_v22 = vadd.f32 1.0, %v3231_v19 }
 0x7a8   :  { %3232 = vrcp.f32 %v755_v21  ;;  %v768_v35 = vand.u32 2147483648, %v755_v21  ;;  %vm762_vm2 = vweird.f32 %v755_v21  ;;  %v766_v39 = vand.u32 2147483647, %v755_v21 }
 0x7a9   :  { %3234 = vrcp.f32 %v756_v22  ;;  %v783_v37 = vand.u32 2147483648, %v756_v22  ;;  %vm777_vm3 = vweird.f32 %v756_v22  ;;  %v781_v40 = vand.u32 2147483647, %v756_v22 }
 0x7aa   :  { %v769_v43 = vor.u32 1.1754944e-38, %v768_v35  ;;  %vm767_vm6 = vcmp.eq.f32.partialorder %v766_v39, 8.507059e+37 }
 0x7ab   :  { %v784_v44 = vor.u32 1.1754944e-38, %v783_v37  ;;  %vm782_vm7 = vcmp.eq.f32.partialorder %v781_v40, 8.507059e+37 }
 0x7ae   :  { %v3233_v23 = vpop.eup %3232 }
 0x7af   :  { %v3235_v24 = vpop.eup %3234  ;;  %v758_v25 = vmul.f32 %v3233_v23, %v755_v21  ;;  %vm763_vm15 = vweird.f32 %v3233_v23 }
 0x7b0   :  { %v773_v26 = vmul.f32 %v3235_v24, %v756_v22  ;;  %vm778_vm0 = vweird.f32 %v3235_v24  ;;  %vm764_vm4 = vmor %vm762_vm2, %vm763_vm15 }
 0x7b1   :  { %v759_v27 = vsub.f32 1.0, %v758_v25  ;;  %vm779_vm5 = vmor %vm777_vm3, %vm778_vm0 }
 0x7b2   :  { %v774_v28 = vsub.f32 1.0, %v773_v26 }
 0x7b3   :  { %v760_v30 = vmul.f32 %v3233_v23, %v759_v27 }
 0x7b4   :  { %v775_v31 = vmul.f32 %v3235_v24, %v774_v28 }
 0x7b5   :  { %v761_v32 = vadd.f32 %v3233_v23, %v760_v30 }
 0x7b6   :  { %v776_v34 = vadd.f32 %v3235_v24, %v775_v31 }
 0x7b7   :  { %v765_v41 = vsel %vm764_vm4, %v3233_v23, %v761_v32 }
 0x7b8   :  { %v780_v42 = vsel %vm779_vm5, %v3235_v24, %v776_v34  ;;  %v770_v48 = vsel %vm767_vm6, %v769_v43, %v765_v41 }
 0x7b9   :  { %v785_v29 = vsel %vm782_vm7, %v784_v44, %v780_v42  ;;  %v787_v53 = vmul.f32 %v770_v48, %v3934_v61 }
 0x7ba   :  { %v805_v58 = vmul.f32 %v785_v29, %v3929_v57 }
 0x816   :  { %v791_v47 = vpop.permute.xlu0 %790 }
 0x817   :  { %v809_v49 = vpop.permute.xlu1 %808  ;;  %v793_v51 = vmul.f32 %v791_v47, %v770_v48 }
 0x818   :  { %v811_v52 = vmul.f32 %v809_v49, %v785_v29 }
 0x819   :  { %795 = vrot.lane.b32.xlu2 %v793_v51, %s3633_s29 }
 0x81a   :  { %813 = vrot.lane.b32.xlu0 %v811_v52, %s3633_s29 }
 0x873   :  { %v796_v54 = vpop.permute.xlu2 %795 }
 0x874   :  { %v3972_v55 = vadd.f32 %v796_v54, %v787_v53 }
 0x876   :  { %3236 = vtanh.f32 %v3972_v55 }
 0x87c   :  { %v3237_v56 = vpop.eup %3236 }
 0x87d   :  { %801 = vrot.lane.b32.xlu1 %v3237_v56, %s3632_s3 }
 0x88c   :  { %v814_v59 = vpop.permute.xlu0 %813 }
 0x88d   :  { %v3977_v60 = vadd.f32 %v814_v59, %v805_v58 }
 0x88f   :  { %3238 = vtanh.f32 %v3977_v60 }
 0x895   :  { %v3239_v62 = vpop.eup %3238 }
 0x896   :  { %819 = vrot.lane.b32.xlu2 %v3239_v62, %s3632_s3 }
 0x8ef   :  { %v802_v63 = vpop.permute.xlu1 %801 }
 0x8f0   :  { %v820_v61 = vpop.permute.xlu2 %819  ;;  %v3981_v46 = vmul.f32 %v802_v63, %v770_v48 }
 0x8f1   :  { %v3983_v45 = vmul.f32 %v820_v61, %v785_v29 }
 0x8f2   :  { %847 = vrot.lane.b32.xlu0 %v3981_v46, %s3633_s29 }
 0x8f3   :  { %850 = vrot.lane.b32.xlu1 %v3983_v45, %s3632_s3 }
 0x964   :  { %v848_v57 = vpop.permute.xlu0 %847 }
 0x965   :  { %v851_v3 = vpop.permute.xlu1 %850 }
 0x966   :  { %v853_v11 = vsel %vm366_vm10, %v848_v57, %v851_v3 }
 0x967   :  { %3106 = vmatmul.msk.f32.vlgmr.msrb.gmra.mxu2 %vm201_vm11, %v853_v11  ;;  %3107 = vmatmul.msk.f32.vlgmr.msra.gmra.mxu3 %vm201_vm11, %v853_v11 }
 0x9ea   :  { %v874_v7 = vpop.f32.mrf.mxu2  ;;  %v894_v9 = vpop.f32.mrf.mxu3 }
 0x9eb   :  { %v909_v12 = vadd.f32 %v903_v8, %v874_v7  ;;  %v910_v13 = vadd.f32 %v907_v10, %v894_v9  ;;  %v1062_v7 = vld [vmem:[#allocation4 + $0x1a] ss:$0 sm:$0xff]  ;;  %v1059_v8 = vld [vmem:[#allocation4 + $0x5] ss:$0 sm:$0xff] }
 0x9ec   :  { %v1065_v10 = vsel %vm251_vm1, %v1060_v5, %v1059_v8 }
 0x9ed   :  { %3240 = vtanh.f32 %v909_v12  ;;  %v3108_v16 = vmul.f32 -1.442695, %v909_v12  ;;  %v3109_v21 = vmul.f32 -1.442695, %v910_v13 }
 0x9ee   :  { %3242 = vtanh.f32 %v910_v13  ;;  %v1069_v13 = vsel %vm251_vm1, %v1062_v7, %v1061_v6 }
 0x9ef   :  { %3244 = vpow2.f32 %v3108_v16 }
 0x9f3   :  { %v3241_v14 = vpop.eup %3240 }
 0x9f4   :  { %v3243_v15 = vpop.eup %3242  ;;  %952 = vrot.lane.b32.xlu2 %v3241_v14, %s3632_s3 }
 0x9f5   :  { %970 = vrot.lane.b32.xlu0 %v3243_v15, %s3632_s3  ;;  %v3245_v17 = vpop.eup %3244 }
 0x9f6   :  { %v917_v18 = vadd.f32 1.0, %v3245_v17 }
 0x9f8   :  { %3246 = vrcp.f32 %v917_v18  ;;  %v930_v28 = vand.u32 2147483648, %v917_v18  ;;  %vm924_vm9 = vweird.f32 %v917_v18  ;;  %v928_v30 = vand.u32 2147483647, %v917_v18 }
 0x9f9   :  { %3248 = vpow2.f32 %v3109_v21 }
 0x9fa   :  { %v931_v32 = vor.u32 1.1754944e-38, %v930_v28  ;;  %vm929_vm13 = vcmp.eq.f32.partialorder %v928_v30, 8.507059e+37 }
 0x9fe   :  { %v3247_v19 = vpop.eup %3246 }
 0x9ff   :  { %v920_v22 = vmul.f32 %v3247_v19, %v917_v18  ;;  %v3249_v25 = vpop.eup %3248  ;;  %vm925_vm8 = vweird.f32 %v3247_v19 }
 0xa00   :  { %v918_v26 = vadd.f32 1.0, %v3249_v25  ;;  %vm926_vm12 = vmor %vm924_vm9, %vm925_vm8 }
 0xa01   :  { %v921_v23 = vsub.f32 1.0, %v920_v22 }
 0xa02   :  { %3250 = vrcp.f32 %v918_v26  ;;  %v945_v44 = vand.u32 2147483648, %v918_v26  ;;  %vm939_vm15 = vweird.f32 %v918_v26  ;;  %v943_v47 = vand.u32 2147483647, %v918_v26 }
 0xa03   :  { %v922_v24 = vmul.f32 %v3247_v19, %v921_v23 }
 0xa04   :  { %v946_v49 = vor.u32 1.1754944e-38, %v945_v44  ;;  %vm944_vm2 = vcmp.eq.f32.partialorder %v943_v47, 8.507059e+37 }
 0xa05   :  { %v923_v27 = vadd.f32 %v3247_v19, %v922_v24 }
 0xa07   :  { %v927_v31 = vsel %vm926_vm12, %v3247_v19, %v923_v27 }
 0xa08   :  { %v932_v35 = vsel %vm929_vm13, %v931_v32, %v927_v31  ;;  %v3251_v39 = vpop.eup %3250 }
 0xa09   :  { %v935_v40 = vmul.f32 %v3251_v39, %v918_v26  ;;  %vm940_vm14 = vweird.f32 %v3251_v39  ;;  %v949_v53 = vmul.f32 %v932_v35, %v3972_v55 }
 0xa0a   :  { %vm941_vm0 = vmor %vm939_vm15, %vm940_vm14 }
 0xa0b   :  { %v936_v41 = vsub.f32 1.0, %v935_v40 }
 0xa0d   :  { %v937_v42 = vmul.f32 %v3251_v39, %v936_v41 }
 0xa0f   :  { %v938_v43 = vadd.f32 %v3251_v39, %v937_v42 }
 0xa11   :  { %v942_v48 = vsel %vm941_vm0, %v3251_v39, %v938_v43 }
 0xa12   :  { %v947_v51 = vsel %vm944_vm2, %v946_v49, %v942_v48 }
 0xa13   :  { %v967_v54 = vmul.f32 %v947_v51, %v3977_v60 }
 0xa4e   :  { %v953_v34 = vpop.permute.xlu2 %952 }
 0xa4f   :  { %v955_v37 = vmul.f32 %v953_v34, %v932_v35 }
 0xa51   :  { %957 = vrot.lane.b32.xlu1 %v955_v37, %s3633_s29 }
 0xa67   :  { %v971_v29 = vpop.permute.xlu0 %970 }
 0xa68   :  { %v973_v52 = vmul.f32 %v971_v29, %v947_v51 }
 0xa6a   :  { %975 = vrot.lane.b32.xlu2 %v973_v52, %s3633_s29 }
 0xac3   :  { %v958_v56 = vpop.permute.xlu1 %957 }
 0xac4   :  { %v976_v58 = vpop.permute.xlu2 %975  ;;  %v4000_v59 = vadd.f32 %v958_v56, %v949_v53 }
 0xac5   :  { %v4002_v62 = vadd.f32 %v976_v58, %v967_v54 }
 0xac6   :  { %3252 = vtanh.f32 %v4000_v59 }
 0xac7   :  { %3254 = vtanh.f32 %v4002_v62 }
 0xacc   :  { %v3253_v63 = vpop.eup %3252 }
 0xacd   :  { %v3255_v61 = vpop.eup %3254  ;;  %963 = vrot.lane.b32.xlu0 %v3253_v63, %s3632_s3 }
 0xace   :  { %981 = vrot.lane.b32.xlu1 %v3255_v61, %s3632_s3 }
 0xb3f   :  { %v964_v57 = vpop.permute.xlu0 %963 }
 0xb40   :  { %v982_v55 = vpop.permute.xlu1 %981  ;;  %v4008_v3 = vmul.f32 %v964_v57, %v932_v35 }
 0xb41   :  { %v4010_v60 = vmul.f32 %v982_v55, %v947_v51 }
 0xb42   :  { %1009 = vrot.lane.b32.xlu2 %v4008_v3, %s3633_s29 }
 0xb43   :  { %1012 = vrot.lane.b32.xlu0 %v4010_v60, %s3632_s3 }
 0xb9c   :  { %v1010_v11 = vpop.permute.xlu2 %1009 }
 0xbb5   :  { %v1013_v1 = vpop.permute.xlu0 %1012 }
 0xbb6   :  { %v1015_v4 = vsel %vm366_vm10, %v1010_v11, %v1013_v1 }
 0xbb7   :  { %3110 = vmatmul.msk.f32.vlgmr.msra.gmra.mxu0 %vm201_vm11, %v1015_v4  ;;  %3111 = vmatmul.msk.f32.vlgmr.msrb.gmra.mxu1 %vm201_vm11, %v1015_v4 }
 0xc34   :  { %v1036_v9 = vpop.f32.mrf.mxu0  ;;  %v1056_v12 = vpop.f32.mrf.mxu1 }
 0xc35   :  { %v1071_v14 = vadd.f32 %v1065_v10, %v1036_v9  ;;  %v1072_v15 = vadd.f32 %v1069_v13, %v1056_v12  ;;  %v1222_v9 = vld [vmem:[#allocation4 + $0x16] ss:$0 sm:$0xff]  ;;  %v1223_v10 = vld [vmem:[#allocation4 + $0x9] ss:$0 sm:$0xff]  ;;  %v1224_v12 = vld [vmem:[#allocation4 + $0x19] ss:$0 sm:$0xff] }
 0xc36   :  { %v1221_v13 = vld [vmem:[#allocation4 + $0x6] ss:$0 sm:$0xff] }
 0xc37   :  { %3256 = vtanh.f32 %v1071_v14  ;;  %v3113_v18 = vmul.f32 -1.442695, %v1072_v15  ;;  %v3112_v23 = vmul.f32 -1.442695, %v1071_v14 }
 0xc38   :  { %3258 = vtanh.f32 %v1072_v15  ;;  %v1227_v15 = vsel %vm251_vm1, %v1222_v9, %v1221_v13 }
 0xc39   :  { %3260 = vpow2.f32 %v3113_v18 }
 0xc3d   :  { %v3257_v16 = vpop.eup %3256 }
 0xc3e   :  { %v3259_v17 = vpop.eup %3258  ;;  %1114 = vrot.lane.b32.xlu1 %v3257_v16, %s3632_s3 }
 0xc3f   :  { %1132 = vrot.lane.b32.xlu2 %v3259_v17, %s3632_s3  ;;  %v3261_v19 = vpop.eup %3260  ;;  %v1231_v17 = vsel %vm251_vm1, %v1224_v12, %v1223_v10 }
 0xc40   :  { %v1080_v21 = vadd.f32 1.0, %v3261_v19 }
 0xc42   :  { %3262 = vrcp.f32 %v1080_v21  ;;  %v1107_v31 = vand.u32 2147483648, %v1080_v21  ;;  %vm1101_vm4 = vweird.f32 %v1080_v21  ;;  %v1105_v32 = vand.u32 2147483647, %v1080_v21 }
 0xc43   :  { %3264 = vpow2.f32 %v3112_v23 }
 0xc44   :  { %v1108_v35 = vor.u32 1.1754944e-38, %v1107_v31  ;;  %vm1106_vm6 = vcmp.eq.f32.partialorder %v1105_v32, 8.507059e+37 }
 0xc48   :  { %v3263_v22 = vpop.eup %3262 }
 0xc49   :  { %v1097_v24 = vmul.f32 %v3263_v22, %v1080_v21  ;;  %v3265_v26 = vpop.eup %3264  ;;  %vm1102_vm3 = vweird.f32 %v3263_v22 }
 0xc4a   :  { %v1079_v28 = vadd.f32 1.0, %v3265_v26  ;;  %vm1103_vm5 = vmor %vm1101_vm4, %vm1102_vm3 }
 0xc4b   :  { %v1098_v25 = vsub.f32 1.0, %v1097_v24 }
 0xc4c   :  { %3266 = vrcp.f32 %v1079_v28  ;;  %v1092_v48 = vand.u32 2147483648, %v1079_v28  ;;  %vm1086_vm8 = vweird.f32 %v1079_v28  ;;  %v1090_v49 = vand.u32 2147483647, %v1079_v28 }
 0xc4d   :  { %v1099_v27 = vmul.f32 %v3263_v22, %v1098_v25 }
 0xc4e   :  { %v1093_v51 = vor.u32 1.1754944e-38, %v1092_v48  ;;  %vm1091_vm12 = vcmp.eq.f32.partialorder %v1090_v49, 8.507059e+37 }
 0xc4f   :  { %v1100_v30 = vadd.f32 %v3263_v22, %v1099_v27 }
 0xc51   :  { %v1104_v34 = vsel %vm1103_vm5, %v3263_v22, %v1100_v30 }
 0xc52   :  { %v1109_v39 = vsel %vm1106_vm6, %v1108_v35, %v1104_v34  ;;  %v3267_v40 = vpop.eup %3266 }
 0xc53   :  { %v1082_v42 = vmul.f32 %v3267_v40, %v1079_v28  ;;  %vm1087_vm7 = vweird.f32 %v3267_v40  ;;  %v1129_v56 = vmul.f32 %v1109_v39, %v4002_v62 }
 0xc54   :  { %vm1088_vm9 = vmor %vm1086_vm8, %vm1087_vm7 }
 0xc55   :  { %v1083_v43 = vsub.f32 1.0, %v1082_v42 }
 0xc57   :  { %v1084_v44 = vmul.f32 %v3267_v40, %v1083_v43 }
 0xc59   :  { %v1085_v47 = vadd.f32 %v3267_v40, %v1084_v44 }
 0xc5b   :  { %v1089_v29 = vsel %vm1088_vm9, %v3267_v40, %v1085_v47 }
 0xc5c   :  { %v1094_v53 = vsel %vm1091_vm12, %v1093_v51, %v1089_v29 }
 0xc5d   :  { %v1111_v57 = vmul.f32 %v1094_v53, %v4000_v59 }
 0xc99   :  { %v1133_v37 = vpop.permute.xlu2 %1132 }
 0xc9a   :  { %v1135_v41 = vmul.f32 %v1133_v37, %v1109_v39 }
 0xc9c   :  { %1137 = vrot.lane.b32.xlu1 %v1135_v41, %s3633_s29 }
 0xcb0   :  { %v1115_v52 = vpop.permute.xlu1 %1114 }
 0xcb1   :  { %v1117_v54 = vmul.f32 %v1115_v52, %v1094_v53 }
 0xcb3   :  { %1119 = vrot.lane.b32.xlu0 %v1117_v54, %s3633_s29 }
 0xd0e   :  { %v1138_v58 = vpop.permute.xlu1 %1137 }
 0xd0f   :  { %v4026_v63 = vadd.f32 %v1138_v58, %v1129_v56 }
 0xd11   :  { %3268 = vtanh.f32 %v4026_v63 }
 0xd17   :  { %v3269_v61 = vpop.eup %3268 }
 0xd18   :  { %1143 = vrot.lane.b32.xlu0 %v3269_v61, %s3632_s3 }
 0xd25   :  { %v1120_v55 = vpop.permute.xlu0 %1119 }
 0xd26   :  { %v4031_v11 = vadd.f32 %v1120_v55, %v1111_v57 }
 0xd28   :  { %3270 = vtanh.f32 %v4031_v11 }
 0xd2e   :  { %v3271_v1 = vpop.eup %3270 }
 0xd2f   :  { %1125 = vrot.lane.b32.xlu2 %v3271_v1, %s3632_s3 }
 0xd89   :  { %v1126_v4 = vpop.permute.xlu2 %1125 }
 0xd8a   :  { %v1144_v62 = vpop.permute.xlu0 %1143  ;;  %v4035_v5 = vmul.f32 %v1126_v4, %v1094_v53 }
 0xd8b   :  { %v4037_v6 = vmul.f32 %v1144_v62, %v1109_v39 }
 0xd8c   :  { %1171 = vrot.lane.b32.xlu1 %v4035_v5, %s3633_s29 }
 0xd8d   :  { %1174 = vrot.lane.b32.xlu2 %v4037_v6, %s3632_s3 }
 0xde7   :  { %v1175_v59 = vpop.permute.xlu2 %1174 }
 0xdfe   :  { %v1172_v7 = vpop.permute.xlu1 %1171 }
 0xdff   :  { %v1177_v8 = vsel %vm366_vm10, %v1172_v7, %v1175_v59 }
 0xe00   :  { %3114 = vmatmul.msk.f32.vlgmr.msra.gmra.mxu2 %vm201_vm11, %v1177_v8  ;;  %3115 = vmatmul.msk.f32.vlgmr.msrb.gmra.mxu3 %vm201_vm11, %v1177_v8 }
 0xe83   :  { %v1198_v14 = vpop.f32.mrf.mxu2  ;;  %v1218_v16 = vpop.f32.mrf.mxu3 }
 0xe84   :  { %v1233_v18 = vadd.f32 %v1227_v15, %v1198_v14  ;;  %v1234_v19 = vadd.f32 %v1231_v17, %v1218_v16  ;;  %v1384_v16 = vld [vmem:[#allocation4 + $0x17] ss:$0 sm:$0xff]  ;;  %v1385_v17 = vld [vmem:[#allocation4 + $0x8] ss:$0 sm:$0xff] }
 0xe86   :  { %3272 = vtanh.f32 %v1233_v18  ;;  %v3116_v23 = vmul.f32 -1.442695, %v1233_v18  ;;  %v3117_v24 = vmul.f32 -1.442695, %v1234_v19  ;;  %v1386_v18 = vld [vmem:[#allocation4 + $0x18] ss:$0 sm:$0xff] }
 0xe87   :  { %3274 = vtanh.f32 %v1234_v19  ;;  %v1383_v19 = vld [vmem:[#allocation4 + $0x7] ss:$0 sm:$0xff] }
 0xe88   :  { %3276 = vpow2.f32 %v3116_v23 }
 0xe89   :  { %3278 = vpow2.f32 %v3117_v24  ;;  %v1393_v24 = vsel %vm251_vm1, %v1386_v18, %v1385_v17 }
 0xe8c   :  { %v3273_v21 = vpop.eup %3272 }
 0xe8d   :  { %v3275_v22 = vpop.eup %3274  ;;  %1276 = vrot.lane.b32.xlu0 %v3273_v21, %s3632_s3 }
 0xe8e   :  { %1294 = vrot.lane.b32.xlu1 %v3275_v22, %s3632_s3  ;;  %v3277_v25 = vpop.eup %3276  ;;  %v1389_v22 = vsel %vm251_vm1, %v1384_v16, %v1383_v19  ;;  %v987_v16 = vperm.slane %v4008_v3, 0  ;;  %v336_v19 = vperm.slane %v3852_v36, 0 }
 0xe8f   :  { %v3279_v26 = vpop.eup %3278  ;;  %v1241_v27 = vadd.f32 1.0, %v3277_v25 }
 0xe90   :  { %v1242_v28 = vadd.f32 1.0, %v3279_v26 }
 0xe91   :  { %3280 = vrcp.f32 %v1241_v27  ;;  %v1254_v43 = vand.u32 2147483648, %v1241_v27  ;;  %vm1248_vm15 = vweird.f32 %v1241_v27  ;;  %v1252_v47 = vand.u32 2147483647, %v1241_v27 }
 0xe92   :  { %3282 = vrcp.f32 %v1242_v28  ;;  %v1269_v44 = vand.u32 2147483648, %v1242_v28  ;;  %vm1263_vm0 = vweird.f32 %v1242_v28  ;;  %v1267_v48 = vand.u32 2147483647, %v1242_v28 }
 0xe93   :  { %v1255_v51 = vor.u32 1.1754944e-38, %v1254_v43  ;;  %vm1253_vm4 = vcmp.eq.f32.partialorder %v1252_v47, 8.507059e+37 }
 0xe94   :  { %v1270_v52 = vor.u32 1.1754944e-38, %v1269_v44  ;;  %vm1268_vm5 = vcmp.eq.f32.partialorder %v1267_v48, 8.507059e+37 }
 0xe97   :  { %v3281_v30 = vpop.eup %3280 }
 0xe98   :  { %v3283_v31 = vpop.eup %3282  ;;  %v1244_v32 = vmul.f32 %v3281_v30, %v1241_v27  ;;  %vm1249_vm13 = vweird.f32 %v3281_v30 }
 0xe99   :  { %v1259_v34 = vmul.f32 %v3283_v31, %v1242_v28  ;;  %vm1264_vm14 = vweird.f32 %v3283_v31  ;;  %vm1250_vm2 = vmor %vm1248_vm15, %vm1249_vm13 }
 0xe9a   :  { %v1245_v35 = vsub.f32 1.0, %v1244_v32  ;;  %vm1265_vm3 = vmor %vm1263_vm0, %vm1264_vm14  ;;  %v837_v32 = vperm.slane %v3983_v45, 0  ;;  %vm357_vm0 = vcmask 516352  }
 0xe9b   :  { %v1260_v37 = vsub.f32 1.0, %v1259_v34  ;;  %v1149_v34 = vperm.slane %v4035_v5, 0 }
 0xe9c   :  { %v1246_v39 = vmul.f32 %v3281_v30, %v1245_v35 }
 0xe9d   :  { %v1261_v40 = vmul.f32 %v3283_v31, %v1260_v37 }
 0xe9e   :  { %v1247_v41 = vadd.f32 %v3281_v30, %v1246_v39 }
 0xe9f   :  { %v1262_v42 = vadd.f32 %v3283_v31, %v1261_v40 }
 0xea0   :  { %v1251_v49 = vsel %vm1250_vm2, %v3281_v30, %v1247_v41  ;;  %v349_v30 = vperm.slane %v3856_v38, 0  ;;  %vm344_vm2 = vcmask 253952  }
 0xea1   :  { %v1266_v29 = vsel %vm1265_vm3, %v3283_v31, %v1262_v42  ;;  %v1256_v54 = vsel %vm1253_vm4, %v1255_v51, %v1251_v49  ;;  %v663_v31 = vperm.slane %v3938_v0, 0 }
 0xea2   :  { %v1271_v58 = vsel %vm1268_vm5, %v1270_v52, %v1266_v29  ;;  %v1273_v55 = vmul.f32 %v1256_v54, %v4031_v11 }
 0xea3   :  { %v1291_v59 = vmul.f32 %v1271_v58, %v4026_v63 }
 0xeff   :  { %v1277_v53 = vpop.permute.xlu0 %1276 }
 0xf00   :  { %v1295_v56 = vpop.permute.xlu1 %1294  ;;  %v1279_v61 = vmul.f32 %v1277_v53, %v1256_v54 }
 0xf01   :  { %v1297_v57 = vmul.f32 %v1295_v56, %v1271_v58 }
 0xf02   :  { %1281 = vrot.lane.b32.xlu2 %v1279_v61, %s3633_s29 }
 0xf03   :  { %1299 = vrot.lane.b32.xlu0 %v1297_v57, %s3633_s29 }
 0xf5c   :  { %v1282_v1 = vpop.permute.xlu2 %1281 }
 0xf5d   :  { %v4053_v4 = vadd.f32 %v1282_v1, %v1273_v55  ;;  %v501_v55 = vperm.slane %v3895_v50, 0 }
 0xf5f   :  { %3284 = vtanh.f32 %v4053_v4 }
 0xf65   :  { %v3285_v62 = vpop.eup %3284 }
 0xf66   :  { %1287 = vrot.lane.b32.xlu1 %v3285_v62, %s3632_s3 }
 0xf75   :  { %v1300_v7 = vpop.permute.xlu0 %1299 }
 0xf76   :  { %v4058_v8 = vadd.f32 %v1300_v7, %v1291_v59  ;;  %v675_v59 = vperm.slane %v3940_v2, 0 }
 0xf78   :  { %3286 = vtanh.f32 %v4058_v8 }
 0xf7e   :  { %v3287_v9 = vpop.eup %3286 }
 0xf7f   :  { %1305 = vrot.lane.b32.xlu2 %v3287_v9, %s3632_s3 }
 0xfd8   :  { %v1288_v10 = vpop.permute.xlu1 %1287 }
 0xfd9   :  { %v1306_v11 = vpop.permute.xlu2 %1305  ;;  %v4062_v12 = vmul.f32 %v1288_v10, %v1256_v54 }
 0xfda   :  { %v4064_v13 = vmul.f32 %v1306_v11, %v1271_v58 }
 0xfdb   :  { %1333 = vrot.lane.b32.xlu0 %v4062_v12, %s3633_s29 }
 0xfdc   :  { %1336 = vrot.lane.b32.xlu1 %v4064_v13, %s3632_s3 }
0x104d   :  { %v1334_v63 = vpop.permute.xlu0 %1333 }
0x104e   :  { %v1337_v14 = vpop.permute.xlu1 %1336 }
0x104f   :  { %v1339_v15 = vsel %vm366_vm10, %v1334_v63, %v1337_v14 }
0x1050   :  { %3118 = vmatmul.msk.f32.vlgmr.msrb.gmra.mxu0 %vm201_vm11, %v1339_v15  ;;  %3119 = vmatmul.msk.f32.vlgmr.msra.gmra.mxu1 %vm201_vm11, %v1339_v15 }
0x10cd   :  { %v1360_v21 = vpop.f32.mrf.mxu0  ;;  %v1380_v23 = vpop.f32.mrf.mxu1 }
0x10ce   :  { %v1395_v25 = vadd.f32 %v1389_v22, %v1360_v21  ;;  %v1396_v26 = vadd.f32 %v1393_v24, %v1380_v23  ;;  %v513_v22 = vperm.slane %v3897_v33, 0  ;;  %v825_v24 = vperm.slane %v3981_v46, 0 }
0x10d0   :  { %3288 = vtanh.f32 %v1395_v25  ;;  %v3120_v35 = vmul.f32 -1.442695, %v1395_v25  ;;  %v3121_v41 = vmul.f32 -1.442695, %v1396_v26  ;;  %v999_v25 = vperm.slane %v4010_v60, 0 }
0x10d1   :  { %3290 = vtanh.f32 %v1396_v26  ;;  %v1311_v26 = vperm.slane %v4062_v12, 0 }
0x10d2   :  { %3292 = vpow2.f32 %v3120_v35  ;;  %v1160_v35 = vrot.slane %v4037_v6, 1 }
0x10d6   :  { %v3289_v27 = vpop.eup %3288 }
0x10d7   :  { %v3291_v28 = vpop.eup %3290  ;;  %1438 = vrot.lane.b32.xlu2 %v3289_v27, %s3632_s3  ;;  %v500_v27 = vrot.slane %v3895_v50, 1 }
0x10d8   :  { %1456 = vrot.lane.b32.xlu0 %v3291_v28, %s3632_s3  ;;  %v3293_v37 = vpop.eup %3292 }
0x10d9   :  { %v1403_v39 = vadd.f32 1.0, %v3293_v37  ;;  %v502_v28 = vperm.slane %v500_v27, 0  ;;  %v1162_v37 = vperm.slane %v1160_v35, 0 }
0x10db   :  { %3294 = vrcp.f32 %v1403_v39  ;;  %v1416_v29 = vand.u32 2147483648, %v1403_v39  ;;  %vm1410_vm7 = vweird.f32 %v1403_v39  ;;  %v1414_v51 = vand.u32 2147483647, %v1403_v39 }
0x10dc   :  { %3296 = vpow2.f32 %v3121_v41 }
0x10dd   :  { %v1417_v53 = vor.u32 1.1754944e-38, %v1416_v29  ;;  %vm1415_vm9 = vcmp.eq.f32.partialorder %v1414_v51, 8.507059e+37  ;;  %v335_v51 = vrot.slane %v3852_v36, 1 }
0x10e0   :  { %351 = vrot.lane.b32.xlu0 %v349_v30, %s3632_s3  ;;  %v674_v30 = vrot.slane %v3940_v2, 1 }
0x10e1   :  { %v3295_v40 = vpop.eup %3294 }
0x10e2   :  { %v1406_v42 = vmul.f32 %v3295_v40, %v1403_v39  ;;  %v3297_v47 = vpop.eup %3296  ;;  %vm1411_vm6 = vweird.f32 %v3295_v40 }
0x10e3   :  { %v1404_v48 = vadd.f32 1.0, %v3297_v47  ;;  %vm1412_vm8 = vmor %vm1410_vm7, %vm1411_vm6 }
0x10e4   :  { %v1407_v43 = vsub.f32 1.0, %v1406_v42 }
0x10e5   :  { %3298 = vrcp.f32 %v1404_v48  ;;  %v1431_v9 = vand.u32 2147483648, %v1404_v48  ;;  %vm1425_vm13 = vweird.f32 %v1404_v48  ;;  %v1429_v10 = vand.u32 2147483647, %v1404_v48 }
0x10e6   :  { %v1408_v44 = vmul.f32 %v3295_v40, %v1407_v43 }
0x10e7   :  { %v1432_v63 = vor.u32 1.1754944e-38, %v1431_v9  ;;  %vm1430_vm15 = vcmp.eq.f32.partialorder %v1429_v10, 8.507059e+37 }
0x10e8   :  { %665 = vrot.lane.b32.xlu0 %v663_v31, %s3633_s29  ;;  %v1409_v49 = vadd.f32 %v3295_v40, %v1408_v44  ;;  %v676_v31 = vperm.slane %v674_v30, 0 }
0x10ea   :  { %v1413_v52 = vsel %vm1412_vm8, %v3295_v40, %v1409_v49  ;;  %v1161_v49 = vperm.slane %v4037_v6, 0  ;;  %v512_v6 = vrot.slane %v3897_v33, 1  ;;  %v998_v33 = vrot.slane %v4010_v60, 1 }
0x10eb   :  { %v4085_v56 = vsel %vm1415_vm9, %v1417_v53, %v1413_v52  ;;  %v3299_v61 = vpop.eup %3298  ;;  %v348_v52 = vrot.slane %v3856_v38, 1  ;;  %v824_v38 = vrot.slane %v3981_v46, 1  ;;  %v1310_v46 = vrot.slane %v4062_v12, 1 }
0x10ec   :  { %v1421_v57 = vmul.f32 %v3299_v61, %v1404_v48  ;;  %vm1426_vm12 = vweird.f32 %v3299_v61  ;;  %v1435_v50 = vmul.f32 %v4085_v56, %v4053_v4  ;;  %v1000_v10 = vperm.slane %v998_v33, 0  ;;  %v4224_v33 = vld [vmem:[#allocation13 + $0x10] sm:$0xff] }
0x10ed   :  { %vm1427_vm14 = vmor %vm1425_vm13, %vm1426_vm12  ;;  %v1322_v12 = vrot.slane %v4064_v13, 1 }
0x10ee   :  { %v1422_v1 = vsub.f32 1.0, %v1421_v57  ;;  %v662_v57 = vrot.slane %v3938_v0, 1  ;;  %v1148_v0 = vrot.slane %v4035_v5, 1 }
0x10f0   :  { %839 = vrot.lane.b32.xlu0 %v837_v32, %s3632_s3  ;;  %v1423_v62 = vmul.f32 %v3299_v61, %v1422_v1  ;;  %v986_v32 = vrot.slane %v4008_v3, 1  ;;  %v664_v1 = vperm.slane %v662_v57, 0  ;;  %v4190_v57 = vld [vmem:[#allocation13 + $0x68] sm:$0xff] }
0x10f2   :  { %v1424_v7 = vadd.f32 %v3299_v61, %v1423_v62  ;;  %v836_v62 = vrot.slane %v3983_v45, 1  ;;  %v1312_v45 = vperm.slane %v1310_v46, 0 }
0x10f4   :  { %v1428_v11 = vsel %vm1427_vm14, %v3299_v61, %v1424_v7  ;;  %v350_v61 = vperm.slane %v348_v52, 0  ;;  %v838_v9 = vperm.slane %v836_v62, 0  ;;  %v1498_v52 = vld [vmem:[#allocation11 + $0x8] sm:$0xff]  ;;  %v4208_v62 = vld [vmem:[#allocation13 + $0x30] sm:$0xff] }
0x10f5   :  { %v4093_v15 = vsel %vm1430_vm15, %v1432_v63, %v1428_v11  ;;  %v1150_v63 = vperm.slane %v1148_v0, 0  ;;  %v4226_v0 = vld [vmem:[#allocation13 + $0x18] sm:$0xff] }
0x10f6   :  { %v1453_v39 = vmul.f32 %v4093_v15, %v4058_v8  ;;  %v1323_v8 = vperm.slane %v4064_v13, 0 }
0x10f8   :  { %1151 = vrot.lane.b32.xlu0 %v1149_v34, %s3633_s29  ;;  %v988_v34 = vperm.slane %v986_v32, 0 }
0x1131   :  { %v1439_v54 = vpop.permute.xlu2 %1438 }
0x1132   :  { %v1441_v58 = vmul.f32 %v1439_v54, %v4085_v56  ;;  %v337_v54 = vperm.slane %v335_v51, 0  ;;  %v1497_v51 = vld [vmem:[#allocation11] sm:$0xff] }
0x1134   :  { %1443 = vrot.lane.b32.xlu1 %v1441_v58, %s3633_s29 }
0x113c   :  { %503 = vrot.lane.b32.xlu1 %v501_v55, %s3633_s29  ;;  %v514_v55 = vperm.slane %v512_v6, 0  ;;  %v4185_v6 = vld [vmem:[#allocation13 + $0x60] sm:$0xff] }
0x1144   :  { %677 = vrot.lane.b32.xlu1 %v675_v59, %s3632_s3  ;;  %v826_v59 = vperm.slane %v824_v38, 0  ;;  %v4202_v38 = vld [vmem:[#allocation13 + $0x48] sm:$0xff] }
0x114a   :  { %v1457_v14 = vpop.permute.xlu0 %1456 }
0x114b   :  { %v1459_v17 = vmul.f32 %v1457_v14, %v4093_v15 }
0x114c   :  { %989 = vrot.lane.b32.xlu1 %v987_v16, %s3633_s29 }
0x114d   :  { %1461 = vrot.lane.b32.xlu2 %v1459_v17, %s3633_s29 }
0x1152   :  { %v352_v18 = vpop.permute.xlu0 %351 }
0x1153   :  { %358 = vst.msk [vmem:[#allocation2 + $0x7] sm:$0x1] %vm357_vm0, %v352_v18 }
0x1155   :  { %338 = vrot.lane.b32.xlu2 %v336_v19, %s3633_s29 }
0x115a   :  { %v666_v21 = vpop.permute.xlu0 %665 }
0x115b   :  { %671 = vst.msk [vmem:[#allocation2 + $0x2] sm:$0x1] %vm344_vm2, %v666_v21 }
0x115d   :  { %515 = vrot.lane.b32.xlu2 %v513_v22, %s3632_s3 }
0x1162   :  { %v840_v23 = vpop.permute.xlu0 %839 }
0x1163   :  { %845 = vst.msk [vmem:[#allocation2 + $0x4] sm:$0x1] %vm357_vm0, %v840_v23 }
0x1165   :  { %827 = vrot.lane.b32.xlu2 %v825_v24, %s3633_s29 }
0x116a   :  { %v1152_v29 = vpop.permute.xlu0 %1151 }
0x116d   :  { %1001 = vrot.lane.b32.xlu2 %v999_v25, %s3632_s3 }
0x1175   :  { %1313 = vrot.lane.b32.xlu2 %v1311_v26, %s3633_s29 }
0x117d   :  { %505 = vrot.lane.b32.xlu2 %v502_v28, %s3633_s29 }
0x1185   :  { %679 = vrot.lane.b32.xlu2 %v676_v31, %s3632_s3 }
0x118d   :  { %991 = vrot.lane.b32.xlu2 %v988_v34, %s3633_s29 }
0x1195   :  { %1165 = vrot.lane.b32.xlu2 %v1162_v37, %s3632_s3 }
0x11a6   :  { %v1444_v2 = vpop.permute.xlu1 %1443 }
0x11a7   :  { %v1462_v40 = vpop.permute.xlu2 %1461  ;;  %v1446_v41 = vadd.f32 %v1444_v2, %v1435_v50  ;;  %v1512_v2 = vld [vmem:[#allocation11 + $0x78] sm:$0xff] }
0x11a8   :  { %v1464_v42 = vadd.f32 %v1462_v40, %v1453_v39  ;;  %v1511_v39 = vld [vmem:[#allocation11 + $0x70] sm:$0xff]  ;;  %v1509_v40 = vld [vmem:[#allocation11 + $0x60] sm:$0xff]  ;;  %1556 = vmatpush.msra.mxu3 %v1512_v2 }
0x11a9   :  { %3300 = vtanh.f32 %v1446_v41  ;;  %1533 = vmatpush.msrb.mxu2 %v1511_v39  ;;  %v1510_v41 = vld [vmem:[#allocation11 + $0x68] sm:$0xff] }
0x11aa   :  { %3302 = vtanh.f32 %v1464_v42  ;;  %v1507_v42 = vld [vmem:[#allocation11 + $0x50] sm:$0xff]  ;;  %1557 = vmatpush.msra.mxu3 %v1510_v41 }
0x11ab   :  { %1534 = vmatpush.msrb.mxu2 %v1509_v40 }
0x11ad   :  { %1535 = vmatpush.msrb.mxu2 %v1507_v42 }
0x11ae   :  { %v504_v3 = vpop.permute.xlu1 %503 }
0x11af   :  { %v3301_v43 = vpop.eup %3300  ;;  %v339_v44 = vpop.permute.xlu2 %338  ;;  %509 = vst.msk [vmem:[#allocation2 + $0x1] sm:$0x1] %vm344_vm2, %v504_v3  ;;  %v1508_v3 = vld [vmem:[#allocation11 + $0x58] sm:$0xff] }
0x11b0   :  { %v3303_v47 = vpop.eup %3302  ;;  %345 = vst.msk [vmem:[#allocation2] sm:$0x1] %vm344_vm2, %v339_v44  ;;  %1449 = vrot.lane.b32.xlu0 %v3301_v43, %s3632_s3  ;;  %v1505_v43 = vld [vmem:[#allocation11 + $0x40] sm:$0xff]  ;;  %v1506_v44 = vld [vmem:[#allocation11 + $0x48] sm:$0xff]  ;;  %1558 = vmatpush.msra.mxu3 %v1508_v3 }
0x11b1   :  { %1467 = vrot.lane.b32.xlu1 %v3303_v47, %s3632_s3  ;;  %1536 = vmatpush.msrb.mxu2 %v1505_v43  ;;  %v1503_v47 = vld [vmem:[#allocation11 + $0x30] sm:$0xff] }
0x11b2   :  { %1559 = vmatpush.msra.mxu3 %v1506_v44 }
0x11b3   :  { %1537 = vmatpush.msrb.mxu2 %v1503_v47 }
0x11b6   :  { %v678_v4 = vpop.permute.xlu1 %677 }
0x11b7   :  { %v516_v48 = vpop.permute.xlu2 %515  ;;  %683 = vst.msk [vmem:[#allocation2 + $0x5] sm:$0x1] %vm357_vm0, %v678_v4  ;;  %v1504_v4 = vld [vmem:[#allocation11 + $0x38] sm:$0xff] }
0x11b8   :  { %521 = vst.msk [vmem:[#allocation2 + $0x6] sm:$0x1] %vm357_vm0, %v516_v48  ;;  %1325 = vrot.lane.b32.xlu0 %v1323_v8, %s3632_s3  ;;  %1560 = vmatpush.msra.mxu3 %v1504_v4  ;;  %v1501_v8 = vld [vmem:[#allocation11 + $0x20] sm:$0xff]  ;;  %v1502_v48 = vld [vmem:[#allocation11 + $0x28] sm:$0xff] }
0x11b9   :  { %1157 = vst.msk [vmem:[#allocation2 + $0x5] sm:$0x1] %vm344_vm2, %v1152_v29  ;;  %1163 = vrot.lane.b32.xlu1 %v1161_v49, %s3632_s3  ;;  %v1499_v49 = vld [vmem:[#allocation11 + $0x10] sm:$0xff]  ;;  %1538 = vmatpush.msrb.mxu2 %v1501_v8  ;;  %v1500_v29 = vld [vmem:[#allocation11 + $0x18] sm:$0xff] }
0x11ba   :  { %1561 = vmatpush.msra.mxu3 %v1502_v48 }
0x11bb   :  { %1539 = vmatpush.msrb.mxu2 %v1499_v49 }
0x11bc   :  { %1562 = vmatpush.msra.mxu3 %v1500_v29 }
0x11bd   :  { %1540 = vmatpush.msrb.mxu2 %v1497_v51 }
0x11be   :  { %v990_v53 = vpop.permute.xlu1 %989  ;;  %1563 = vmatpush.msra.mxu3 %v1498_v52 }
0x11bf   :  { %v828_v58 = vpop.permute.xlu2 %827  ;;  %995 = vst.msk [vmem:[#allocation2 + $0x4] sm:$0x1] %vm344_vm2, %v990_v53 }
0x11c0   :  { %833 = vst.msk [vmem:[#allocation2 + $0x3] sm:$0x1] %vm344_vm2, %v828_v58  ;;  %340 = vrot.lane.b32.xlu0 %v337_v54, %s3633_s29  ;;  %v4181_v58 = vld [vmem:[#allocation13 + $0x70] sm:$0xff] }
0x11c1   :  { %353 = vrot.lane.b32.xlu1 %v350_v61, %s3632_s3  ;;  %v4183_v61 = vld [vmem:[#allocation13 + $0x78] sm:$0xff]  ;;  %1599 = vmatpush.msra.mxu0 %v4181_v58 }
0x11c2   :  { %1619 = vmatpush.msrb.mxu1 %v4183_v61  ;;  %1761 = vmatpush.msra.mxu2 %v4181_v58 }
0x11c3   :  { %1781 = vmatpush.msrb.mxu3 %v4183_v61  ;;  %1600 = vmatpush.msra.mxu0 %v4185_v6 }
0x11c4   :  { %1620 = vmatpush.msrb.mxu1 %v4190_v57  ;;  %1762 = vmatpush.msra.mxu2 %v4185_v6 }
0x11c5   :  { %1782 = vmatpush.msrb.mxu3 %v4190_v57 }
0x11c7   :  { %v1002_v36 = vpop.permute.xlu2 %1001 }
0x11c8   :  { %1007 = vst.msk [vmem:[#allocation2 + $0x3] sm:$0x1] %vm357_vm0, %v1002_v36  ;;  %517 = vrot.lane.b32.xlu0 %v514_v55, %s3632_s3  ;;  %v4192_v55 = vld [vmem:[#allocation13 + $0x50] sm:$0xff]  ;;  %v4194_v36 = vld [vmem:[#allocation13 + $0x58] sm:$0xff] }
0x11c9   :  { %667 = vrot.lane.b32.xlu1 %v664_v1, %s3633_s29  ;;  %v4200_v1 = vld [vmem:[#allocation13 + $0x40] sm:$0xff]  ;;  %1601 = vmatpush.msra.mxu0 %v4192_v55 }
0x11ca   :  { %1621 = vmatpush.msrb.mxu1 %v4194_v36  ;;  %1763 = vmatpush.msra.mxu2 %v4192_v55 }
0x11cb   :  { %1783 = vmatpush.msrb.mxu3 %v4194_v36  ;;  %1602 = vmatpush.msra.mxu0 %v4200_v1 }
0x11cc   :  { %1622 = vmatpush.msrb.mxu1 %v4202_v38  ;;  %1764 = vmatpush.msra.mxu2 %v4200_v1 }
0x11cd   :  { %1784 = vmatpush.msrb.mxu3 %v4202_v38  ;;  %1603 = vmatpush.msra.mxu0 %v4208_v62 }
0x11ce   :  { %1765 = vmatpush.msra.mxu2 %v4208_v62 }
0x11cf   :  { %v1314_v7 = vpop.permute.xlu2 %1313 }
0x11d0   :  { %1319 = vst.msk [vmem:[#allocation2 + $0x6] sm:$0x1] %vm344_vm2, %v1314_v7  ;;  %829 = vrot.lane.b32.xlu0 %v826_v59, %s3633_s29  ;;  %v4210_v59 = vld [vmem:[#allocation13 + $0x38] sm:$0xff]  ;;  %v4216_v7 = vld [vmem:[#allocation13 + $0x20] sm:$0xff] }
0x11d1   :  { %841 = vrot.lane.b32.xlu1 %v838_v9, %s3632_s3  ;;  %v4218_v9 = vld [vmem:[#allocation13 + $0x28] sm:$0xff]  ;;  %1623 = vmatpush.msrb.mxu1 %v4210_v59 }
0x11d2   :  { %1785 = vmatpush.msrb.mxu3 %v4210_v59  ;;  %1604 = vmatpush.msra.mxu0 %v4216_v7 }
0x11d3   :  { %1624 = vmatpush.msrb.mxu1 %v4218_v9  ;;  %1766 = vmatpush.msra.mxu2 %v4216_v7 }
0x11d4   :  { %1786 = vmatpush.msrb.mxu3 %v4218_v9  ;;  %1605 = vmatpush.msra.mxu0 %v4224_v33 }
0x11d5   :  { %1625 = vmatpush.msrb.mxu1 %v4226_v0  ;;  %1767 = vmatpush.msra.mxu2 %v4224_v33 }
0x11d6   :  { %1787 = vmatpush.msrb.mxu3 %v4226_v0 }
0x11d7   :  { %v506_v11 = vpop.permute.xlu2 %505 }
0x11d8   :  { %510 = vst.msk [vmem:[#allocation2 + $0x9] sm:$0x1] %vm344_vm2, %v506_v11  ;;  %1003 = vrot.lane.b32.xlu0 %v1000_v10, %s3632_s3  ;;  %v4232_v10 = vld [vmem:[#allocation13] sm:$0xff]  ;;  %v4234_v11 = vld [vmem:[#allocation13 + $0x8] sm:$0xff] }
0x11d9   :  { %1153 = vrot.lane.b32.xlu1 %v1150_v63, %s3633_s29  ;;  %1606 = vmatpush.msra.mxu0 %v4232_v10 }
0x11da   :  { %1626 = vmatpush.msrb.mxu1 %v4234_v11  ;;  %1607 = vmatmul.f32.vlgmr.msra.gmra.mxu0 %v3631_v20 }
0x11db   :  { %1627 = vmatmul.f32.vlgmr.msrb.gmra.mxu1 %v3631_v20  ;;  %1768 = vmatpush.msra.mxu2 %v4232_v10 }
0x11dc   :  { %1788 = vmatpush.msrb.mxu3 %v4234_v11  ;;  %1923 = vmatpush.msrb.mxu0 %v4181_v58 }
0x11dd   :  { %1943 = vmatpush.msra.mxu1 %v4183_v61 }
0x11de   :  { %1924 = vmatpush.msrb.mxu0 %v4185_v6 }
0x11df   :  { %v680_v14 = vpop.permute.xlu2 %679  ;;  %1944 = vmatpush.msra.mxu1 %v4190_v57 }
0x11e0   :  { %684 = vst.msk [vmem:[#allocation2 + $0xd] sm:$0x1] %vm357_vm0, %v680_v14  ;;  %1315 = vrot.lane.b32.xlu0 %v1312_v45, %s3633_s29  ;;  %1925 = vmatpush.msrb.mxu0 %v4192_v55 }
0x11e1   :  { %1945 = vmatpush.msra.mxu1 %v4194_v36 }
0x11e2   :  { %1926 = vmatpush.msrb.mxu0 %v4200_v1 }
0x11e3   :  { %1946 = vmatpush.msra.mxu1 %v4202_v38 }
0x11e4   :  { %1927 = vmatpush.msrb.mxu0 %v4208_v62 }
0x11e5   :  { %1947 = vmatpush.msra.mxu1 %v4210_v59 }
0x11e6   :  { %1928 = vmatpush.msrb.mxu0 %v4216_v7 }
0x11e7   :  { %v992_v26 = vpop.permute.xlu2 %991  ;;  %1948 = vmatpush.msra.mxu1 %v4218_v9 }
0x11e8   :  { %1929 = vmatpush.msrb.mxu0 %v4224_v33 }
0x11e9   :  { %1949 = vmatpush.msra.mxu1 %v4226_v0 }
0x11ea   :  { %1930 = vmatpush.msrb.mxu0 %v4232_v10 }
0x11eb   :  { %1950 = vmatpush.msra.mxu1 %v4234_v11 }
0x11ec   :  { %2247 = vmatpush.msra.mxu0 %v4181_v58 }
0x11ed   :  { %2267 = vmatpush.msrb.mxu1 %v4183_v61 }
0x11ee   :  { %2248 = vmatpush.msra.mxu0 %v4185_v6 }
0x11ef   :  { %v1166_v31 = vpop.permute.xlu2 %1165  ;;  %2268 = vmatpush.msrb.mxu1 %v4190_v57 }
0x11f0   :  { %2249 = vmatpush.msra.mxu0 %v4192_v55 }
0x11f1   :  { %2269 = vmatpush.msrb.mxu1 %v4194_v36 }
0x11f2   :  { %2250 = vmatpush.msra.mxu0 %v4200_v1 }
0x11f3   :  { %2270 = vmatpush.msrb.mxu1 %v4202_v38 }
0x11f4   :  { %2251 = vmatpush.msra.mxu0 %v4208_v62 }
0x11f5   :  { %2271 = vmatpush.msrb.mxu1 %v4210_v59 }
0x11f6   :  { %2252 = vmatpush.msra.mxu0 %v4216_v7 }
0x11f7   :  { %2272 = vmatpush.msrb.mxu1 %v4218_v9 }
0x11f8   :  { %2253 = vmatpush.msra.mxu0 %v4224_v33 }
0x11f9   :  { %2273 = vmatpush.msrb.mxu1 %v4226_v0 }
0x11fa   :  { %2254 = vmatpush.msra.mxu0 %v4232_v10 }
0x11fb   :  { %2274 = vmatpush.msrb.mxu1 %v4234_v11 }
0x1222   :  { %v1450_v60 = vpop.permute.xlu0 %1449 }
0x1223   :  { %v1468_v16 = vpop.permute.xlu1 %1467  ;;  %v1452_v5 = vmul.f32 %v1450_v60, %v4085_v56  ;;  %v1324_v56 = vperm.slane %v1322_v12, 0  ;;  %v1513_v60 = vld [vmem:[%s4731_s6] sm:$0x3] }
0x1224   :  { %v1470_v17 = vmul.f32 %v1468_v16, %v4093_v15  ;;  %v1515_v16 = vperm.slane %v1513_v60, 0 }
0x1225   :  { %v1473_v18 = vperm.slane %v1452_v5, 0  ;;  %v1472_v23 = vrot.slane %v1452_v5, 1  ;;  %v1516_v5 = vperm.slane %v1513_v60, 1 }
0x1226   :  { %v1484_v19 = vrot.slane %v1470_v17, 1  ;;  %v1485_v21 = vperm.slane %v1470_v17, 0 }
0x1227   :  { %1475 = vrot.lane.b32.xlu1 %v1473_v18, %s3633_s29  ;;  %v1474_v15 = vperm.slane %v1472_v23, 0 }
0x1228   :  { %v1486_v22 = vperm.slane %v1484_v19, 0  ;;  %1487 = vrot.lane.b32.xlu2 %v1485_v21, %s3632_s3 }
0x122a   :  { %1489 = vrot.lane.b32.xlu0 %v1486_v22, %s3632_s3  ;;  %v1326_v24 = vpop.permute.xlu0 %1325 }
0x122b   :  { %v1164_v25 = vpop.permute.xlu1 %1163  ;;  %1331 = vst.msk [vmem:[#allocation2 + $0x1] sm:$0x1] %vm357_vm0, %v1326_v24 }
0x122c   :  { %1169 = vst.msk [vmem:[#allocation2 + $0x2] sm:$0x1] %vm357_vm0, %v1164_v25 }
0x122f   :  { %1327 = vrot.lane.b32.xlu1 %v1324_v56, %s3632_s3 }
0x1230   :  { %1477 = vrot.lane.b32.xlu2 %v1474_v15, %s3633_s29 }
0x1232   :  { %v341_v27 = vpop.permute.xlu0 %340 }
0x1233   :  { %346 = vst.msk [vmem:[#allocation2 + $0x8] sm:$0x1] %vm344_vm2, %v341_v27  ;;  %v354_v13 = vpop.permute.xlu1 %353 }
0x1234   :  { %359 = vst.msk [vmem:[#allocation2 + $0xf] sm:$0x1] %vm357_vm0, %v354_v13 }
0x123a   :  { %v518_v28 = vpop.permute.xlu0 %517 }
0x123b   :  { %522 = vst.msk [vmem:[#allocation2 + $0xe] sm:$0x1] %vm357_vm0, %v518_v28  ;;  %v668_v30 = vpop.permute.xlu1 %667 }
0x123c   :  { %672 = vst.msk [vmem:[#allocation2 + $0xa] sm:$0x1] %vm344_vm2, %v668_v30 }
0x123d   :  { %1170 = vst.msk [vmem:[#allocation2 + $0xa] sm:$0x1] %vm357_vm0, %v1166_v31 }
0x1242   :  { %v830_v32 = vpop.permute.xlu0 %829 }
0x1243   :  { %834 = vst.msk [vmem:[#allocation2 + $0xb] sm:$0x1] %vm344_vm2, %v830_v32  ;;  %v842_v34 = vpop.permute.xlu1 %841 }
0x1244   :  { %846 = vst.msk [vmem:[#allocation2 + $0xc] sm:$0x1] %vm357_vm0, %v842_v34 }
0x1245   :  { %996 = vst.msk [vmem:[#allocation2 + $0xc] sm:$0x1] %vm344_vm2, %v992_v26 }
0x124a   :  { %v1004_v35 = vpop.permute.xlu0 %1003 }
0x124b   :  { %1008 = vst.msk [vmem:[#allocation2 + $0xb] sm:$0x1] %vm357_vm0, %v1004_v35  ;;  %v1154_v37 = vpop.permute.xlu1 %1153 }
0x124c   :  { %1158 = vst.msk [vmem:[#allocation2 + $0xd] sm:$0x1] %vm344_vm2, %v1154_v37 }
0x1252   :  { %v1316_v50 = vpop.permute.xlu0 %1315 }
0x1253   :  { %1320 = vst.msk [vmem:[#allocation2 + $0xe] sm:$0x1] %vm344_vm2, %v1316_v50 }
0x1257   :  { %v1608_v25 = vpop.f32.mrf.mxu0 }
0x1258   :  { %v1628_v26 = vpop.f32.mrf.mxu1 }
0x1282   :  { %v1488_v53 = vpop.permute.xlu2 %1487 }
0x1283   :  { %1493 = vst.msk [vmem:[#allocation2] sm:$0x1] %vm357_vm0, %v1488_v53 }
0x128a   :  { %v1478_v54 = vpop.permute.xlu2 %1477 }
0x128b   :  { %1482 = vst.msk [vmem:[#allocation2 + $0xf] sm:$0x1] %vm344_vm2, %v1478_v54 }
0x1299   :  { %v1476_v63 = vpop.permute.xlu1 %1475 }
0x129a   :  { %1481 = vst.msk [vmem:[#allocation2 + $0x7] sm:$0x1] %vm344_vm2, %v1476_v63 }
0x129c   :  { %v1490_v46 = vpop.permute.xlu0 %1489 }
0x129d   :  { %1494 = vst.msk [vmem:[#allocation2 + $0x8] sm:$0x1] %vm357_vm0, %v1490_v46 }
0x12a1   :  { %v1328_v20 = vpop.permute.xlu1 %1327  ;;  %v1495_v45 = vld [vmem:[#allocation2] sm:$0xff] }
0x12a2   :  { %1332 = vst.msk [vmem:[#allocation2 + $0x9] sm:$0x1] %vm357_vm0, %v1328_v20  ;;  %3122 = vmatmul.msk.f32.vlgmr.msrb.gmra.mxu2 %vm201_vm11, %v1495_v45  ;;  %3124 = vmatmul.msk.f32.vlgmr.msra.gmra.mxu3 %vm201_vm11, %v1495_v45 }
0x12a3   :  { %2085 = vmatpush.msrb.mxu2 %v4181_v58  ;;  %2105 = vmatpush.msra.mxu3 %v4183_v61 }
0x12a5   :  { %2086 = vmatpush.msrb.mxu2 %v4185_v6  ;;  %2106 = vmatpush.msra.mxu3 %v4190_v57 }
0x12a7   :  { %2087 = vmatpush.msrb.mxu2 %v4192_v55  ;;  %2107 = vmatpush.msra.mxu3 %v4194_v36 }
0x12a9   :  { %v1496_v14 = vld [vmem:[#allocation2 + $0x8] sm:$0xff]  ;;  %2088 = vmatpush.msrb.mxu2 %v4200_v1  ;;  %2108 = vmatpush.msra.mxu3 %v4202_v38 }
0x12aa   :  { %3123 = vmatmul.msk.f32.gmra.mxu2 %vm201_vm11, %v1496_v14  ;;  %3125 = vmatmul.msk.f32.gmra.mxu3 %vm201_vm11, %v1496_v14 }
0x12ab   :  { %2089 = vmatpush.msrb.mxu2 %v4208_v62  ;;  %2109 = vmatpush.msra.mxu3 %v4210_v59 }
0x12ad   :  { %2090 = vmatpush.msrb.mxu2 %v4216_v7  ;;  %2110 = vmatpush.msra.mxu3 %v4218_v9 }
0x12af   :  { %2091 = vmatpush.msrb.mxu2 %v4224_v33  ;;  %2111 = vmatpush.msra.mxu3 %v4226_v0 }
0x12b1   :  { %2092 = vmatpush.msrb.mxu2 %v4232_v10  ;;  %2112 = vmatpush.msra.mxu3 %v4234_v11 }
0x1325   :  { %v1542_v17 = vpop.f32.mrf.mxu2  ;;  %v1565_v18 = vpop.f32.mrf.mxu3 }
0x1326   :  { %v1543_v19 = vadd.f32 %v1542_v17, %v1515_v16  ;;  %v1566_v21 = vadd.f32 %v1565_v18, %v1516_v5 }
0x1328   :  { %1571 = vst [vmem:[#allocation4] sm:$0xff] %v1543_v19 }
0x1329   :  { %1572 = vst [vmem:[#allocation4 + $0x8] sm:$0xff] %v1566_v21 }
0x132d   :  { %v1545_v22 = vpop.f32.mrf.mxu2  ;;  %v1568_v12 = vpop.f32.mrf.mxu3 }
0x132e   :  { %v1546_v23 = vadd.f32 %v1545_v22, %v1515_v16  ;;  %v1569_v24 = vadd.f32 %v1568_v12, %v1516_v5 }
0x132f   :  { %v1631_v56 = vld [vmem:[#allocation4] ss:$0 sm:$0xff] }
0x1330   :  { %1573 = vst [vmem:[#allocation4 + $0x10] sm:$0xff] %v1546_v23  ;;  %v1633_v13 = vld [vmem:[#allocation4 + $0xf] ss:$0 sm:$0xff] }
0x1331   :  { %1574 = vst [vmem:[#allocation4 + $0x18] sm:$0xff] %v1569_v24 }
0x1337   :  { %v1632_v15 = vld [vmem:[#allocation4 + $0x10] ss:$0 sm:$0xff] }
0x1338   :  { %v1637_v27 = vsel %vm251_vm1, %v1632_v15, %v1631_v56  ;;  %v1634_v28 = vld [vmem:[#allocation4 + $0x1f] ss:$0 sm:$0xff] }
0x1339   :  { %v1643_v30 = vadd.f32 %v1637_v27, %v1608_v25  ;;  %v1641_v31 = vsel %vm251_vm1, %v1634_v28, %v1633_v13 }
0x133a   :  { %v1644_v32 = vadd.f32 %v1641_v31, %v1628_v26 }
0x133b   :  { %3304 = vtanh.f32 %v1643_v30  ;;  %v3126_v40 = vmul.f32 -1.442695, %v1643_v30 }
0x133c   :  { %3306 = vtanh.f32 %v1644_v32  ;;  %v3127_v37 = vmul.f32 -1.442695, %v1644_v32  ;;  %v1794_v32 = vld [vmem:[#allocation4 + $0x11] ss:$0 sm:$0xff] }
0x133e   :  { %3308 = vpow2.f32 %v3127_v37  ;;  %v1795_v37 = vld [vmem:[#allocation4 + $0xe] ss:$0 sm:$0xff] }
0x1341   :  { %v3305_v34 = vpop.eup %3304 }
0x1342   :  { %v3307_v35 = vpop.eup %3306  ;;  %1686 = vrot.lane.b32.xlu1 %v3305_v34, %s3632_s3  ;;  %v1796_v34 = vld [vmem:[#allocation4 + $0x1e] ss:$0 sm:$0xff] }
0x1343   :  { %1704 = vrot.lane.b32.xlu2 %v3307_v35, %s3632_s3  ;;  %v1793_v35 = vld [vmem:[#allocation4 + $0x1] ss:$0 sm:$0xff] }
0x1344   :  { %v3309_v50 = vpop.eup %3308 }
0x1345   :  { %v1652_v39 = vadd.f32 1.0, %v3309_v50 }
0x1347   :  { %3310 = vrcp.f32 %v1652_v39  ;;  %v1679_v4 = vand.u32 2147483648, %v1652_v39  ;;  %vm1673_vm4 = vweird.f32 %v1652_v39  ;;  %v1677_v8 = vand.u32 2147483647, %v1652_v39 }
0x1348   :  { %3312 = vpow2.f32 %v3126_v40  ;;  %v1803_v40 = vsel %vm251_vm1, %v1796_v34, %v1795_v37 }
0x1349   :  { %v1680_v49 = vor.u32 1.1754944e-38, %v1679_v4  ;;  %vm1678_vm6 = vcmp.eq.f32.partialorder %v1677_v8, 8.507059e+37 }
0x134d   :  { %v3311_v2 = vpop.eup %3310 }
0x134e   :  { %v1669_v41 = vmul.f32 %v3311_v2, %v1652_v39  ;;  %v3313_v3 = vpop.eup %3312  ;;  %vm1674_vm3 = vweird.f32 %v3311_v2  ;;  %v1799_v39 = vsel %vm251_vm1, %v1794_v32, %v1793_v35 }
0x134f   :  { %v1651_v44 = vadd.f32 1.0, %v3313_v3  ;;  %vm1675_vm5 = vmor %vm1673_vm4, %vm1674_vm3 }
0x1350   :  { %v1670_v42 = vsub.f32 1.0, %v1669_v41 }
0x1351   :  { %3314 = vrcp.f32 %v1651_v44  ;;  %v1664_v45 = vand.u32 2147483648, %v1651_v44  ;;  %vm1658_vm8 = vweird.f32 %v1651_v44  ;;  %v1662_v14 = vand.u32 2147483647, %v1651_v44 }
0x1352   :  { %v1671_v43 = vmul.f32 %v3311_v2, %v1670_v42 }
0x1353   :  { %v1665_v16 = vor.u32 1.1754944e-38, %v1664_v45  ;;  %vm1663_vm12 = vcmp.eq.f32.partialorder %v1662_v14, 8.507059e+37 }
0x1354   :  { %v1672_v47 = vadd.f32 %v3311_v2, %v1671_v43 }
0x1356   :  { %v1676_v48 = vsel %vm1675_vm5, %v3311_v2, %v1672_v47 }
0x1357   :  { %v1681_v51 = vsel %vm1678_vm6, %v1680_v49, %v1676_v48  ;;  %v3315_v52 = vpop.eup %3314 }
0x1358   :  { %v1654_v54 = vmul.f32 %v3315_v52, %v1651_v44  ;;  %vm1659_vm7 = vweird.f32 %v3315_v52  ;;  %v1701_v19 = vmul.f32 0.0, %v1681_v51 }
0x1359   :  { %vm1660_vm9 = vmor %vm1658_vm8, %vm1659_vm7 }
0x135a   :  { %v1655_v63 = vsub.f32 1.0, %v1654_v54 }
0x135c   :  { %v1656_v46 = vmul.f32 %v3315_v52, %v1655_v63 }
0x135e   :  { %v1657_v20 = vadd.f32 %v3315_v52, %v1656_v46 }
0x1360   :  { %v1661_v60 = vsel %vm1660_vm9, %v3315_v52, %v1657_v20 }
0x1361   :  { %v1666_v17 = vsel %vm1663_vm12, %v1665_v16, %v1661_v60 }
0x1362   :  { %v1683_v23 = vmul.f32 0.0, %v1666_v17 }
0x139d   :  { %v1705_v29 = vpop.permute.xlu2 %1704 }
0x139e   :  { %v1707_v53 = vmul.f32 %v1705_v29, %v1681_v51 }
0x13a0   :  { %1709 = vrot.lane.b32.xlu1 %v1707_v53, %s3633_s29 }
0x13b4   :  { %v1687_v5 = vpop.permute.xlu1 %1686 }
0x13b5   :  { %v1689_v18 = vmul.f32 %v1687_v5, %v1666_v17 }
0x13b7   :  { %1691 = vrot.lane.b32.xlu0 %v1689_v18, %s3633_s29 }
0x1412   :  { %v1710_v21 = vpop.permute.xlu1 %1709 }
0x1413   :  { %v4312_v22 = vadd.f32 %v1710_v21, %v1701_v19 }
0x1415   :  { %3316 = vtanh.f32 %v4312_v22 }
0x141b   :  { %v3317_v12 = vpop.eup %3316 }
0x141c   :  { %1715 = vrot.lane.b32.xlu0 %v3317_v12, %s3632_s3 }
0x1429   :  { %v1692_v24 = vpop.permute.xlu0 %1691 }
0x142a   :  { %v4316_v25 = vadd.f32 %v1692_v24, %v1683_v23 }
0x142c   :  { %3318 = vtanh.f32 %v4316_v25 }
0x1432   :  { %v3319_v56 = vpop.eup %3318 }
0x1433   :  { %1697 = vrot.lane.b32.xlu2 %v3319_v56, %s3632_s3 }
0x148d   :  { %v1698_v15 = vpop.permute.xlu2 %1697 }
0x148e   :  { %v1716_v26 = vpop.permute.xlu0 %1715  ;;  %v4320_v27 = vmul.f32 %v1698_v15, %v1666_v17 }
0x148f   :  { %v4322_v13 = vmul.f32 %v1716_v26, %v1681_v51 }
0x1490   :  { %1743 = vrot.lane.b32.xlu1 %v4320_v27, %s3633_s29 }
0x1491   :  { %1746 = vrot.lane.b32.xlu2 %v4322_v13, %s3632_s3 }
0x14eb   :  { %v1747_v28 = vpop.permute.xlu2 %1746 }
0x1502   :  { %v1744_v30 = vpop.permute.xlu1 %1743 }
0x1503   :  { %v1749_v31 = vsel %vm366_vm10, %v1744_v30, %v1747_v28 }
0x1504   :  { %3128 = vmatmul.msk.f32.vlgmr.msra.gmra.mxu2 %vm201_vm11, %v1749_v31  ;;  %3129 = vmatmul.msk.f32.vlgmr.msrb.gmra.mxu3 %vm201_vm11, %v1749_v31 }
0x1505   :  { %2409 = vmatpush.msra.mxu2 %v4181_v58  ;;  %2429 = vmatpush.msrb.mxu3 %v4183_v61 }
0x1507   :  { %2410 = vmatpush.msra.mxu2 %v4185_v6  ;;  %2430 = vmatpush.msrb.mxu3 %v4190_v57 }
0x1509   :  { %2411 = vmatpush.msra.mxu2 %v4192_v55  ;;  %2431 = vmatpush.msrb.mxu3 %v4194_v36 }
0x150b   :  { %2412 = vmatpush.msra.mxu2 %v4200_v1  ;;  %2432 = vmatpush.msrb.mxu3 %v4202_v38 }
0x150d   :  { %2413 = vmatpush.msra.mxu2 %v4208_v62  ;;  %2433 = vmatpush.msrb.mxu3 %v4210_v59 }
0x150f   :  { %2414 = vmatpush.msra.mxu2 %v4216_v7  ;;  %2434 = vmatpush.msrb.mxu3 %v4218_v9 }
0x1511   :  { %2415 = vmatpush.msra.mxu2 %v4224_v33  ;;  %2435 = vmatpush.msrb.mxu3 %v4226_v0 }
0x1513   :  { %2416 = vmatpush.msra.mxu2 %v4232_v10  ;;  %2436 = vmatpush.msrb.mxu3 %v4234_v11 }
0x1587   :  { %v1770_v50 = vpop.f32.mrf.mxu2  ;;  %v1790_v2 = vpop.f32.mrf.mxu3 }
0x1588   :  { %v1805_v41 = vadd.f32 %v1799_v39, %v1770_v50  ;;  %v1806_v42 = vadd.f32 %v1803_v40, %v1790_v2 }
0x158a   :  { %3320 = vtanh.f32 %v1805_v41  ;;  %v3130_v44 = vmul.f32 -1.442695, %v1805_v41  ;;  %v3131_v47 = vmul.f32 -1.442695, %v1806_v42 }
0x158b   :  { %3322 = vtanh.f32 %v1806_v42 }
0x158c   :  { %3324 = vpow2.f32 %v3130_v44  ;;  %v1958_v44 = vld [vmem:[#allocation4 + $0x1d] ss:$0 sm:$0xff] }
0x158d   :  { %3326 = vpow2.f32 %v3131_v47  ;;  %v1955_v47 = vld [vmem:[#allocation4 + $0x2] ss:$0 sm:$0xff] }
0x1590   :  { %v3321_v3 = vpop.eup %3320 }
0x1591   :  { %v3323_v43 = vpop.eup %3322  ;;  %1848 = vrot.lane.b32.xlu0 %v3321_v3, %s3632_s3 }
0x1592   :  { %1866 = vrot.lane.b32.xlu1 %v3323_v43, %s3632_s3  ;;  %v3325_v4 = vpop.eup %3324  ;;  %v1956_v43 = vld [vmem:[#allocation4 + $0x12] ss:$0 sm:$0xff] }
0x1593   :  { %v3327_v8 = vpop.eup %3326  ;;  %v1813_v48 = vadd.f32 1.0, %v3325_v4  ;;  %v1957_v4 = vld [vmem:[#allocation4 + $0xd] ss:$0 sm:$0xff] }
0x1594   :  { %v1814_v49 = vadd.f32 1.0, %v3327_v8 }
0x1595   :  { %3328 = vrcp.f32 %v1813_v48  ;;  %v1826_v60 = vand.u32 2147483648, %v1813_v48  ;;  %vm1820_vm15 = vweird.f32 %v1813_v48  ;;  %v1824_v5 = vand.u32 2147483647, %v1813_v48 }
0x1596   :  { %3330 = vrcp.f32 %v1814_v49  ;;  %v1841_v16 = vand.u32 2147483648, %v1814_v49  ;;  %vm1835_vm3 = vweird.f32 %v1814_v49  ;;  %v1839_v17 = vand.u32 2147483647, %v1814_v49 }
0x1597   :  { %v1827_v21 = vor.u32 1.1754944e-38, %v1826_v60  ;;  %vm1825_vm6 = vcmp.eq.f32.partialorder %v1824_v5, 8.507059e+37 }
0x1598   :  { %v1842_v12 = vor.u32 1.1754944e-38, %v1841_v16  ;;  %vm1840_vm7 = vcmp.eq.f32.partialorder %v1839_v17, 8.507059e+37 }
0x159b   :  { %v3329_v29 = vpop.eup %3328 }
0x159c   :  { %v3331_v51 = vpop.eup %3330  ;;  %v1816_v52 = vmul.f32 %v3329_v29, %v1813_v48  ;;  %vm1821_vm13 = vweird.f32 %v3329_v29  ;;  %v1961_v48 = vsel %vm251_vm1, %v1956_v43, %v1955_v47 }
0x159d   :  { %v1831_v53 = vmul.f32 %v3331_v51, %v1814_v49  ;;  %vm1836_vm14 = vweird.f32 %v3331_v51  ;;  %vm1822_vm4 = vmor %vm1820_vm15, %vm1821_vm13 }
0x159e   :  { %v1817_v54 = vsub.f32 1.0, %v1816_v52  ;;  %vm1837_vm5 = vmor %vm1835_vm3, %vm1836_vm14 }
0x159f   :  { %v1832_v63 = vsub.f32 1.0, %v1831_v53 }
0x15a0   :  { %v1818_v46 = vmul.f32 %v3329_v29, %v1817_v54 }
0x15a1   :  { %v1833_v20 = vmul.f32 %v3331_v51, %v1832_v63 }
0x15a2   :  { %v1819_v45 = vadd.f32 %v3329_v29, %v1818_v46 }
0x15a3   :  { %v1834_v14 = vadd.f32 %v3331_v51, %v1833_v20 }
0x15a4   :  { %v1823_v18 = vsel %vm1822_vm4, %v3329_v29, %v1819_v45  ;;  %v1965_v29 = vsel %vm251_vm1, %v1958_v44, %v1957_v4 }
0x15a5   :  { %v1838_v19 = vsel %vm1837_vm5, %v3331_v51, %v1834_v14  ;;  %v1828_v24 = vsel %vm1825_vm6, %v1827_v21, %v1823_v18 }
0x15a6   :  { %v1843_v15 = vsel %vm1840_vm7, %v1842_v12, %v1838_v19  ;;  %v1845_v30 = vmul.f32 %v1828_v24, %v4316_v25 }
0x15a7   :  { %v1863_v35 = vmul.f32 %v1843_v15, %v4312_v22 }
0x1603   :  { %v1849_v23 = vpop.permute.xlu0 %1848 }
0x1604   :  { %v1867_v56 = vpop.permute.xlu1 %1866  ;;  %v1851_v26 = vmul.f32 %v1849_v23, %v1828_v24 }
0x1605   :  { %v1869_v28 = vmul.f32 %v1867_v56, %v1843_v15 }
0x1606   :  { %1853 = vrot.lane.b32.xlu2 %v1851_v26, %s3633_s29 }
0x1607   :  { %1871 = vrot.lane.b32.xlu0 %v1869_v28, %s3633_s29 }
0x1660   :  { %v1854_v31 = vpop.permute.xlu2 %1853 }
0x1661   :  { %v4354_v32 = vadd.f32 %v1854_v31, %v1845_v30 }
0x1663   :  { %3332 = vtanh.f32 %v4354_v32 }
0x1669   :  { %v3333_v34 = vpop.eup %3332 }
0x166a   :  { %1859 = vrot.lane.b32.xlu1 %v3333_v34, %s3632_s3 }
0x1679   :  { %v1872_v37 = vpop.permute.xlu0 %1871 }
0x167a   :  { %v4359_v50 = vadd.f32 %v1872_v37, %v1863_v35 }
0x167c   :  { %3334 = vtanh.f32 %v4359_v50 }
0x1682   :  { %v3335_v39 = vpop.eup %3334 }
0x1683   :  { %1877 = vrot.lane.b32.xlu2 %v3335_v39, %s3632_s3 }
0x16dc   :  { %v1860_v2 = vpop.permute.xlu1 %1859 }
0x16dd   :  { %v1878_v25 = vpop.permute.xlu2 %1877  ;;  %v4363_v40 = vmul.f32 %v1860_v2, %v1828_v24 }
0x16de   :  { %v4365_v41 = vmul.f32 %v1878_v25, %v1843_v15 }
0x16df   :  { %1905 = vrot.lane.b32.xlu0 %v4363_v40, %s3633_s29 }
0x16e0   :  { %1908 = vrot.lane.b32.xlu1 %v4365_v41, %s3632_s3 }
0x1751   :  { %v1906_v22 = vpop.permute.xlu0 %1905 }
0x1752   :  { %v1909_v42 = vpop.permute.xlu1 %1908 }
0x1753   :  { %v1911_v3 = vsel %vm366_vm10, %v1906_v22, %v1909_v42 }
0x1754   :  { %3132 = vmatmul.msk.f32.vlgmr.msrb.gmra.mxu0 %vm201_vm11, %v1911_v3  ;;  %3133 = vmatmul.msk.f32.vlgmr.msra.gmra.mxu1 %vm201_vm11, %v1911_v3 }
0x1755   :  { %2571 = vmatpush.msrb.mxu0 %v4181_v58  ;;  %2591 = vmatpush.msra.mxu1 %v4183_v61 }
0x1757   :  { %2572 = vmatpush.msrb.mxu0 %v4185_v6  ;;  %2592 = vmatpush.msra.mxu1 %v4190_v57 }
0x1759   :  { %2573 = vmatpush.msrb.mxu0 %v4192_v55  ;;  %2593 = vmatpush.msra.mxu1 %v4194_v36 }
0x175b   :  { %2574 = vmatpush.msrb.mxu0 %v4200_v1  ;;  %2594 = vmatpush.msra.mxu1 %v4202_v38 }
0x175d   :  { %2575 = vmatpush.msrb.mxu0 %v4208_v62  ;;  %2595 = vmatpush.msra.mxu1 %v4210_v59 }
0x175f   :  { %2576 = vmatpush.msrb.mxu0 %v4216_v7  ;;  %2596 = vmatpush.msra.mxu1 %v4218_v9 }
0x1761   :  { %2577 = vmatpush.msrb.mxu0 %v4224_v33  ;;  %2597 = vmatpush.msra.mxu1 %v4226_v0 }
0x1763   :  { %2578 = vmatpush.msrb.mxu0 %v4232_v10  ;;  %2598 = vmatpush.msra.mxu1 %v4234_v11 }
0x17d1   :  { %v1932_v8 = vpop.f32.mrf.mxu0  ;;  %v1952_v49 = vpop.f32.mrf.mxu1 }
0x17d2   :  { %v1967_v51 = vadd.f32 %v1961_v48, %v1932_v8  ;;  %v1968_v52 = vadd.f32 %v1965_v29, %v1952_v49 }
0x17d4   :  { %3336 = vtanh.f32 %v1967_v51  ;;  %v3134_v63 = vmul.f32 -1.442695, %v1967_v51  ;;  %v3135_v14 = vmul.f32 -1.442695, %v1968_v52 }
0x17d5   :  { %3338 = vtanh.f32 %v1968_v52 }
0x17d6   :  { %3340 = vpow2.f32 %v3134_v63 }
0x17da   :  { %v3337_v53 = vpop.eup %3336 }
0x17db   :  { %v3339_v54 = vpop.eup %3338  ;;  %2010 = vrot.lane.b32.xlu2 %v3337_v53, %s3632_s3 }
0x17dc   :  { %2028 = vrot.lane.b32.xlu0 %v3339_v54, %s3632_s3  ;;  %v3341_v46 = vpop.eup %3340 }
0x17dd   :  { %v1975_v20 = vadd.f32 1.0, %v3341_v46 }
0x17df   :  { %3342 = vrcp.f32 %v1975_v20  ;;  %v1988_v21 = vand.u32 2147483648, %v1975_v20  ;;  %vm1982_vm9 = vweird.f32 %v1975_v20  ;;  %v1986_v12 = vand.u32 2147483647, %v1975_v20 }
0x17e0   :  { %3344 = vpow2.f32 %v3135_v14 }
0x17e1   :  { %v1989_v24 = vor.u32 1.1754944e-38, %v1988_v21  ;;  %vm1987_vm13 = vcmp.eq.f32.partialorder %v1986_v12, 8.507059e+37 }
0x17e5   :  { %v3343_v45 = vpop.eup %3342 }
0x17e6   :  { %v1978_v60 = vmul.f32 %v3343_v45, %v1975_v20  ;;  %v3345_v17 = vpop.eup %3344  ;;  %vm1983_vm8 = vweird.f32 %v3343_v45 }
0x17e7   :  { %v1976_v18 = vadd.f32 1.0, %v3345_v17  ;;  %vm1984_vm12 = vmor %vm1982_vm9, %vm1983_vm8 }
0x17e8   :  { %v1979_v16 = vsub.f32 1.0, %v1978_v60 }
0x17e9   :  { %3346 = vrcp.f32 %v1976_v18  ;;  %v2003_v37 = vand.u32 2147483648, %v1976_v18  ;;  %vm1997_vm15 = vweird.f32 %v1976_v18  ;;  %v2001_v39 = vand.u32 2147483647, %v1976_v18 }
0x17ea   :  { %v1980_v5 = vmul.f32 %v3343_v45, %v1979_v16 }
0x17eb   :  { %v2004_v25 = vor.u32 1.1754944e-38, %v2003_v37  ;;  %vm2002_vm4 = vcmp.eq.f32.partialorder %v2001_v39, 8.507059e+37 }
0x17ec   :  { %v1981_v19 = vadd.f32 %v3343_v45, %v1980_v5 }
0x17ee   :  { %v1985_v23 = vsel %vm1984_vm12, %v3343_v45, %v1981_v19 }
0x17ef   :  { %v1990_v15 = vsel %vm1987_vm13, %v1989_v24, %v1985_v23  ;;  %v3347_v28 = vpop.eup %3346 }
0x17f0   :  { %v1993_v30 = vmul.f32 %v3347_v28, %v1976_v18  ;;  %vm1998_vm14 = vweird.f32 %v3347_v28  ;;  %v2007_v43 = vmul.f32 %v1990_v15, %v4354_v32 }
0x17f1   :  { %vm1999_vm3 = vmor %vm1997_vm15, %vm1998_vm14 }
0x17f2   :  { %v1994_v31 = vsub.f32 1.0, %v1993_v30 }
0x17f4   :  { %v1995_v34 = vmul.f32 %v3347_v28, %v1994_v31 }
0x17f6   :  { %v1996_v35 = vadd.f32 %v3347_v28, %v1995_v34 }
0x17f8   :  { %v2000_v2 = vsel %vm1999_vm3, %v3347_v28, %v1996_v35 }
0x17f9   :  { %v2005_v42 = vsel %vm2002_vm4, %v2004_v25, %v2000_v2 }
0x17fa   :  { %v2025_v44 = vmul.f32 %v2005_v42, %v4359_v50 }
0x1835   :  { %v2011_v56 = vpop.permute.xlu2 %2010 }
0x1836   :  { %v2013_v26 = vmul.f32 %v2011_v56, %v1990_v15 }
0x1838   :  { %2015 = vrot.lane.b32.xlu1 %v2013_v26, %s3633_s29 }
0x184e   :  { %v2029_v22 = vpop.permute.xlu0 %2028 }
0x184f   :  { %v2031_v3 = vmul.f32 %v2029_v22, %v2005_v42 }
0x1851   :  { %2033 = vrot.lane.b32.xlu2 %v2031_v3, %s3633_s29 }
0x18aa   :  { %v2016_v47 = vpop.permute.xlu1 %2015 }
0x18ab   :  { %v2034_v4 = vpop.permute.xlu2 %2033  ;;  %v4398_v8 = vadd.f32 %v2016_v47, %v2007_v43 }
0x18ac   :  { %v4400_v48 = vadd.f32 %v2034_v4, %v2025_v44 }
0x18ad   :  { %3348 = vtanh.f32 %v4398_v8 }
0x18ae   :  { %3350 = vtanh.f32 %v4400_v48 }
0x18b3   :  { %v3349_v49 = vpop.eup %3348 }
0x18b4   :  { %v3351_v29 = vpop.eup %3350  ;;  %2021 = vrot.lane.b32.xlu0 %v3349_v49, %s3632_s3 }
0x18b5   :  { %2039 = vrot.lane.b32.xlu1 %v3351_v29, %s3632_s3 }
0x1926   :  { %v2022_v51 = vpop.permute.xlu0 %2021 }
0x1927   :  { %v2040_v32 = vpop.permute.xlu1 %2039  ;;  %v4406_v52 = vmul.f32 %v2022_v51, %v1990_v15 }
0x1928   :  { %v4408_v50 = vmul.f32 %v2040_v32, %v2005_v42 }
0x1929   :  { %2067 = vrot.lane.b32.xlu2 %v4406_v52, %s3633_s29 }
0x192a   :  { %2070 = vrot.lane.b32.xlu0 %v4408_v50, %s3632_s3 }
0x1983   :  { %v2068_v53 = vpop.permute.xlu2 %2067 }
0x199c   :  { %v2071_v54 = vpop.permute.xlu0 %2070 }
0x199d   :  { %v2073_v63 = vsel %vm366_vm10, %v2068_v53, %v2071_v54 }
0x199e   :  { %3136 = vmatmul.msk.f32.vlgmr.msrb.gmra.mxu2 %vm201_vm11, %v2073_v63  ;;  %3137 = vmatmul.msk.f32.vlgmr.msra.gmra.mxu3 %vm201_vm11, %v2073_v63  ;;  %v2280_v63 = vld [vmem:[#allocation4 + $0x14] ss:$0 sm:$0xff] }
0x199f   :  { %2733 = vmatpush.msrb.mxu2 %v4181_v58  ;;  %2753 = vmatpush.msra.mxu3 %v4183_v61  ;;  %v2118_v58 = vld [vmem:[#allocation4 + $0x13] ss:$0 sm:$0xff]  ;;  %v2120_v61 = vld [vmem:[#allocation4 + $0x1c] ss:$0 sm:$0xff] }
0x19a1   :  { %2734 = vmatpush.msrb.mxu2 %v4185_v6  ;;  %2754 = vmatpush.msra.mxu3 %v4190_v57  ;;  %v2117_v6 = vld [vmem:[#allocation4 + $0x3] ss:$0 sm:$0xff]  ;;  %v2119_v57 = vld [vmem:[#allocation4 + $0xc] ss:$0 sm:$0xff] }
0x19a3   :  { %2735 = vmatpush.msrb.mxu2 %v4192_v55  ;;  %2755 = vmatpush.msra.mxu3 %v4194_v36  ;;  %v2123_v36 = vsel %vm251_vm1, %v2118_v58, %v2117_v6  ;;  %v2282_v58 = vld [vmem:[#allocation4 + $0x1b] ss:$0 sm:$0xff]  ;;  %v2281_v6 = vld [vmem:[#allocation4 + $0xb] ss:$0 sm:$0xff] }
0x19a5   :  { %2736 = vmatpush.msrb.mxu2 %v4200_v1  ;;  %2756 = vmatpush.msra.mxu3 %v4202_v38  ;;  %v2127_v38 = vsel %vm251_vm1, %v2120_v61, %v2119_v57  ;;  %v2279_v61 = vld [vmem:[#allocation4 + $0x4] ss:$0 sm:$0xff] }
0x19a7   :  { %2737 = vmatpush.msrb.mxu2 %v4208_v62  ;;  %2757 = vmatpush.msra.mxu3 %v4210_v59 }
0x19a9   :  { %2738 = vmatpush.msrb.mxu2 %v4216_v7  ;;  %2758 = vmatpush.msra.mxu3 %v4218_v9 }
0x19ab   :  { %2739 = vmatpush.msrb.mxu2 %v4224_v33  ;;  %2759 = vmatpush.msra.mxu3 %v4226_v0 }
0x19ad   :  { %2740 = vmatpush.msrb.mxu2 %v4232_v10  ;;  %2760 = vmatpush.msra.mxu3 %v4234_v11 }
0x1a21   :  { %v2094_v55 = vpop.f32.mrf.mxu2  ;;  %v2114_v1 = vpop.f32.mrf.mxu3 }
0x1a22   :  { %v2129_v62 = vadd.f32 %v2123_v36, %v2094_v55  ;;  %v2130_v59 = vadd.f32 %v2127_v38, %v2114_v1  ;;  %v2285_v55 = vsel %vm251_vm1, %v2280_v63, %v2279_v61  ;;  %v2289_v1 = vsel %vm251_vm1, %v2282_v58, %v2281_v6  ;;  %v2442_v58 = vld [vmem:[#allocation4 + $0x15] ss:$0 sm:$0xff]  ;;  %v2444_v61 = vld [vmem:[#allocation4 + $0x1a] ss:$0 sm:$0xff]  ;;  %v2441_v6 = vld [vmem:[#allocation4 + $0x5] ss:$0 sm:$0xff] }
0x1a24   :  { %3352 = vtanh.f32 %v2129_v62  ;;  %v3139_v33 = vmul.f32 -1.442695, %v2130_v59  ;;  %v3138_v46 = vmul.f32 -1.442695, %v2129_v62 }
0x1a25   :  { %3354 = vtanh.f32 %v2130_v59 }
0x1a26   :  { %3356 = vpow2.f32 %v3139_v33 }
0x1a2a   :  { %v3353_v7 = vpop.eup %3352 }
0x1a2b   :  { %v3355_v9 = vpop.eup %3354  ;;  %2172 = vrot.lane.b32.xlu1 %v3353_v7, %s3632_s3 }
0x1a2c   :  { %2190 = vrot.lane.b32.xlu2 %v3355_v9, %s3632_s3  ;;  %v3357_v0 = vpop.eup %3356 }
0x1a2d   :  { %v2138_v10 = vadd.f32 1.0, %v3357_v0 }
0x1a2f   :  { %3358 = vrcp.f32 %v2138_v10  ;;  %v2165_v17 = vand.u32 2147483648, %v2138_v10  ;;  %vm2159_vm6 = vweird.f32 %v2138_v10  ;;  %v2163_v18 = vand.u32 2147483647, %v2138_v10 }
0x1a30   :  { %3360 = vpow2.f32 %v3138_v46 }
0x1a31   :  { %v2166_v21 = vor.u32 1.1754944e-38, %v2165_v17  ;;  %vm2164_vm8 = vcmp.eq.f32.partialorder %v2163_v18, 8.507059e+37 }
0x1a35   :  { %v3359_v11 = vpop.eup %3358 }
0x1a36   :  { %v2155_v20 = vmul.f32 %v3359_v11, %v2138_v10  ;;  %v3361_v14 = vpop.eup %3360  ;;  %vm2160_vm5 = vweird.f32 %v3359_v11 }
0x1a37   :  { %v2137_v16 = vadd.f32 1.0, %v3361_v14  ;;  %vm2161_vm7 = vmor %vm2159_vm6, %vm2160_vm5 }
0x1a38   :  { %v2156_v45 = vsub.f32 1.0, %v2155_v20 }
0x1a39   :  { %3362 = vrcp.f32 %v2137_v16  ;;  %v2150_v31 = vand.u32 2147483648, %v2137_v16  ;;  %vm2144_vm12 = vweird.f32 %v2137_v16  ;;  %v2148_v34 = vand.u32 2147483647, %v2137_v16 }
0x1a3a   :  { %v2157_v60 = vmul.f32 %v3359_v11, %v2156_v45 }
0x1a3b   :  { %v2151_v37 = vor.u32 1.1754944e-38, %v2150_v31  ;;  %vm2149_vm14 = vcmp.eq.f32.partialorder %v2148_v34, 8.507059e+37 }
0x1a3c   :  { %v2158_v5 = vadd.f32 %v3359_v11, %v2157_v60 }
0x1a3e   :  { %v2162_v19 = vsel %vm2161_vm7, %v3359_v11, %v2158_v5 }
0x1a3f   :  { %v2167_v23 = vsel %vm2164_vm8, %v2166_v21, %v2162_v19  ;;  %v3363_v24 = vpop.eup %3362 }
0x1a40   :  { %v2140_v15 = vmul.f32 %v3363_v24, %v2137_v16  ;;  %vm2145_vm9 = vweird.f32 %v3363_v24  ;;  %v2187_v22 = vmul.f32 %v2167_v23, %v4400_v48 }
0x1a41   :  { %vm2146_vm13 = vmor %vm2144_vm12, %vm2145_vm9 }
0x1a42   :  { %v2141_v26 = vsub.f32 1.0, %v2140_v15 }
0x1a44   :  { %v2142_v28 = vmul.f32 %v3363_v24, %v2141_v26 }
0x1a46   :  { %v2143_v30 = vadd.f32 %v3363_v24, %v2142_v28 }
0x1a48   :  { %v2147_v35 = vsel %vm2146_vm13, %v3363_v24, %v2143_v30 }
0x1a49   :  { %v2152_v2 = vsel %vm2149_vm14, %v2151_v37, %v2147_v35 }
0x1a4a   :  { %v2169_v44 = vmul.f32 %v2152_v2, %v4398_v8 }
0x1a86   :  { %v2191_v12 = vpop.permute.xlu2 %2190 }
0x1a87   :  { %v2193_v56 = vmul.f32 %v2191_v12, %v2167_v23 }
0x1a89   :  { %2195 = vrot.lane.b32.xlu1 %v2193_v56, %s3633_s29 }
0x1a9d   :  { %v2173_v39 = vpop.permute.xlu1 %2172 }
0x1a9e   :  { %v2175_v25 = vmul.f32 %v2173_v39, %v2152_v2 }
0x1aa0   :  { %2177 = vrot.lane.b32.xlu0 %v2175_v25, %s3633_s29 }
0x1afb   :  { %v2196_v42 = vpop.permute.xlu1 %2195 }
0x1afc   :  { %v4440_v3 = vadd.f32 %v2196_v42, %v2187_v22 }
0x1afe   :  { %3364 = vtanh.f32 %v4440_v3 }
0x1b04   :  { %v3365_v43 = vpop.eup %3364 }
0x1b05   :  { %2201 = vrot.lane.b32.xlu0 %v3365_v43, %s3632_s3 }
0x1b12   :  { %v2178_v47 = vpop.permute.xlu0 %2177 }
0x1b13   :  { %v4445_v4 = vadd.f32 %v2178_v47, %v2169_v44 }
0x1b15   :  { %3366 = vtanh.f32 %v4445_v4 }
0x1b1b   :  { %v3367_v49 = vpop.eup %3366 }
0x1b1c   :  { %2183 = vrot.lane.b32.xlu2 %v3367_v49, %s3632_s3 }
0x1b76   :  { %v2184_v29 = vpop.permute.xlu2 %2183 }
0x1b77   :  { %v2202_v48 = vpop.permute.xlu0 %2201  ;;  %v4449_v51 = vmul.f32 %v2184_v29, %v2152_v2 }
0x1b78   :  { %v4451_v32 = vmul.f32 %v2202_v48, %v2167_v23 }
0x1b79   :  { %2229 = vrot.lane.b32.xlu1 %v4449_v51, %s3633_s29 }
0x1b7a   :  { %2232 = vrot.lane.b32.xlu2 %v4451_v32, %s3632_s3 }
0x1bd4   :  { %v2233_v8 = vpop.permute.xlu2 %2232 }
0x1beb   :  { %v2230_v53 = vpop.permute.xlu1 %2229 }
0x1bec   :  { %v2235_v54 = vsel %vm366_vm10, %v2230_v53, %v2233_v8 }
0x1bed   :  { %3140 = vmatmul.msk.f32.vlgmr.msra.gmra.mxu0 %vm201_vm11, %v2235_v54  ;;  %3141 = vmatmul.msk.f32.vlgmr.msrb.gmra.mxu1 %vm201_vm11, %v2235_v54 }
0x1c6a   :  { %v2256_v57 = vpop.f32.mrf.mxu0  ;;  %v2276_v36 = vpop.f32.mrf.mxu1 }
0x1c6b   :  { %v2291_v38 = vadd.f32 %v2285_v55, %v2256_v57  ;;  %v2292_v62 = vadd.f32 %v2289_v1, %v2276_v36  ;;  %v2443_v57 = vld [vmem:[#allocation4 + $0xa] ss:$0 sm:$0xff]  ;;  %v2447_v36 = vsel %vm251_vm1, %v2442_v58, %v2441_v6 }
0x1c6d   :  { %3368 = vtanh.f32 %v2291_v38  ;;  %v3142_v9 = vmul.f32 -1.442695, %v2291_v38  ;;  %v3143_v33 = vmul.f32 -1.442695, %v2292_v62  ;;  %v2451_v38 = vsel %vm251_vm1, %v2444_v61, %v2443_v57  ;;  %v2604_v57 = vld [vmem:[#allocation4 + $0x16] ss:$0 sm:$0xff] }
0x1c6e   :  { %3370 = vtanh.f32 %v2292_v62 }
0x1c6f   :  { %3372 = vpow2.f32 %v3142_v9 }
0x1c70   :  { %3374 = vpow2.f32 %v3143_v33 }
0x1c73   :  { %v3369_v59 = vpop.eup %3368 }
0x1c74   :  { %v3371_v7 = vpop.eup %3370  ;;  %2334 = vrot.lane.b32.xlu0 %v3369_v59, %s3632_s3 }
0x1c75   :  { %2352 = vrot.lane.b32.xlu1 %v3371_v7, %s3632_s3  ;;  %v3373_v0 = vpop.eup %3372 }
0x1c76   :  { %v3375_v10 = vpop.eup %3374  ;;  %v2299_v11 = vadd.f32 1.0, %v3373_v0 }
0x1c77   :  { %v2300_v46 = vadd.f32 1.0, %v3375_v10 }
0x1c78   :  { %3376 = vrcp.f32 %v2299_v11  ;;  %v2312_v12 = vand.u32 2147483648, %v2299_v11  ;;  %vm2306_vm4 = vweird.f32 %v2299_v11  ;;  %v2310_v24 = vand.u32 2147483647, %v2299_v11 }
0x1c79   :  { %3378 = vrcp.f32 %v2300_v46  ;;  %v2327_v23 = vand.u32 2147483648, %v2300_v46  ;;  %vm2321_vm5 = vweird.f32 %v2300_v46  ;;  %v2325_v56 = vand.u32 2147483647, %v2300_v46 }
0x1c7a   :  { %v2313_v28 = vor.u32 1.1754944e-38, %v2312_v12  ;;  %vm2311_vm8 = vcmp.eq.f32.partialorder %v2310_v24, 8.507059e+37 }
0x1c7b   :  { %v2328_v30 = vor.u32 1.1754944e-38, %v2327_v23  ;;  %vm2326_vm9 = vcmp.eq.f32.partialorder %v2325_v56, 8.507059e+37 }
0x1c7e   :  { %v3377_v20 = vpop.eup %3376 }
0x1c7f   :  { %v3379_v45 = vpop.eup %3378  ;;  %v2302_v14 = vmul.f32 %v3377_v20, %v2299_v11  ;;  %vm2307_vm15 = vweird.f32 %v3377_v20 }
0x1c80   :  { %v2317_v60 = vmul.f32 %v3379_v45, %v2300_v46  ;;  %vm2322_vm3 = vweird.f32 %v3379_v45  ;;  %vm2308_vm6 = vmor %vm2306_vm4, %vm2307_vm15 }
0x1c81   :  { %v2303_v16 = vsub.f32 1.0, %v2302_v14  ;;  %vm2323_vm7 = vmor %vm2321_vm5, %vm2322_vm3 }
0x1c82   :  { %v2318_v5 = vsub.f32 1.0, %v2317_v60 }
0x1c83   :  { %v2304_v17 = vmul.f32 %v3377_v20, %v2303_v16 }
0x1c84   :  { %v2319_v18 = vmul.f32 %v3379_v45, %v2318_v5 }
0x1c85   :  { %v2305_v19 = vadd.f32 %v3377_v20, %v2304_v17 }
0x1c86   :  { %v2320_v21 = vadd.f32 %v3379_v45, %v2319_v18 }
0x1c87   :  { %v2309_v15 = vsel %vm2308_vm6, %v3377_v20, %v2305_v19 }
0x1c88   :  { %v2324_v26 = vsel %vm2323_vm7, %v3379_v45, %v2320_v21  ;;  %v2314_v34 = vsel %vm2311_vm8, %v2313_v28, %v2309_v15 }
0x1c89   :  { %v2329_v37 = vsel %vm2326_vm9, %v2328_v30, %v2324_v26  ;;  %v2331_v25 = vmul.f32 %v2314_v34, %v4445_v4 }
0x1c8a   :  { %v2349_v44 = vmul.f32 %v2329_v37, %v4440_v3 }
0x1ce6   :  { %v2335_v31 = vpop.permute.xlu0 %2334 }
0x1ce7   :  { %v2353_v35 = vpop.permute.xlu1 %2352  ;;  %v2337_v39 = vmul.f32 %v2335_v31, %v2314_v34 }
0x1ce8   :  { %v2355_v2 = vmul.f32 %v2353_v35, %v2329_v37 }
0x1ce9   :  { %2339 = vrot.lane.b32.xlu2 %v2337_v39, %s3633_s29 }
0x1cea   :  { %2357 = vrot.lane.b32.xlu0 %v2355_v2, %s3633_s29 }
0x1d43   :  { %v2340_v22 = vpop.permute.xlu2 %2339 }
0x1d44   :  { %v4467_v42 = vadd.f32 %v2340_v22, %v2331_v25 }
0x1d46   :  { %3380 = vtanh.f32 %v4467_v42 }
0x1d4c   :  { %v3381_v43 = vpop.eup %3380 }
0x1d4d   :  { %2345 = vrot.lane.b32.xlu1 %v3381_v43, %s3632_s3 }
0x1d5c   :  { %v2358_v47 = vpop.permute.xlu0 %2357 }
0x1d5d   :  { %v4472_v49 = vadd.f32 %v2358_v47, %v2349_v44 }
0x1d5f   :  { %3382 = vtanh.f32 %v4472_v49 }
0x1d65   :  { %v3383_v29 = vpop.eup %3382 }
0x1d66   :  { %2363 = vrot.lane.b32.xlu2 %v3383_v29, %s3632_s3 }
0x1dbf   :  { %v2346_v48 = vpop.permute.xlu1 %2345 }
0x1dc0   :  { %v2364_v4 = vpop.permute.xlu2 %2363  ;;  %v4476_v8 = vmul.f32 %v2346_v48, %v2314_v34 }
0x1dc1   :  { %v4478_v53 = vmul.f32 %v2364_v4, %v2329_v37 }
0x1dc2   :  { %2391 = vrot.lane.b32.xlu0 %v4476_v8, %s3633_s29 }
0x1dc3   :  { %2394 = vrot.lane.b32.xlu1 %v4478_v53, %s3632_s3 }
0x1e34   :  { %v2392_v3 = vpop.permute.xlu0 %2391 }
0x1e35   :  { %v2395_v54 = vpop.permute.xlu1 %2394 }
0x1e36   :  { %v2397_v63 = vsel %vm366_vm10, %v2392_v3, %v2395_v54 }
0x1e37   :  { %3144 = vmatmul.msk.f32.vlgmr.msra.gmra.mxu2 %vm201_vm11, %v2397_v63  ;;  %3145 = vmatmul.msk.f32.vlgmr.msrb.gmra.mxu3 %vm201_vm11, %v2397_v63 }
0x1eba   :  { %v2418_v55 = vpop.f32.mrf.mxu2  ;;  %v2438_v1 = vpop.f32.mrf.mxu3 }
0x1ebb   :  { %v2453_v62 = vadd.f32 %v2447_v36, %v2418_v55  ;;  %v2454_v59 = vadd.f32 %v2451_v38, %v2438_v1  ;;  %v2606_v55 = vld [vmem:[#allocation4 + $0x19] ss:$0 sm:$0xff]  ;;  %v2603_v36 = vld [vmem:[#allocation4 + $0x6] ss:$0 sm:$0xff]  ;;  %v2605_v1 = vld [vmem:[#allocation4 + $0x9] ss:$0 sm:$0xff] }
0x1ebd   :  { %3384 = vtanh.f32 %v2453_v62  ;;  %v3146_v33 = vmul.f32 -1.442695, %v2453_v62  ;;  %v3147_v46 = vmul.f32 -1.442695, %v2454_v59  ;;  %v2609_v62 = vsel %vm251_vm1, %v2604_v57, %v2603_v36 }
0x1ebe   :  { %3386 = vtanh.f32 %v2454_v59 }
0x1ebf   :  { %3388 = vpow2.f32 %v3146_v33 }
0x1ec3   :  { %v3385_v7 = vpop.eup %3384 }
0x1ec4   :  { %v3387_v9 = vpop.eup %3386  ;;  %2496 = vrot.lane.b32.xlu2 %v3385_v7, %s3632_s3  ;;  %v2613_v7 = vsel %vm251_vm1, %v2606_v55, %v2605_v1 }
0x1ec5   :  { %2514 = vrot.lane.b32.xlu0 %v3387_v9, %s3632_s3  ;;  %v3389_v0 = vpop.eup %3388 }
0x1ec6   :  { %v2461_v10 = vadd.f32 1.0, %v3389_v0 }
0x1ec8   :  { %3390 = vrcp.f32 %v2461_v10  ;;  %v2474_v17 = vand.u32 2147483648, %v2461_v10  ;;  %vm2468_vm13 = vweird.f32 %v2461_v10  ;;  %v2472_v18 = vand.u32 2147483647, %v2461_v10 }
0x1ec9   :  { %3392 = vpow2.f32 %v3147_v46 }
0x1eca   :  { %v2475_v21 = vor.u32 1.1754944e-38, %v2474_v17  ;;  %vm2473_vm15 = vcmp.eq.f32.partialorder %v2472_v18, 8.507059e+37 }
0x1ece   :  { %v3391_v11 = vpop.eup %3390 }
0x1ecf   :  { %v2464_v20 = vmul.f32 %v3391_v11, %v2461_v10  ;;  %v3393_v60 = vpop.eup %3392  ;;  %vm2469_vm12 = vweird.f32 %v3391_v11 }
0x1ed0   :  { %v2462_v16 = vadd.f32 1.0, %v3393_v60  ;;  %vm2470_vm14 = vmor %vm2468_vm13, %vm2469_vm12 }
0x1ed1   :  { %v2465_v45 = vsub.f32 1.0, %v2464_v20 }
0x1ed2   :  { %3394 = vrcp.f32 %v2462_v16  ;;  %v2489_v31 = vand.u32 2147483648, %v2462_v16  ;;  %vm2483_vm4 = vweird.f32 %v2462_v16  ;;  %v2487_v34 = vand.u32 2147483647, %v2462_v16 }
0x1ed3   :  { %v2466_v14 = vmul.f32 %v3391_v11, %v2465_v45 }
0x1ed4   :  { %v2490_v37 = vor.u32 1.1754944e-38, %v2489_v31  ;;  %vm2488_vm6 = vcmp.eq.f32.partialorder %v2487_v34, 8.507059e+37 }
0x1ed5   :  { %v2467_v5 = vadd.f32 %v3391_v11, %v2466_v14 }
0x1ed7   :  { %v2471_v19 = vsel %vm2470_vm14, %v3391_v11, %v2467_v5 }
0x1ed8   :  { %v2476_v23 = vsel %vm2473_vm15, %v2475_v21, %v2471_v19  ;;  %v3395_v56 = vpop.eup %3394 }
0x1ed9   :  { %v2479_v15 = vmul.f32 %v3395_v56, %v2462_v16  ;;  %vm2484_vm3 = vweird.f32 %v3395_v56  ;;  %v2493_v22 = vmul.f32 %v2476_v23, %v4467_v42 }
0x1eda   :  { %vm2485_vm5 = vmor %vm2483_vm4, %vm2484_vm3 }
0x1edb   :  { %v2480_v26 = vsub.f32 1.0, %v2479_v15 }
0x1edd   :  { %v2481_v28 = vmul.f32 %v3395_v56, %v2480_v26 }
0x1edf   :  { %v2482_v30 = vadd.f32 %v3395_v56, %v2481_v28 }
0x1ee1   :  { %v2486_v35 = vsel %vm2485_vm5, %v3395_v56, %v2482_v30 }
0x1ee2   :  { %v2491_v2 = vsel %vm2488_vm6, %v2490_v37, %v2486_v35 }
0x1ee3   :  { %v2511_v43 = vmul.f32 %v2491_v2, %v4472_v49 }
0x1f1e   :  { %v2497_v12 = vpop.permute.xlu2 %2496 }
0x1f1f   :  { %v2499_v24 = vmul.f32 %v2497_v12, %v2476_v23 }
0x1f21   :  { %2501 = vrot.lane.b32.xlu1 %v2499_v24, %s3633_s29 }
0x1f37   :  { %v2515_v39 = vpop.permute.xlu0 %2514 }
0x1f38   :  { %v2517_v25 = vmul.f32 %v2515_v39, %v2491_v2 }
0x1f3a   :  { %2519 = vrot.lane.b32.xlu2 %v2517_v25, %s3633_s29 }
0x1f93   :  { %v2502_v44 = vpop.permute.xlu1 %2501 }
0x1f94   :  { %v2520_v47 = vpop.permute.xlu2 %2519  ;;  %v4495_v29 = vadd.f32 %v2502_v44, %v2493_v22 }
0x1f95   :  { %v4497_v48 = vadd.f32 %v2520_v47, %v2511_v43 }
0x1f96   :  { %3396 = vtanh.f32 %v4495_v29 }
0x1f97   :  { %3398 = vtanh.f32 %v4497_v48 }
0x1f9c   :  { %v3397_v4 = vpop.eup %3396 }
0x1f9d   :  { %v3399_v3 = vpop.eup %3398  ;;  %2507 = vrot.lane.b32.xlu0 %v3397_v4, %s3632_s3 }
0x1f9e   :  { %2525 = vrot.lane.b32.xlu1 %v3399_v3, %s3632_s3 }
0x200f   :  { %v2508_v54 = vpop.permute.xlu0 %2507 }
0x2010   :  { %v2526_v42 = vpop.permute.xlu1 %2525  ;;  %v4503_v63 = vmul.f32 %v2508_v54, %v2476_v23 }
0x2011   :  { %v4505_v49 = vmul.f32 %v2526_v42, %v2491_v2 }
0x2012   :  { %2553 = vrot.lane.b32.xlu2 %v4503_v63, %s3633_s29 }
0x2013   :  { %2556 = vrot.lane.b32.xlu0 %v4505_v49, %s3632_s3 }
0x206c   :  { %v2554_v58 = vpop.permute.xlu2 %2553 }
0x2085   :  { %v2557_v61 = vpop.permute.xlu0 %2556 }
0x2086   :  { %v2559_v6 = vsel %vm366_vm10, %v2554_v58, %v2557_v61 }
0x2087   :  { %3148 = vmatmul.msk.f32.vlgmr.msrb.gmra.mxu0 %vm201_vm11, %v2559_v6  ;;  %3149 = vmatmul.msk.f32.vlgmr.msra.gmra.mxu1 %vm201_vm11, %v2559_v6 }
0x2104   :  { %v2580_v38 = vpop.f32.mrf.mxu0  ;;  %v2600_v59 = vpop.f32.mrf.mxu1 }
0x2105   :  { %v2615_v9 = vadd.f32 %v2609_v62, %v2580_v38  ;;  %v2616_v33 = vadd.f32 %v2613_v7, %v2600_v59  ;;  %v2766_v62 = vld [vmem:[#allocation4 + $0x17] ss:$0 sm:$0xff]  ;;  %v2768_v59 = vld [vmem:[#allocation4 + $0x18] ss:$0 sm:$0xff]  ;;  %v2765_v7 = vld [vmem:[#allocation4 + $0x7] ss:$0 sm:$0xff] }
0x2107   :  { %3400 = vtanh.f32 %v2615_v9  ;;  %v3151_v11 = vmul.f32 -1.442695, %v2616_v33  ;;  %v3150_v14 = vmul.f32 -1.442695, %v2615_v9  ;;  %v2767_v9 = vld [vmem:[#allocation4 + $0x8] ss:$0 sm:$0xff] }
0x2108   :  { %3402 = vtanh.f32 %v2616_v33 }
0x2109   :  { %3404 = vpow2.f32 %v3151_v11  ;;  %v2775_v11 = vsel %vm251_vm1, %v2768_v59, %v2767_v9  ;;  %v2057_v59 = vperm.slane %v4408_v50, 0  ;;  %v1895_v9 = vperm.slane %v4365_v41, 0 }
0x210d   :  { %v3401_v0 = vpop.eup %3400 }
0x210e   :  { %v3403_v10 = vpop.eup %3402  ;;  %2658 = vrot.lane.b32.xlu1 %v3401_v0, %s3632_s3  ;;  %v2771_v0 = vsel %vm251_vm1, %v2766_v62, %v2765_v7  ;;  %v1721_v62 = vperm.slane %v4320_v27, 0 }
0x210f   :  { %2676 = vrot.lane.b32.xlu2 %v3403_v10, %s3632_s3  ;;  %v3405_v46 = vpop.eup %3404 }
0x2110   :  { %v2624_v20 = vadd.f32 1.0, %v3405_v46 }
0x2112   :  { %3406 = vrcp.f32 %v2624_v20  ;;  %v2651_v21 = vand.u32 2147483648, %v2624_v20  ;;  %vm2645_vm8 = vweird.f32 %v2624_v20  ;;  %v2649_v12 = vand.u32 2147483647, %v2624_v20 }
0x2113   :  { %3408 = vpow2.f32 %v3150_v14 }
0x2114   :  { %v2652_v24 = vor.u32 1.1754944e-38, %v2651_v21  ;;  %vm2650_vm12 = vcmp.eq.f32.partialorder %v2649_v12, 8.507059e+37 }
0x2118   :  { %v3407_v45 = vpop.eup %3406 }
0x2119   :  { %v2641_v60 = vmul.f32 %v3407_v45, %v2624_v20  ;;  %v3409_v5 = vpop.eup %3408  ;;  %vm2646_vm7 = vweird.f32 %v3407_v45 }
0x211a   :  { %v2623_v18 = vadd.f32 1.0, %v3409_v5  ;;  %vm2647_vm9 = vmor %vm2645_vm8, %vm2646_vm7  ;;  %v2219_v5 = vperm.slane %v4451_v32, 0 }
0x211b   :  { %v2642_v16 = vsub.f32 1.0, %v2641_v60  ;;  %v1733_v60 = vperm.slane %v4322_v13, 0 }
0x211c   :  { %3410 = vrcp.f32 %v2623_v18  ;;  %v2636_v37 = vand.u32 2147483648, %v2623_v18  ;;  %vm2630_vm14 = vweird.f32 %v2623_v18  ;;  %v2634_v39 = vand.u32 2147483647, %v2623_v18 }
0x211d   :  { %v2643_v17 = vmul.f32 %v3407_v45, %v2642_v16  ;;  %v2045_v16 = vperm.slane %v4406_v52, 0 }
0x211e   :  { %v2637_v25 = vor.u32 1.1754944e-38, %v2636_v37  ;;  %vm2635_vm3 = vcmp.eq.f32.partialorder %v2634_v39, 8.507059e+37 }
0x211f   :  { %v2644_v19 = vadd.f32 %v3407_v45, %v2643_v17  ;;  %v2531_v17 = vperm.slane %v4503_v63, 0 }
0x2121   :  { %v2648_v23 = vsel %vm2647_vm9, %v3407_v45, %v2644_v19 }
0x2122   :  { %v2653_v15 = vsel %vm2650_vm12, %v2652_v24, %v2648_v23  ;;  %v3411_v26 = vpop.eup %3410 }
0x2123   :  { %v2626_v30 = vmul.f32 %v3411_v26, %v2623_v18  ;;  %vm2631_vm13 = vweird.f32 %v3411_v26  ;;  %v2673_v47 = vmul.f32 %v2653_v15, %v4497_v48 }
0x2124   :  { %vm2632_vm15 = vmor %vm2630_vm14, %vm2631_vm13 }
0x2125   :  { %v2627_v31 = vsub.f32 1.0, %v2626_v30 }
0x2127   :  { %v2628_v34 = vmul.f32 %v3411_v26, %v2627_v31 }
0x2129   :  { %v2629_v35 = vadd.f32 %v3411_v26, %v2628_v34 }
0x212b   :  { %v2633_v2 = vsel %vm2632_vm15, %v3411_v26, %v2629_v35 }
0x212c   :  { %v2638_v43 = vsel %vm2635_vm3, %v2637_v25, %v2633_v2 }
0x212d   :  { %v2655_v42 = vmul.f32 %v2638_v43, %v4495_v29 }
0x2169   :  { %v2677_v56 = vpop.permute.xlu2 %2676 }
0x216a   :  { %v2679_v28 = vmul.f32 %v2677_v56, %v2653_v15 }
0x216c   :  { %2681 = vrot.lane.b32.xlu1 %v2679_v28, %s3633_s29 }
0x2180   :  { %v2659_v22 = vpop.permute.xlu1 %2658 }
0x2181   :  { %v2661_v44 = vmul.f32 %v2659_v22, %v2638_v43 }
0x2183   :  { %2663 = vrot.lane.b32.xlu0 %v2661_v44, %s3633_s29 }
0x21de   :  { %v2682_v4 = vpop.permute.xlu1 %2681 }
0x21df   :  { %v4521_v3 = vadd.f32 %v2682_v4, %v2673_v47 }
0x21e1   :  { %3412 = vtanh.f32 %v4521_v3 }
0x21e7   :  { %v3413_v54 = vpop.eup %3412 }
0x21e8   :  { %2687 = vrot.lane.b32.xlu0 %v3413_v54, %s3632_s3 }
0x21f5   :  { %v2664_v58 = vpop.permute.xlu0 %2663 }
0x21f6   :  { %v4526_v61 = vadd.f32 %v2664_v58, %v2655_v42 }
0x21f8   :  { %3414 = vtanh.f32 %v4526_v61 }
0x21fe   :  { %v3415_v6 = vpop.eup %3414 }
0x21ff   :  { %2669 = vrot.lane.b32.xlu2 %v3415_v6, %s3632_s3 }
0x2259   :  { %v2670_v57 = vpop.permute.xlu2 %2669 }
0x225a   :  { %v2688_v48 = vpop.permute.xlu0 %2687  ;;  %v4530_v55 = vmul.f32 %v2670_v57, %v2638_v43 }
0x225b   :  { %v4532_v36 = vmul.f32 %v2688_v48, %v2653_v15 }
0x225c   :  { %2715 = vrot.lane.b32.xlu1 %v4530_v55, %s3633_s29 }
0x225d   :  { %2718 = vrot.lane.b32.xlu2 %v4532_v36, %s3632_s3 }
0x22b7   :  { %v2719_v29 = vpop.permute.xlu2 %2718 }
0x22ce   :  { %v2716_v1 = vpop.permute.xlu1 %2715 }
0x22cf   :  { %v2721_v38 = vsel %vm366_vm10, %v2716_v1, %v2719_v29  ;;  %v1883_v1 = vperm.slane %v4363_v40, 0 }
0x22d0   :  { %3152 = vmatmul.msk.f32.vlgmr.msrb.gmra.mxu2 %vm201_vm11, %v2721_v38  ;;  %3153 = vmatmul.msk.f32.vlgmr.msra.gmra.mxu3 %vm201_vm11, %v2721_v38 }
0x2353   :  { %v2742_v33 = vpop.f32.mrf.mxu2  ;;  %v2762_v10 = vpop.f32.mrf.mxu3 }
0x2354   :  { %v2777_v46 = vadd.f32 %v2771_v0, %v2742_v33  ;;  %v2778_v20 = vadd.f32 %v2775_v11, %v2762_v10  ;;  %v2369_v33 = vperm.slane %v4476_v8, 0  ;;  %v2207_v10 = vperm.slane %v4449_v51, 0 }
0x2355   :  { %v2381_v11 = vperm.slane %v4478_v53, 0 }
0x2356   :  { %3416 = vtanh.f32 %v2777_v46  ;;  %v3154_v18 = vmul.f32 -1.442695, %v2777_v46  ;;  %v3155_v19 = vmul.f32 -1.442695, %v2778_v20  ;;  %v2693_v46 = vperm.slane %v4530_v55, 0 }
0x2357   :  { %3418 = vtanh.f32 %v2778_v20  ;;  %v1882_v20 = vrot.slane %v4363_v40, 1 }
0x2358   :  { %3420 = vpow2.f32 %v3154_v18 }
0x2359   :  { %3422 = vpow2.f32 %v3155_v19 }
0x235c   :  { %v3417_v45 = vpop.eup %3416 }
0x235d   :  { %v3419_v14 = vpop.eup %3418  ;;  %2820 = vrot.lane.b32.xlu0 %v3417_v45, %s3632_s3  ;;  %v1884_v45 = vperm.slane %v1882_v20, 0 }
0x235e   :  { %2838 = vrot.lane.b32.xlu1 %v3419_v14, %s3632_s3  ;;  %v3421_v21 = vpop.eup %3420  ;;  %v2056_v14 = vrot.slane %v4408_v50, 1 }
0x235f   :  { %v3423_v12 = vpop.eup %3422  ;;  %v2785_v23 = vadd.f32 1.0, %v3421_v21 }
0x2360   :  { %v2786_v24 = vadd.f32 1.0, %v3423_v12 }
0x2361   :  { %3424 = vrcp.f32 %v2785_v23  ;;  %v2798_v2 = vand.u32 2147483648, %v2785_v23  ;;  %vm2792_vm5 = vweird.f32 %v2785_v23  ;;  %v2796_v22 = vand.u32 2147483647, %v2785_v23 }
0x2362   :  { %3426 = vrcp.f32 %v2786_v24  ;;  %v2813_v25 = vand.u32 2147483648, %v2786_v24  ;;  %vm2807_vm6 = vweird.f32 %v2786_v24  ;;  %v2811_v43 = vand.u32 2147483647, %v2786_v24 }
0x2363   :  { %v2799_v4 = vor.u32 1.1754944e-38, %v2798_v2  ;;  %vm2797_vm9 = vcmp.eq.f32.partialorder %v2796_v22, 8.507059e+37 }
0x2364   :  { %v2814_v54 = vor.u32 1.1754944e-38, %v2813_v25  ;;  %vm2812_vm12 = vcmp.eq.f32.partialorder %v2811_v43, 8.507059e+37  ;;  %v1732_v25 = vrot.slane %v4322_v13, 1  ;;  %v2218_v13 = vrot.slane %v4451_v32, 1 }
0x2366   :  { %1735 = vrot.lane.b32.xlu1 %v1733_v60, %s3632_s3  ;;  %v2058_v60 = vperm.slane %v2056_v14, 0  ;;  %v1734_v43 = vperm.slane %v1732_v25, 0 }
0x2367   :  { %v3425_v56 = vpop.eup %3424 }
0x2368   :  { %v3427_v15 = vpop.eup %3426  ;;  %v2788_v26 = vmul.f32 %v3425_v56, %v2785_v23  ;;  %vm2793_vm10 = vweird.f32 %v3425_v56 }
0x2369   :  { %v2803_v28 = vmul.f32 %v3427_v15, %v2786_v24  ;;  %vm2808_vm4 = vweird.f32 %v3427_v15  ;;  %vm2794_vm7 = vmor %vm2792_vm5, %vm2793_vm10  ;;  %vm3046_vm5 = vcmask 9216  }
0x236a   :  { %v2789_v30 = vsub.f32 1.0, %v2788_v26  ;;  %vm2809_vm8 = vmor %vm2807_vm6, %vm2808_vm4 }
0x236b   :  { %v2804_v31 = vsub.f32 1.0, %v2803_v28 }
0x236c   :  { %v2790_v34 = vmul.f32 %v3425_v56, %v2789_v30 }
0x236d   :  { %v2805_v35 = vmul.f32 %v3427_v15, %v2804_v31  ;;  %v1894_v31 = vrot.slane %v4365_v41, 1  ;;  %v2380_v41 = vrot.slane %v4478_v53, 1  ;;  %v2220_v53 = vperm.slane %v2218_v13, 0  ;;  %v3007_v13 = vld [vmem:[%s4734_s9 + $0x38] sm:$0xff] }
0x236e   :  { %2047 = vrot.lane.b32.xlu1 %v2045_v16, %s3633_s29  ;;  %v2791_v37 = vadd.f32 %v3425_v56, %v2790_v34  ;;  %v2368_v16 = vrot.slane %v4476_v8, 1  ;;  %v2705_v8 = vperm.slane %v4532_v36, 0  ;;  %3025 = vmatpush.msrb.mxu1 %v3007_v13 }
0x236f   :  { %v2806_v39 = vadd.f32 %v3427_v15, %v2805_v35  ;;  %v1896_v34 = vperm.slane %v1894_v31, 0  ;;  %v2382_v22 = vperm.slane %v2380_v41, 0 }
0x2370   :  { %v2795_v44 = vsel %vm2794_vm7, %v3425_v56, %v2791_v37 }
0x2371   :  { %v2810_v47 = vsel %vm2809_vm8, %v3427_v15, %v2806_v39  ;;  %v4553_v58 = vsel %vm2797_vm9, %v2799_v4, %v2795_v44  ;;  %v2543_v39 = vperm.slane %v4505_v49, 0 }
0x2372   :  { %v4555_v57 = vsel %vm2812_vm12, %v2814_v54, %v2810_v47  ;;  %v2817_v40 = vmul.f32 %v4553_v58, %v4526_v61  ;;  %v1720_v61 = vrot.slane %v4320_v27, 1  ;;  %v2206_v27 = vrot.slane %v4449_v51, 1 }
0x2373   :  { %v2835_v15 = vmul.f32 %v4555_v57, %v4521_v3  ;;  %v2692_v51 = vrot.slane %v4530_v55, 1  ;;  %v2530_v55 = vrot.slane %v4503_v63, 1 }
0x2374   :  { %v1722_v56 = vperm.slane %v1720_v61, 0  ;;  %v2208_v3 = vperm.slane %v2206_v27, 0 }
0x2375   :  { %v2694_v47 = vperm.slane %v2692_v51, 0 }
0x2376   :  { %2221 = vrot.lane.b32.xlu1 %v2219_v5, %s3632_s3  ;;  %v2370_v5 = vperm.slane %v2368_v16, 0 }
0x237e   :  { %2533 = vrot.lane.b32.xlu1 %v2531_v17, %s3633_s29  ;;  %v2542_v17 = vrot.slane %v4505_v49, 1  ;;  %v2044_v49 = vrot.slane %v4406_v52, 1  ;;  %v2532_v52 = vperm.slane %v2530_v55, 0 }
0x2380   :  { %v2544_v18 = vperm.slane %v2542_v17, 0  ;;  %v2046_v4 = vperm.slane %v2044_v49, 0 }
0x23cf   :  { %v2821_v42 = vpop.permute.xlu0 %2820 }
0x23d0   :  { %v2839_v6 = vpop.permute.xlu1 %2838  ;;  %v2823_v48 = vmul.f32 %v2821_v42, %v4553_v58 }
0x23d1   :  { %v2841_v29 = vmul.f32 %v2839_v6, %v4555_v57 }
0x23d2   :  { %2825 = vrot.lane.b32.xlu2 %v2823_v48, %s3633_s29 }
0x23d3   :  { %2843 = vrot.lane.b32.xlu0 %v2841_v29, %s3633_s29 }
0x23d8   :  { %v1736_v38 = vpop.permute.xlu1 %1735 }
0x23d9   :  { %1741 = vst.msk [vmem:[#allocation3 + $0x7] sm:$0x1] %vm357_vm0, %v1736_v38 }
0x23da   :  { %1885 = vrot.lane.b32.xlu2 %v1883_v1, %s3633_s29 }
0x23db   :  { %1723 = vrot.lane.b32.xlu0 %v1721_v62, %s3633_s29 }
0x23e0   :  { %v2048_v7 = vpop.permute.xlu1 %2047 }
0x23e1   :  { %2053 = vst.msk [vmem:[#allocation3 + $0x2] sm:$0x1] %vm344_vm2, %v2048_v7 }
0x23e2   :  { %2059 = vrot.lane.b32.xlu2 %v2057_v59, %s3632_s3 }
0x23e3   :  { %1897 = vrot.lane.b32.xlu0 %v1895_v9, %s3632_s3  ;;  %v2704_v9 = vrot.slane %v4532_v36, 1 }
0x23e8   :  { %v2222_v0 = vpop.permute.xlu1 %2221 }
0x23e9   :  { %2227 = vst.msk [vmem:[#allocation3 + $0x4] sm:$0x1] %vm357_vm0, %v2222_v0 }
0x23ea   :  { %2371 = vrot.lane.b32.xlu2 %v2369_v33, %s3633_s29 }
0x23eb   :  { %2209 = vrot.lane.b32.xlu0 %v2207_v10, %s3633_s29 }
0x23f0   :  { %v2534_v24 = vpop.permute.xlu1 %2533 }
0x23f3   :  { %2383 = vrot.lane.b32.xlu0 %v2381_v11, %s3632_s3 }
0x23fb   :  { %2695 = vrot.lane.b32.xlu0 %v2693_v46, %s3633_s29 }
0x2403   :  { %1887 = vrot.lane.b32.xlu0 %v1884_v45, %s3633_s29 }
0x240b   :  { %2061 = vrot.lane.b32.xlu0 %v2058_v60, %s3632_s3 }
0x2413   :  { %2373 = vrot.lane.b32.xlu0 %v2370_v5, %s3633_s29 }
0x241b   :  { %2547 = vrot.lane.b32.xlu0 %v2544_v18, %s3632_s3 }
0x242c   :  { %v2826_v19 = vpop.permute.xlu2 %2825 }
0x242d   :  { %v2828_v21 = vadd.f32 %v2826_v19, %v2817_v40  ;;  %v2886_v40 = vld [vmem:[%s4732_s7 + $0x38] sm:$0xff]  ;;  %v2885_v19 = vld [vmem:[%s4732_s7 + $0x30] sm:$0xff] }
0x242e   :  { %2905 = vmatpush.msra.mxu0 %v2886_v40 }
0x242f   :  { %3428 = vtanh.f32 %v2828_v21  ;;  %v2884_v21 = vld [vmem:[%s4732_s7 + $0x28] sm:$0xff] }
0x2430   :  { %2906 = vmatpush.msra.mxu0 %v2885_v19 }
0x2432   :  { %2907 = vmatpush.msra.mxu0 %v2884_v21 }
0x2434   :  { %v1886_v50 = vpop.permute.xlu2 %1885 }
0x2435   :  { %v3429_v12 = vpop.eup %3428  ;;  %1891 = vst.msk [vmem:[#allocation3 + $0x1] sm:$0x1] %vm344_vm2, %v1886_v50  ;;  %v2883_v50 = vld [vmem:[%s4732_s7 + $0x20] sm:$0xff] }
0x2436   :  { %2831 = vrot.lane.b32.xlu1 %v3429_v12, %s3632_s3  ;;  %2908 = vmatpush.msra.mxu0 %v2883_v50  ;;  %v2882_v12 = vld [vmem:[%s4732_s7 + $0x18] sm:$0xff] }
0x2438   :  { %2909 = vmatpush.msra.mxu0 %v2882_v12 }
0x243c   :  { %v2060_v23 = vpop.permute.xlu2 %2059 }
0x243d   :  { %2065 = vst.msk [vmem:[#allocation3 + $0x5] sm:$0x1] %vm357_vm0, %v2060_v23  ;;  %v2880_v23 = vld [vmem:[%s4732_s7 + $0x8] sm:$0xff] }
0x243e   :  { %2539 = vst.msk [vmem:[#allocation3 + $0x5] sm:$0x1] %vm344_vm2, %v2534_v24  ;;  %2707 = vrot.lane.b32.xlu1 %v2705_v8, %s3632_s3  ;;  %v2881_v8 = vld [vmem:[%s4732_s7 + $0x10] sm:$0xff]  ;;  %v2879_v24 = vld [vmem:[%s4732_s7] sm:$0xff]  ;;  %s3071_s7 = sshll.u32 %s4737_s12, 4  ;;  %s3072_s7 = int_to_ptr.hbm [resolvable:$true] %s3071_s7 }
0x243f   :  { %2910 = vmatpush.msra.mxu0 %v2881_v8 }
0x2441   :  { %2911 = vmatpush.msra.mxu0 %v2880_v23 }
0x2443   :  { %2912 = vmatpush.msra.mxu0 %v2879_v24 }
0x2444   :  { %v2372_v26 = vpop.permute.xlu2 %2371 }
0x2445   :  { %v2844_v28 = vpop.permute.xlu0 %2843  ;;  %2377 = vst.msk [vmem:[#allocation3 + $0x4] sm:$0x1] %vm344_vm2, %v2372_v26 }
0x2446   :  { %v2846_v30 = vadd.f32 %v2844_v28, %v2835_v15  ;;  %1725 = vrot.lane.b32.xlu1 %v1722_v56, %s3633_s29 }
0x2448   :  { %3430 = vtanh.f32 %v2846_v30 }
0x244d   :  { %v1724_v35 = vpop.permute.xlu0 %1723 }
0x244e   :  { %v3431_v37 = vpop.eup %3430  ;;  %1729 = vst.msk [vmem:[#allocation3] sm:$0x1] %vm344_vm2, %v1724_v35  ;;  %1899 = vrot.lane.b32.xlu1 %v1896_v34, %s3632_s3  ;;  %v3174_v34 = vld [vmem:[%s4733_s8] ss:$0 sm:$0xff] }
0x244f   :  { %2849 = vrot.lane.b32.xlu2 %v3431_v37, %s3632_s3 }
0x2455   :  { %v1898_v2 = vpop.permute.xlu0 %1897 }
0x2456   :  { %1903 = vst.msk [vmem:[#allocation3 + $0x6] sm:$0x1] %vm357_vm0, %v1898_v2  ;;  %2211 = vrot.lane.b32.xlu1 %v2208_v3, %s3633_s29 }
0x2457   :  { %2545 = vrot.lane.b32.xlu2 %v2543_v39, %s3632_s3 }
0x245d   :  { %v2210_v44 = vpop.permute.xlu0 %2209 }
0x245e   :  { %2215 = vst.msk [vmem:[#allocation3 + $0x3] sm:$0x1] %vm344_vm2, %v2210_v44  ;;  %2385 = vrot.lane.b32.xlu1 %v2382_v22, %s3632_s3 }
0x245f   :  { %1737 = vrot.lane.b32.xlu2 %v1734_v43, %s3632_s3 }
0x2465   :  { %v2384_v54 = vpop.permute.xlu0 %2383 }
0x2466   :  { %2389 = vst.msk [vmem:[#allocation3 + $0x3] sm:$0x1] %vm357_vm0, %v2384_v54  ;;  %2697 = vrot.lane.b32.xlu1 %v2694_v47, %s3633_s29 }
0x2467   :  { %2049 = vrot.lane.b32.xlu2 %v2046_v4, %s3633_s29 }
0x246d   :  { %v2696_v42 = vpop.permute.xlu0 %2695 }
0x246e   :  { %2701 = vst.msk [vmem:[#allocation3 + $0x6] sm:$0x1] %vm344_vm2, %v2696_v42 }
0x246f   :  { %2223 = vrot.lane.b32.xlu2 %v2220_v53, %s3632_s3  ;;  %v3006_v53 = vld [vmem:[%s4734_s9 + $0x30] sm:$0xff] }
0x2470   :  { %3026 = vmatpush.msrb.mxu1 %v3006_v53 }
0x2475   :  { %v1888_v6 = vpop.permute.xlu0 %1887 }
0x2476   :  { %1892 = vst.msk [vmem:[#allocation3 + $0x9] sm:$0x1] %vm344_vm2, %v1888_v6 }
0x2477   :  { %2535 = vrot.lane.b32.xlu2 %v2532_v52, %s3633_s29  ;;  %v3005_v52 = vld [vmem:[%s4734_s9 + $0x28] sm:$0xff] }
0x2478   :  { %3027 = vmatpush.msrb.mxu1 %v3005_v52 }
0x247d   :  { %v2062_v48 = vpop.permute.xlu0 %2061 }
0x247e   :  { %2066 = vst.msk [vmem:[#allocation3 + $0xd] sm:$0x1] %vm357_vm0, %v2062_v48  ;;  %v3004_v48 = vld [vmem:[%s4734_s9 + $0x20] sm:$0xff] }
0x247f   :  { %3028 = vmatpush.msrb.mxu1 %v3004_v48 }
0x2485   :  { %v2374_v11 = vpop.permute.xlu0 %2373 }
0x248d   :  { %v2548_v14 = vpop.permute.xlu0 %2547 }
0x24a8   :  { %v2832_v29 = vpop.permute.xlu1 %2831 }
0x24a9   :  { %v2850_v1 = vpop.permute.xlu2 %2849  ;;  %v2834_v32 = vmul.f32 %v2832_v29, %v4553_v58  ;;  %v2706_v58 = vperm.slane %v2704_v9, 0 }
0x24aa   :  { %v2852_v38 = vmul.f32 %v2850_v1, %v4555_v57  ;;  %v3003_v1 = vld [vmem:[%s4734_s9 + $0x18] sm:$0xff] }
0x24ab   :  { %v2855_v62 = vperm.slane %v2834_v32, 0  ;;  %v2854_v33 = vrot.slane %v2834_v32, 1  ;;  %3029 = vmatpush.msrb.mxu1 %v3003_v1 }
0x24ac   :  { %v2866_v59 = vrot.slane %v2852_v38, 1  ;;  %v2867_v7 = vperm.slane %v2852_v38, 0  ;;  %v3002_v38 = vld [vmem:[%s4734_s9 + $0x10] sm:$0xff] }
0x24ad   :  { %2857 = vrot.lane.b32.xlu2 %v2855_v62, %s3633_s29  ;;  %v2856_v57 = vperm.slane %v2854_v33, 0  ;;  %3030 = vmatpush.msrb.mxu1 %v3002_v38  ;;  %v3000_v33 = vld [vmem:[%s4734_s9] sm:$0xff] }
0x24ae   :  { %v2868_v63 = vperm.slane %v2866_v59, 0  ;;  %2869 = vrot.lane.b32.xlu0 %v2867_v7, %s3632_s3  ;;  %v3001_v7 = vld [vmem:[%s4734_s9 + $0x8] sm:$0xff] }
0x24af   :  { %3031 = vmatpush.msrb.mxu1 %v3001_v7 }
0x24b0   :  { %2871 = vrot.lane.b32.xlu1 %v2868_v63, %s3632_s3  ;;  %v2708_v0 = vpop.permute.xlu1 %2707 }
0x24b1   :  { %v2546_v10 = vpop.permute.xlu2 %2545  ;;  %2713 = vst.msk [vmem:[#allocation3 + $0x1] sm:$0x1] %vm357_vm0, %v2708_v0  ;;  %3032 = vmatpush.msrb.mxu1 %v3000_v33 }
0x24b2   :  { %2551 = vst.msk [vmem:[#allocation3 + $0x2] sm:$0x1] %vm357_vm0, %v2546_v10 }
0x24b5   :  { %2709 = vrot.lane.b32.xlu2 %v2706_v58, %s3632_s3 }
0x24b6   :  { %2859 = vrot.lane.b32.xlu0 %v2856_v57, %s3633_s29 }
0x24b8   :  { %v1726_v46 = vpop.permute.xlu1 %1725 }
0x24b9   :  { %v1738_v20 = vpop.permute.xlu2 %1737  ;;  %1730 = vst.msk [vmem:[#allocation3 + $0x8] sm:$0x1] %vm344_vm2, %v1726_v46 }
0x24ba   :  { %1742 = vst.msk [vmem:[#allocation3 + $0xf] sm:$0x1] %vm357_vm0, %v1738_v20 }
0x24c0   :  { %v1900_v36 = vpop.permute.xlu1 %1899 }
0x24c1   :  { %v2050_v45 = vpop.permute.xlu2 %2049  ;;  %1904 = vst.msk [vmem:[#allocation3 + $0xe] sm:$0x1] %vm357_vm0, %v1900_v36 }
0x24c2   :  { %2054 = vst.msk [vmem:[#allocation3 + $0xa] sm:$0x1] %vm344_vm2, %v2050_v45 }
0x24c3   :  { %2552 = vst.msk [vmem:[#allocation3 + $0xa] sm:$0x1] %vm357_vm0, %v2548_v14 }
0x24c8   :  { %v2212_v60 = vpop.permute.xlu1 %2211 }
0x24c9   :  { %v2224_v16 = vpop.permute.xlu2 %2223  ;;  %2216 = vst.msk [vmem:[#allocation3 + $0xb] sm:$0x1] %vm344_vm2, %v2212_v60 }
0x24ca   :  { %2228 = vst.msk [vmem:[#allocation3 + $0xc] sm:$0x1] %vm357_vm0, %v2224_v16 }
0x24cb   :  { %2378 = vst.msk [vmem:[#allocation3 + $0xc] sm:$0x1] %vm344_vm2, %v2374_v11 }
0x24d0   :  { %v2386_v5 = vpop.permute.xlu1 %2385 }
0x24d1   :  { %v2536_v17 = vpop.permute.xlu2 %2535  ;;  %2390 = vst.msk [vmem:[#allocation3 + $0xb] sm:$0x1] %vm357_vm0, %v2386_v5 }
0x24d2   :  { %2540 = vst.msk [vmem:[#allocation3 + $0xd] sm:$0x1] %vm344_vm2, %v2536_v17 }
0x24d8   :  { %v2698_v18 = vpop.permute.xlu1 %2697 }
0x24d9   :  { %2702 = vst.msk [vmem:[#allocation3 + $0xe] sm:$0x1] %vm344_vm2, %v2698_v18 }
0x2507   :  { %v2858_v61 = vpop.permute.xlu2 %2857 }
0x2508   :  { %2863 = vst.msk [vmem:[#allocation3 + $0x7] sm:$0x1] %vm344_vm2, %v2858_v61 }
0x250f   :  { %v2710_v56 = vpop.permute.xlu2 %2709 }
0x2510   :  { %2714 = vst.msk [vmem:[#allocation3 + $0x9] sm:$0x1] %vm357_vm0, %v2710_v56 }
0x2520   :  { %v2870_v15 = vpop.permute.xlu0 %2869 }
0x2521   :  { %2875 = vst.msk [vmem:[#allocation3] sm:$0x1] %vm357_vm0, %v2870_v15 }
0x2522   :  { %v2872_v26 = vpop.permute.xlu1 %2871 }
0x2523   :  { %2876 = vst.msk [vmem:[#allocation3 + $0x8] sm:$0x1] %vm357_vm0, %v2872_v26 }
0x2528   :  { %v2860_v28 = vpop.permute.xlu0 %2859  ;;  %v2877_v30 = vld [vmem:[#allocation3] sm:$0xff] }
0x2529   :  { %2864 = vst.msk [vmem:[#allocation3 + $0xf] sm:$0x1] %vm344_vm2, %v2860_v28  ;;  %3156 = vmatmul.msk.f32.vlgmr.msra.gmra.mxu0 %vm201_vm11, %v2877_v30 }
0x2530   :  { %v2878_v31 = vld [vmem:[#allocation3 + $0x8] sm:$0xff] }
0x2531   :  { %3157 = vmatmul.msk.f32.gmra.mxu0 %vm201_vm11, %v2878_v31 }
0x25a6   :  { %v2914_v35 = vpop.f32.mrf.mxu0 }
0x25a7   :  { %v2915_v37 = vadd.f32 %v3174_v34, %v2914_v35 }
0x25a9   :  { %v2920_v27 = vsel %vm201_vm11, %v2915_v37, -inf }
0x25aa   :  { %v2921_v3 = vrot.slane %v2920_v27, 4 }
0x25ac   :  { %v2922_v39 = vmax.f32 %v2920_v27, %v2921_v3 }
0x25ae   :  { %v2923_v2 = vrot.slane %v2922_v39, 2  ;;  %v2917_v41 = vpop.f32.mrf.mxu0 }
0x25af   :  { %v2918_v25 = vadd.f32 %v3174_v34, %v2917_v41 }
0x25b0   :  { %v2924_v22 = vmax.f32 %v2922_v39, %v2923_v2 }
0x25b1   :  { %v2927_v43 = vsel %vm201_vm11, %v2918_v25, -inf }
0x25b2   :  { %v2925_v44 = vrot.slane %v2924_v22, 1  ;;  %v2928_v51 = vrot.slane %v2927_v43, 4 }
0x25b4   :  { %v2926_v49 = vmax.f32 %v2924_v22, %v2925_v44  ;;  %v2929_v47 = vmax.f32 %v2927_v43, %v2928_v51 }
0x25b6   :  { %v2934_v4 = vsub.f32 %v2915_v37, %v2926_v49  ;;  %v2930_v54 = vrot.slane %v2929_v47, 2 }
0x25b8   :  { %v2936_v42 = vmul.f32 1.442695, %v2934_v4  ;;  %v2931_v55 = vmax.f32 %v2929_v47, %v2930_v54 }
0x25ba   :  { %3432 = vpow2.f32 %v2936_v42  ;;  %v2932_v6 = vrot.slane %v2931_v55, 1 }
0x25bc   :  { %v2933_v29 = vmax.f32 %v2931_v55, %v2932_v6  ;;  %v3175_v6 = vld [vmem:[%s4735_s10] ss:$0 sm:$0xff]  ;;  %s3635_s10 = smov 126  }
0x25be   :  { %v2935_v32 = vsub.f32 %v2918_v25, %v2933_v29 }
0x25c0   :  { %v3433_v62 = vpop.eup %3432  ;;  %v2938_v59 = vmul.f32 1.442695, %v2935_v32 }
0x25c1   :  { %v2956_v63 = vsel %vm201_vm11, %v3433_v62, 0.0  ;;  %v2940_v11 = vmul.f32 %v3433_v62, %v2877_v30 }
0x25c2   :  { %v2957_v9 = vrot.slane %v2956_v63, 4  ;;  %3434 = vpow2.f32 %v2938_v59 }
0x25c3   :  { %v2942_v16 = vsel %vm201_vm11, %v2940_v11, 0.0 }
0x25c4   :  { %v2958_v0 = vadd.f32 %v2957_v9, %v2956_v63  ;;  %v2943_v18 = vrot.slane %v2942_v16, 4 }
0x25c6   :  { %v2959_v10 = vrot.slane %v2958_v0, 2  ;;  %v2944_v12 = vadd.f32 %v2943_v18, %v2942_v16 }
0x25c8   :  { %v3435_v58 = vpop.eup %3434  ;;  %v2960_v57 = vadd.f32 %v2959_v10, %v2958_v0  ;;  %v2945_v56 = vrot.slane %v2944_v12, 2 }
0x25c9   :  { %v2941_v46 = vmul.f32 %v3435_v58, %v2878_v31  ;;  %v2963_v20 = vsel %vm201_vm11, %v3435_v58, 0.0 }
0x25ca   :  { %v2961_v36 = vrot.slane %v2960_v57, 1  ;;  %v2964_v45 = vrot.slane %v2963_v20, 4  ;;  %v2946_v30 = vadd.f32 %v2945_v56, %v2944_v12 }
0x25cb   :  { %v2949_v5 = vsel %vm201_vm11, %v2941_v46, 0.0 }
0x25cc   :  { %v2962_v14 = vadd.f32 %v2961_v36, %v2960_v57  ;;  %v2965_v60 = vadd.f32 %v2964_v45, %v2963_v20  ;;  %v2950_v40 = vrot.slane %v2949_v5, 4  ;;  %v2947_v39 = vrot.slane %v2946_v30, 1 }
0x25ce   :  { %3436 = vrcp.f32 %v2962_v14  ;;  %v2966_v17 = vrot.slane %v2965_v60, 2  ;;  %v2951_v8 = vadd.f32 %v2950_v40, %v2949_v5  ;;  %v2981_v37 = vand.u32 2147483648, %v2962_v14 }
0x25cf   :  { %vm2975_vm2 = vweird.f32 %v2962_v14  ;;  %v2979_v27 = vand.u32 2147483647, %v2962_v14  ;;  %v2948_v4 = vadd.f32 %v2947_v39, %v2946_v30 }
0x25d0   :  { %v2967_v19 = vadd.f32 %v2966_v17, %v2965_v60  ;;  %v2952_v15 = vrot.slane %v2951_v8, 2  ;;  %v2982_v44 = vor.u32 1.1754944e-38, %v2981_v37 }
0x25d1   :  { %vm2980_vm15 = vcmp.eq.f32.partialorder %v2979_v27, 8.507059e+37 }
0x25d2   :  { %v2968_v21 = vrot.slane %v2967_v19, 1  ;;  %v2953_v31 = vadd.f32 %v2952_v15, %v2951_v8 }
0x25d4   :  { %v3437_v50 = vpop.eup %3436  ;;  %v2969_v23 = vadd.f32 %v2968_v21, %v2967_v19  ;;  %v2954_v2 = vrot.slane %v2953_v31, 1 }
0x25d5   :  { %v2971_v24 = vmul.f32 %v3437_v50, %v2962_v14  ;;  %vm2976_vm0 = vweird.f32 %v3437_v50 }
0x25d6   :  { %3438 = vrcp.f32 %v2969_v23  ;;  %vm2977_vm13 = vmor %vm2975_vm2, %vm2976_vm0  ;;  %v2996_v41 = vand.u32 2147483648, %v2969_v23  ;;  %v2994_v43 = vand.u32 2147483647, %v2969_v23  ;;  %vm2990_vm3 = vweird.f32 %v2969_v23 }
0x25d7   :  { %v2972_v61 = vsub.f32 1.0, %v2971_v24  ;;  %v2955_v54 = vadd.f32 %v2954_v2, %v2953_v31 }
0x25d8   :  { %v2997_v47 = vor.u32 1.1754944e-38, %v2996_v41  ;;  %vm2995_vm4 = vcmp.eq.f32.partialorder %v2994_v43, 8.507059e+37 }
0x25d9   :  { %v2973_v26 = vmul.f32 %v3437_v50, %v2972_v61 }
0x25db   :  { %v2974_v34 = vadd.f32 %v3437_v50, %v2973_v26 }
0x25dc   :  { %v3439_v28 = vpop.eup %3438 }
0x25dd   :  { %v2986_v35 = vmul.f32 %v3439_v28, %v2969_v23  ;;  %v2978_v25 = vsel %vm2977_vm13, %v3437_v50, %v2974_v34  ;;  %vm2991_vm14 = vweird.f32 %v3439_v28 }
0x25de   :  { %v2983_v49 = vsel %vm2980_vm15, %v2982_v44, %v2978_v25  ;;  %vm2992_vm10 = vmor %vm2990_vm3, %vm2991_vm14 }
0x25df   :  { %v2987_v3 = vsub.f32 1.0, %v2986_v35  ;;  %v2984_v42 = vmul.f32 %v2983_v49, %v2948_v4 }
0x25e1   :  { %v2988_v22 = vmul.f32 %v3439_v28, %v2987_v3 }
0x25e3   :  { %v2989_v51 = vadd.f32 %v3439_v28, %v2988_v22 }
0x25e5   :  { %v2993_v13 = vsel %vm2992_vm10, %v3439_v28, %v2989_v51 }
0x25e6   :  { %v2998_v53 = vsel %vm2995_vm4, %v2997_v47, %v2993_v13 }
0x25e7   :  { %v2999_v55 = vmul.f32 %v2998_v53, %v2955_v54 }
0x25e9   :  { %v3014_v52 = vsel %vm251_vm1, %v2999_v55, %v2984_v42 }
0x25ea   :  { %3158 = vmatmul.msk.f32.vlgmr.msrb.gmra.mxu1 %vm201_vm11, %v3014_v52 }
0x2667   :  { %v3034_v48 = vpop.f32.mrf.mxu1 }
0x2668   :  { %v3035_v29 = vadd.f32 %v3175_v6, %v3034_v48 }
0x266a   :  { %v3038_v1 = vand.u32 2147483647, %v3035_v29  ;;  %3047 = vst.msk [vmem:[#allocation14] sm:$0x3] %vm3046_vm5, %v3035_v29  ;;  %v3037_v63 = vmax.f32 %v3035_v29, 0.0 }
0x266b   :  { %3063 = dma.vmem_to_hbm [thread:$0]  %s3059_s21, 32, %s3061_s23, [#allocation7]  }
0x266c   :  { %v3039_v32 = vsub.f32 0.0, %v3038_v1 }
0x266e   :  { %v3040_v38 = vmul.f32 1.442695, %v3039_v32 }
0x2670   :  { %3440 = vpow2.f32 %v3040_v38 }
0x2676   :  { %v3441_v62 = vpop.eup %3440 }
0x2677   :  { %v3042_v59 = vadd.f32 1.0, %v3441_v62 }
0x2679   :  { %3442 = vlog2.f32 %v3042_v59 }
0x267f   :  { %v3443_v7 = vpop.eup %3442 }
0x2680   :  { %v3044_v9 = vmul.f32 0.6931472, %v3443_v7 }
0x2682   :  { %v3045_v33 = vadd.f32 %v3044_v9, %v3037_v63 }
0x2684   :  { %3049 = vrot.lane.b32.xlu2 %v3045_v33, %s3635_s10 }
0x26de   :  { %v3050_v0 = vpop.permute.xlu2 %3049 }
0x26df   :  { %3052 = vst.msk [vmem:[#allocation15] sm:$0x3] %vm3046_vm5, %v3050_v0 }
0x26e0   :  { %3074 = dma.vmem_to_hbm [thread:$0]  %s3070_s24, 32, %s3072_s7, [#allocation16]  }
0x26e1   :  { %3618 = dma.done.wait [#allocation7], 32  }
0x26e2   :  { %3619 = vsyncadd [#allocation7], 4294967264 }
0x26e3   :  { %3620 = dma.done.wait [#allocation16], 32  }
0x26e4   :  { %3621 = vsyncadd [#allocation16], 4294967264 }
0x26e5   :  { %3083 = vsyncpa [#allocation6], 1 }
0x26e6   :  { %3084 = vsyncpa [#allocation9], 1 }
0x26e7   :  { %3085 = vsyncpa [#allocation12], 1 }
0x26e8   :  { %3086 = vsyncpa [#allocation7], 1 }
0x26e9   :  { %3087 = vsyncpa [#allocation16], 1 }

</bundles_post_ra>
